<compile_context>
chip_gen: v7x
topology: tpu7x:2x2x1
jax: 0.10.0
libtpu: 0.0.40
codegen_flags: <defaults>
</compile_context>

<pallas_src>
import jax
import jax.numpy as jnp
from jax import lax
from jax.experimental import pallas as pl
from jax.experimental.pallas import tpu as pltpu


def _round_up(x, m):
    return ((x + m - 1) // m) * m


# ---------------------------------------------------------------------------
# Fused Seq2Seq kernel builder
# ---------------------------------------------------------------------------
def _build_seq2seq_call(S, Td, Bp, E, H, Hg, Vp, TN):
    """S: src_len, Td: trg_len-1, Bp: padded batch, Hg: per-gate column
    stride (lane aligned), Vp: padded vocab, TN: fc vocab tile."""
    H3g = 3 * Hg
    n_tiles = Vp // TN

    def kernel(enc_x_ref, dec_x_ref,
               enc_wi_ref, enc_wh_ref, enc_bgi_ref, enc_bhn_ref,
               dec_wi_ref, dec_wh_ref, dec_bgi_ref, dec_bhn_ref,
               wfc_ref, bfc_ref,
               out_ref,
               enc_gi_sc, dec_gi_sc, hs_sc):

        # ---- recurrent phase: runs once, on the first vocab tile ----------
        # Scratch buffers persist across the sequential vocab grid axis.
        @pl.when(pl.program_id(0) == 0)
        def _recurrence():
            # Hoisted loop-invariant loads / broadcasts (JAX does not CSE
            # broadcast_in_dim -> do them once, not per iteration).
            enc_wh = enc_wh_ref[...]                      # bf16 (H, 3Hg)
            dec_wh = dec_wh_ref[...]
            enc_bhn = jnp.broadcast_to(enc_bhn_ref[...], (Bp, H))
            dec_bhn = jnp.broadcast_to(dec_bhn_ref[...], (Bp, H))

            # Input-side gate pre-activations for ALL time steps: two large
            # MXU-friendly bf16 matmuls (f32 accumulate) hoisted out of the
            # serial recurrences.  b_ih plus the r/z parts of b_hh are folded
            # into the bias already.
            enc_gi_sc[...] = (
                jnp.dot(enc_x_ref[...], enc_wi_ref[...],
                        preferred_element_type=jnp.float32)
                + enc_bgi_ref[...]).astype(jnp.bfloat16)
            dec_gi_sc[...] = (
                jnp.dot(dec_x_ref[...], dec_wi_ref[...],
                        preferred_element_type=jnp.float32)
                + dec_bgi_ref[...]).astype(jnp.bfloat16)

            def gru_cell(gi, h, wh, bhn):
                # gi = x@Wi + b_ih + [b_hr|b_hz|0]  (precomputed)
                # gh = h@Wh                          (bias-free)
                # PyTorch nn.GRU:
                #   r = sig(gi_r + gh_r); z = sig(gi_z + gh_z)
                #   n = tanh(gi_n + r*(gh_n + b_hn)); h' = n + z*(h - n)
                gh = jnp.dot(h.astype(jnp.bfloat16), wh,
                             preferred_element_type=jnp.float32)
                gi = gi.astype(jnp.float32)
                # Per-gate columns start on 128-lane boundaries -> free views.
                r = jax.nn.sigmoid(gi[:, 0 * Hg:0 * Hg + H]
                                   + gh[:, 0 * Hg:0 * Hg + H])
                z = jax.nn.sigmoid(gi[:, 1 * Hg:1 * Hg + H]
                                   + gh[:, 1 * Hg:1 * Hg + H])
                n = jnp.tanh(gi[:, 2 * Hg:2 * Hg + H]
                             + r * (gh[:, 2 * Hg:2 * Hg + H] + bhn))
                return n + z * (h - n)

            enc_unroll = True if S <= 16 else 8
            dec_unroll = True if Td <= 16 else 8

            # encoder recurrence (zero initial hidden)
            def enc_body(t, h):
                row = pl.multiple_of(t * Bp, Bp)
                gi = enc_gi_sc[pl.ds(row, Bp), :]
                return gru_cell(gi, h, enc_wh, enc_bhn)

            h_enc = lax.fori_loop(0, S, enc_body,
                                  jnp.zeros((Bp, H), jnp.float32),
                                  unroll=enc_unroll)

            # decoder recurrence (teacher forcing); per-step hidden stored in
            # bf16 VMEM scratch for the deferred, tiled fc projection.
            def dec_body(t, h):
                row = pl.multiple_of(t * Bp, Bp)
                gi = dec_gi_sc[pl.ds(row, Bp), :]
                h_new = gru_cell(gi, h, dec_wh, dec_bhn)
                hs_sc[pl.ds(row, Bp), :] = h_new.astype(jnp.bfloat16)
                return h_new

            lax.fori_loop(0, Td, dec_body, h_enc, unroll=dec_unroll)

        # ---- fc projection for this vocab tile: lane-dense, written -------
        # straight into the (pipelined) output block.
        logits = (jnp.dot(hs_sc[...], wfc_ref[...],
                          preferred_element_type=jnp.float32)
                  + bfc_ref[...])
        out_ref[...] = logits.astype(out_ref.dtype)

    # ------------------------------------------------------------------ specs
    in_specs = [
        pl.BlockSpec((S * Bp, E), lambda j: (0, 0)),      # enc_x   (bf16)
        pl.BlockSpec((Td * Bp, E), lambda j: (0, 0)),     # dec_x   (bf16)
        pl.BlockSpec((E, H3g), lambda j: (0, 0)),         # enc_wi  (bf16)
        pl.BlockSpec((H, H3g), lambda j: (0, 0)),         # enc_wh  (bf16)
        pl.BlockSpec((1, H3g), lambda j: (0, 0)),         # enc_bgi (f32)
        pl.BlockSpec((1, H), lambda j: (0, 0)),           # enc_bhn (f32)
        pl.BlockSpec((E, H3g), lambda j: (0, 0)),         # dec_wi  (bf16)
        pl.BlockSpec((H, H3g), lambda j: (0, 0)),         # dec_wh  (bf16)
        pl.BlockSpec((1, H3g), lambda j: (0, 0)),         # dec_bgi (f32)
        pl.BlockSpec((1, H), lambda j: (0, 0)),           # dec_bhn (f32)
        pl.BlockSpec((H, TN), lambda j: (0, j)),          # wfc tile (bf16)
        pl.BlockSpec((1, TN), lambda j: (0, j)),          # bfc tile (f32)
    ]
    out_specs = pl.BlockSpec((Td * Bp, TN), lambda j: (0, j))

    scratch_shapes = [
        pltpu.VMEM((S * Bp, H3g), jnp.bfloat16),   # encoder x@Wi (+bias)
        pltpu.VMEM((Td * Bp, H3g), jnp.bfloat16),  # decoder x@Wi (+bias)
        pltpu.VMEM((Td * Bp, H), jnp.bfloat16),    # decoder hidden states
    ]

    # VMEM budget (resident inputs + double-buffered tiled fc/out + scratch).
    resident = (
        (S * Bp * E + Td * Bp * E) * 2              # activations (bf16)
        + 2 * (E * H3g + H * H3g) * 2               # GRU weights (bf16)
        + 2 * (H3g + H) * 4                         # GRU biases (f32)
        + 2 * (H * TN * 2 + TN * 4)                 # wfc/bfc tile, dbl-buffered
        + 2 * (Td * Bp * TN * 4)                    # out tile, dbl-buffered
        + (S * Bp + Td * Bp) * H3g * 2              # gi scratches (bf16)
        + Td * Bp * H * 2)                          # hidden-state scratch
    vmem_limit = min(128 << 20, max(32 << 20, int(resident * 1.5) + (2 << 20)))

    flops = int(2 * S * Bp * E * H3g + 2 * Td * Bp * E * H3g
                + 2 * (S + Td) * Bp * H * H3g
                + 2 * Td * Bp * H * Vp)
    transcendentals = int((S + Td) * Bp * 3 * H)
    bytes_in = ((S * Bp * E + Td * Bp * E + 2 * (E * H3g + H * H3g)
                 + H * Vp) * 2
                + (2 * (H3g + H) + Vp) * 4)
    bytes_out = Td * Bp * Vp * 4
    cost = pl.CostEstimate(flops=flops, transcendentals=transcendentals,
                           bytes_accessed=int(bytes_in + bytes_out))

    return pl.pallas_call(
        kernel,
        out_shape=jax.ShapeDtypeStruct((Td * Bp, Vp), jnp.float32),
        grid=(n_tiles,),
        in_specs=in_specs,
        out_specs=out_specs,
        scratch_shapes=scratch_shapes,
        compiler_params=pltpu.CompilerParams(
            dimension_semantics=("arbitrary",),
            vmem_limit_bytes=vmem_limit),
        cost_estimate=cost,
    )


# ---------------------------------------------------------------------------
# Parameter initialization (deterministic, synthetic)
# ---------------------------------------------------------------------------
def _gru_params(key, in_dim, hidden):
    ks = jax.random.split(key, 4)
    s = 0.1
    return {
        "wi": jax.random.normal(ks[0], (in_dim, 3 * hidden), jnp.float32) * s,
        "wh": jax.random.normal(ks[1], (hidden, 3 * hidden), jnp.float32) * s,
        "bi": jax.random.normal(ks[2], (1, 3 * hidden), jnp.float32) * s,
        "bh": jax.random.normal(ks[3], (1, 3 * hidden), jnp.float32) * s,
    }


def init_params(key, src_vocab, trg_vocab, emb, hidden):
    k1, k2, k3, k4, k5, k6 = jax.random.split(key, 6)
    dec = _gru_params(k4, emb, hidden)
    dec["wfc"] = jax.random.normal(k5, (hidden, trg_vocab), jnp.float32) * 0.1
    dec["bfc"] = jax.random.normal(k6, (1, trg_vocab), jnp.float32) * 0.1
    return {
        "enc_emb": jax.random.normal(k1, (src_vocab, emb), jnp.float32) * 0.1,
        "dec_emb": jax.random.normal(k2, (trg_vocab, emb), jnp.float32) * 0.1,
        "enc": _gru_params(k3, emb, hidden),
        "dec": dec,
    }


# ---------------------------------------------------------------------------
# Seq2Seq forward (teacher forcing path), Pallas kernel + thin XLA glue
# ---------------------------------------------------------------------------
def seq2seq_forward(params, src, trg):
    B, S = src.shape
    _, T = trg.shape
    assert T >= 2
    Td = T - 1
    E = params["enc_emb"].shape[1]
    H = params["enc"]["wh"].shape[0]
    V = params["dec"]["wfc"].shape[1]

    # bf16 activations/scratches pack 16 rows per sublane tile -> pad batch
    # to a multiple of 16 so per-timestep row slices stay tile aligned.
    Bp = max(16, _round_up(B, 16))
    Vp = max(128, _round_up(V, 128))     # lane-dense vocab for the fc output
    Hg = _round_up(H, 128)               # per-gate column stride (lane aligned)
    TN = next(t for t in (512, 384, 256, 128) if Vp % t == 0)  # fc vocab tile

    def pad_gate_cols(w):
        # (rows, 3H) -> (rows, 3Hg): gate g occupies cols [g*Hg, g*Hg+H).
        out = jnp.zeros((w.shape[0], 3 * Hg), jnp.float32)
        for g in range(3):
            out = out.at[:, g * Hg:g * Hg + H].set(w[:, g * H:(g + 1) * H])
        return out

    def folded_bias(p):
        # Fold b_ih and the r/z parts of b_hh into the hoisted gi precompute;
        # b_hn stays separate (it sits inside the r* term in nn.GRU).
        bi, bh = p["bi"], p["bh"]
        bgi = jnp.concatenate([bi[:, :H] + bh[:, :H],
                               bi[:, H:2 * H] + bh[:, H:2 * H],
                               bi[:, 2 * H:]], axis=1)
        return pad_gate_cols(bgi), bh[:, 2 * H:]

    enc_wi = pad_gate_cols(params["enc"]["wi"]).astype(jnp.bfloat16)
    enc_wh = pad_gate_cols(params["enc"]["wh"]).astype(jnp.bfloat16)
    dec_wi = pad_gate_cols(params["dec"]["wi"]).astype(jnp.bfloat16)
    dec_wh = pad_gate_cols(params["dec"]["wh"]).astype(jnp.bfloat16)
    enc_bgi, enc_bhn = folded_bias(params["enc"])
    dec_bgi, dec_bhn = folded_bias(params["dec"])

    # Pad tokens along batch (padded rows are discarded after the kernel).
    src_p = jnp.zeros((Bp, S), src.dtype).at[:B].set(src)
    dec_tok_p = jnp.zeros((Bp, Td), trg.dtype).at[:B].set(trg[:, :Td])

    # Time-major embedding gather: transpose the tiny token matrices, not the
    # embedded activations; flatten to (T*Bp, E); bf16 for the MXU.
    enc_x = params["enc_emb"][src_p.T].reshape(S * Bp, E).astype(jnp.bfloat16)
    dec_x = params["dec_emb"][dec_tok_p.T].reshape(Td * Bp, E).astype(jnp.bfloat16)

    # Zero-pad fc weights to the lane-dense padded vocab; bf16 weights.
    wfc_p = jnp.zeros((H, Vp), jnp.float32).at[:, :V].set(
        params["dec"]["wfc"]).astype(jnp.bfloat16)
    bfc_p = jnp.zeros((1, Vp), jnp.float32).at[:, :V].set(params["dec"]["bfc"])

    fused = _build_seq2seq_call(S, Td, Bp, E, H, Hg, Vp, TN)
    logits_p = fused(enc_x, dec_x,
                     enc_wi, enc_wh, enc_bgi, enc_bhn,
                     dec_wi, dec_wh, dec_bgi, dec_bhn,
                     wfc_p, bfc_p)                       # (Td*Bp, Vp)

    logits = logits_p.reshape(Td, Bp, Vp)[:, :B, :V]     # (Td, B, V)
    outputs = jnp.zeros((B, T, V), jnp.float32)
    outputs = outputs.at[:, 1:, :].set(jnp.transpose(logits, (1, 0, 2)))
    return outputs


# ---------------------------------------------------------------------------
# Pure-JAX reference (teacher forcing), for a correctness check
# ---------------------------------------------------------------------------
def reference_forward(params, src, trg):
    B, S = src.shape
    _, T = trg.shape
    H = params["enc"]["wh"].shape[0]
    V = params["dec"]["wfc"].shape[1]

    def cell(p, x, h):
        gi = x @ p["wi"] + p["bi"]
        gh = h @ p["wh"] + p["bh"]
        r = jax.nn.sigmoid(gi[:, :H] + gh[:, :H])
        z = jax.nn.sigmoid(gi[:, H:2 * H] + gh[:, H:2 * H])
        n = jnp.tanh(gi[:, 2 * H:] + r * gh[:, 2 * H:])
        return (1.0 - z) * n + z * h

    h = jnp.zeros((B, H), jnp.float32)
    enc_x = params["enc_emb"][src]                # (B, S, E)
    for s in range(S):
        h = cell(params["enc"], enc_x[:, s], h)

    outputs = jnp.zeros((B, T, V), jnp.float32)
    dec_x = params["dec_emb"][trg]                # (B, T, E)
    for t in range(1, T):
        h = cell(params["dec"], dec_x[:, t - 1], h)
        logit = h @ params["dec"]["wfc"] + params["dec"]["bfc"]
        outputs = outputs.at[:, t, :].set(logit)
    return outputs


if __name__ == "__main__":
    B, SRC_LEN, TRG_LEN = 2, 8, 8
    SRC_VOCAB, TRG_VOCAB = 24, 16
    EMB, HIDDEN = 32, 32

    key = jax.random.PRNGKey(0)
    k_params, k_src, k_trg = jax.random.split(key, 3)

    params = init_params(k_params, SRC_VOCAB, TRG_VOCAB, EMB, HIDDEN)
    src = jax.random.randint(k_src, (B, SRC_LEN), 0, SRC_VOCAB, jnp.int32)
    trg = jax.random.randint(k_trg, (B, TRG_LEN), 0, TRG_VOCAB, jnp.int32)

    outputs = jax.jit(seq2seq_forward)(params, src, trg)
    outputs = jax.block_until_ready(outputs)

    assert outputs.shape == (B, TRG_LEN, TRG_VOCAB)
    assert bool(jnp.all(outputs[:, 0, :] == 0.0))
    assert bool(jnp.all(jnp.isfinite(outputs)))

    ref = reference_forward(params, src, trg)
    max_err = float(jnp.max(jnp.abs(outputs - ref)))
    # bf16 MXU operands / bf16 scratches -> ~1e-3-level deltas vs f32 ref.
    assert bool(jnp.allclose(outputs, ref, rtol=2e-2, atol=2e-2)), max_err

    print("KERNEL_OK")
</pallas_src>

<mosaic_0001>
module attributes {stable_mosaic.version = 11 : i64} {
  func.func @kernel(%arg0: i32, %arg1: memref<128x32xbf16, #tpu.memory_space<vmem>>, %arg2: memref<112x32xbf16, #tpu.memory_space<vmem>>, %arg3: memref<32x384xbf16, #tpu.memory_space<vmem>>, %arg4: memref<32x384xbf16, #tpu.memory_space<vmem>>, %arg5: memref<1x384xf32, #tpu.memory_space<vmem>>, %arg6: memref<1x32xf32, #tpu.memory_space<vmem>>, %arg7: memref<32x384xbf16, #tpu.memory_space<vmem>>, %arg8: memref<32x384xbf16, #tpu.memory_space<vmem>>, %arg9: memref<1x384xf32, #tpu.memory_space<vmem>>, %arg10: memref<1x32xf32, #tpu.memory_space<vmem>>, %arg11: memref<32x128xbf16, #tpu.memory_space<vmem>>, %arg12: memref<1x128xf32, #tpu.memory_space<vmem>>, %arg13: memref<112x128xf32, #tpu.memory_space<vmem>>, %arg14: memref<128x384xbf16, #tpu.memory_space<vmem>>, %arg15: memref<112x384xbf16, #tpu.memory_space<vmem>>, %arg16: memref<112x32xbf16, #tpu.memory_space<vmem>>) attributes {dimension_semantics = [#tpu.dimension_semantics<arbitrary>], iteration_bounds = array<i64: 1>, scalar_prefetch = 0 : i64, scratch_operands = 3 : i64, tpu.core_type = #tpu.core_type<tc>, window_params = [{pipeline_mode = #tpu.pipeline_mode<synchronous>, transform_indices = @transform_0, window_bounds = array<i64: 128, 32>}, {pipeline_mode = #tpu.pipeline_mode<synchronous>, transform_indices = @transform_1, window_bounds = array<i64: 112, 32>}, {pipeline_mode = #tpu.pipeline_mode<synchronous>, transform_indices = @transform_2, window_bounds = array<i64: 32, 384>}, {pipeline_mode = #tpu.pipeline_mode<synchronous>, transform_indices = @transform_3, window_bounds = array<i64: 32, 384>}, {pipeline_mode = #tpu.pipeline_mode<synchronous>, transform_indices = @transform_4, window_bounds = array<i64: 1, 384>}, {pipeline_mode = #tpu.pipeline_mode<synchronous>, transform_indices = @transform_5, window_bounds = array<i64: 1, 32>}, {pipeline_mode = #tpu.pipeline_mode<synchronous>, transform_indices = @transform_6, window_bounds = array<i64: 32, 384>}, {pipeline_mode = #tpu.pipeline_mode<synchronous>, transform_indices = @transform_7, window_bounds = array<i64: 32, 384>}, {pipeline_mode = #tpu.pipeline_mode<synchronous>, transform_indices = @transform_8, window_bounds = array<i64: 1, 384>}, {pipeline_mode = #tpu.pipeline_mode<synchronous>, transform_indices = @transform_9, window_bounds = array<i64: 1, 32>}, {transform_indices = @transform_10, window_bounds = array<i64: 32, 128>}, {transform_indices = @transform_11, window_bounds = array<i64: 1, 128>}, {transform_indices = @transform_12, window_bounds = array<i64: 112, 128>}]} {
    %c0_i32 = arith.constant 0 : i32
    %0 = arith.cmpi eq, %arg0, %c0_i32 : i32
    %1 = arith.extui %0 : i1 to i32
    %c0_i32_0 = arith.constant 0 : i32
    %2 = arith.cmpi ne, %1, %c0_i32_0 : i32
    scf.if %2 {
      %c0_8 = arith.constant 0 : index
      %c0_9 = arith.constant 0 : index
      %10 = vector.load %arg4[%c0_8, %c0_9] : memref<32x384xbf16, #tpu.memory_space<vmem>>, vector<32x384xbf16>
      %c0_10 = arith.constant 0 : index
      %c0_11 = arith.constant 0 : index
      %11 = vector.load %arg8[%c0_10, %c0_11] : memref<32x384xbf16, #tpu.memory_space<vmem>>, vector<32x384xbf16>
      %c0_12 = arith.constant 0 : index
      %c0_13 = arith.constant 0 : index
      %12 = vector.load %arg6[%c0_12, %c0_13] : memref<1x32xf32, #tpu.memory_space<vmem>>, vector<1x32xf32>
      %13 = vector.shape_cast %12 : vector<1x32xf32> to vector<1x32xf32>
      %14 = vector.broadcast %13 : vector<1x32xf32> to vector<16x32xf32>
      %c0_14 = arith.constant 0 : index
      %c0_15 = arith.constant 0 : index
      %15 = vector.load %arg10[%c0_14, %c0_15] : memref<1x32xf32, #tpu.memory_space<vmem>>, vector<1x32xf32>
      %16 = vector.shape_cast %15 : vector<1x32xf32> to vector<1x32xf32>
      %17 = vector.broadcast %16 : vector<1x32xf32> to vector<16x32xf32>
      %c0_16 = arith.constant 0 : index
      %c0_17 = arith.constant 0 : index
      %18 = vector.load %arg1[%c0_16, %c0_17] : memref<128x32xbf16, #tpu.memory_space<vmem>>, vector<128x32xbf16>
      %c0_18 = arith.constant 0 : index
      %c0_19 = arith.constant 0 : index
      %19 = vector.load %arg3[%c0_18, %c0_19] : memref<32x384xbf16, #tpu.memory_space<vmem>>, vector<32x384xbf16>
      %cst_20 = arith.constant dense<0.000000e+00> : vector<128x384xf32>
      %20 = tpu.matmul %18, %19, %cst_20 {dimension_numbers = #tpu.dot_dimension_numbers<[1], [0], [0], [1], [0, 0, 1, 1], [], []>} : vector<128x32xbf16>, vector<32x384xbf16>, vector<128x384xf32> -> vector<128x384xf32>
      %c0_21 = arith.constant 0 : index
      %c0_22 = arith.constant 0 : index
      %21 = vector.load %arg5[%c0_21, %c0_22] : memref<1x384xf32, #tpu.memory_space<vmem>>, vector<1x384xf32>
      %22 = vector.broadcast %21 : vector<1x384xf32> to vector<128x384xf32>
      %23 = arith.addf %20, %22 : vector<128x384xf32>
      %24 = arith.truncf %23 : vector<128x384xf32> to vector<128x384xbf16>
      %c0_23 = arith.constant 0 : index
      %c0_24 = arith.constant 0 : index
      %25 = vector.load %arg14[%c0_23, %c0_24] : memref<128x384xbf16, #tpu.memory_space<vmem>>, vector<128x384xbf16>
      tpu.vector_store %arg14[%c0_23, %c0_24], %24 {strides = array<i32>} : memref<128x384xbf16, #tpu.memory_space<vmem>>, vector<128x384xbf16>,
      %c0_25 = arith.constant 0 : index
      %c0_26 = arith.constant 0 : index
      %26 = vector.load %arg2[%c0_25, %c0_26] : memref<112x32xbf16, #tpu.memory_space<vmem>>, vector<112x32xbf16>
      %c0_27 = arith.constant 0 : index
      %c0_28 = arith.constant 0 : index
      %27 = vector.load %arg7[%c0_27, %c0_28] : memref<32x384xbf16, #tpu.memory_space<vmem>>, vector<32x384xbf16>
      %cst_29 = arith.constant dense<0.000000e+00> : vector<112x384xf32>
      %28 = tpu.matmul %26, %27, %cst_29 {dimension_numbers = #tpu.dot_dimension_numbers<[1], [0], [0], [1], [0, 0, 1, 1], [], []>} : vector<112x32xbf16>, vector<32x384xbf16>, vector<112x384xf32> -> vector<112x384xf32>
      %c0_30 = arith.constant 0 : index
      %c0_31 = arith.constant 0 : index
      %29 = vector.load %arg9[%c0_30, %c0_31] : memref<1x384xf32, #tpu.memory_space<vmem>>, vector<1x384xf32>
      %30 = vector.broadcast %29 : vector<1x384xf32> to vector<112x384xf32>
      %31 = arith.addf %28, %30 : vector<112x384xf32>
      %32 = arith.truncf %31 : vector<112x384xf32> to vector<112x384xbf16>
      %c0_32 = arith.constant 0 : index
      %c0_33 = arith.constant 0 : index
      %33 = vector.load %arg15[%c0_32, %c0_33] : memref<112x384xbf16, #tpu.memory_space<vmem>>, vector<112x384xbf16>
      tpu.vector_store %arg15[%c0_32, %c0_33], %32 {strides = array<i32>} : memref<112x384xbf16, #tpu.memory_space<vmem>>, vector<112x384xbf16>,
      %cst_34 = arith.constant 0.000000e+00 : f32
      %34 = vector.broadcast %cst_34 : f32 to vector<16x32xf32>
      %c0_i32_35 = arith.constant 0 : i32
      %c16_i32 = arith.constant 16 : i32
      %35 = arith.muli %c0_i32_35, %c16_i32 : i32
      %36 = tpu.assume_multiple %35, 16 : i32
      %37 = arith.index_cast %36 : i32 to index
      %c0_36 = arith.constant 0 : index
      %38 = vector.load %arg14[%37, %c0_36] : memref<128x384xbf16, #tpu.memory_space<vmem>>, vector<16x384xbf16>
      %39 = arith.truncf %34 : vector<16x32xf32> to vector<16x32xbf16>
      %cst_37 = arith.constant dense<0.000000e+00> : vector<16x384xf32>
      %40 = tpu.matmul %39, %10, %cst_37 {dimension_numbers = #tpu.dot_dimension_numbers<[1], [0], [0], [1], [0, 0, 1, 1], [], []>} : vector<16x32xbf16>, vector<32x384xbf16>, vector<16x384xf32> -> vector<16x384xf32>
      %41 = arith.extf %38 : vector<16x384xbf16> to vector<16x384xf32>
      %42 = vector.extract_strided_slice %41 {offsets = [0, 0], sizes = [16, 32], strides = [1, 1]} : vector<16x384xf32> to vector<16x32xf32>
      %43 = vector.extract_strided_slice %40 {offsets = [0, 0], sizes = [16, 32], strides = [1, 1]} : vector<16x384xf32> to vector<16x32xf32>
      %44 = arith.addf %42, %43 : vector<16x32xf32>
      %45 = arith.negf %44 : vector<16x32xf32>
      %46 = math.exp %45 : vector<16x32xf32>
      %cst_38 = arith.constant 1.000000e+00 : f32
      %47 = vector.broadcast %cst_38 : f32 to vector<16x32xf32>
      %48 = arith.addf %47, %46 : vector<16x32xf32>
      %49 = arith.divf %47, %48 : vector<16x32xf32>
      %50 = vector.extract_strided_slice %41 {offsets = [0, 128], sizes = [16, 32], strides = [1, 1]} : vector<16x384xf32> to vector<16x32xf32>
      %51 = vector.extract_strided_slice %40 {offsets = [0, 128], sizes = [16, 32], strides = [1, 1]} : vector<16x384xf32> to vector<16x32xf32>
      %52 = arith.addf %50, %51 : vector<16x32xf32>
      %53 = arith.negf %52 : vector<16x32xf32>
      %54 = math.exp %53 : vector<16x32xf32>
      %cst_39 = arith.constant 1.000000e+00 : f32
      %55 = vector.broadcast %cst_39 : f32 to vector<16x32xf32>
      %56 = arith.addf %55, %54 : vector<16x32xf32>
      %57 = arith.divf %55, %56 : vector<16x32xf32>
      %58 = vector.extract_strided_slice %41 {offsets = [0, 256], sizes = [16, 32], strides = [1, 1]} : vector<16x384xf32> to vector<16x32xf32>
      %59 = vector.extract_strided_slice %40 {offsets = [0, 256], sizes = [16, 32], strides = [1, 1]} : vector<16x384xf32> to vector<16x32xf32>
      %60 = arith.addf %59, %14 : vector<16x32xf32>
      %61 = arith.mulf %49, %60 : vector<16x32xf32>
      %62 = arith.addf %58, %61 : vector<16x32xf32>
      %63 = math.tanh %62 : vector<16x32xf32>
      %64 = arith.subf %34, %63 : vector<16x32xf32>
      %65 = arith.mulf %57, %64 : vector<16x32xf32>
      %66 = arith.addf %63, %65 : vector<16x32xf32>
      %c1_i32 = arith.constant 1 : i32
      %c16_i32_40 = arith.constant 16 : i32
      %67 = arith.muli %c1_i32, %c16_i32_40 : i32
      %68 = tpu.assume_multiple %67, 16 : i32
      %69 = arith.index_cast %68 : i32 to index
      %c0_41 = arith.constant 0 : index
      %70 = vector.load %arg14[%69, %c0_41] : memref<128x384xbf16, #tpu.memory_space<vmem>>, vector<16x384xbf16>
      %71 = arith.truncf %66 : vector<16x32xf32> to vector<16x32xbf16>
      %cst_42 = arith.constant dense<0.000000e+00> : vector<16x384xf32>
      %72 = tpu.matmul %71, %10, %cst_42 {dimension_numbers = #tpu.dot_dimension_numbers<[1], [0], [0], [1], [0, 0, 1, 1], [], []>} : vector<16x32xbf16>, vector<32x384xbf16>, vector<16x384xf32> -> vector<16x384xf32>
      %73 = arith.extf %70 : vector<16x384xbf16> to vector<16x384xf32>
      %74 = vector.extract_strided_slice %73 {offsets = [0, 0], sizes = [16, 32], strides = [1, 1]} : vector<16x384xf32> to vector<16x32xf32>
      %75 = vector.extract_strided_slice %72 {offsets = [0, 0], sizes = [16, 32], strides = [1, 1]} : vector<16x384xf32> to vector<16x32xf32>
      %76 = arith.addf %74, %75 : vector<16x32xf32>
      %77 = arith.negf %76 : vector<16x32xf32>
      %78 = math.exp %77 : vector<16x32xf32>
      %cst_43 = arith.constant 1.000000e+00 : f32
      %79 = vector.broadcast %cst_43 : f32 to vector<16x32xf32>
      %80 = arith.addf %79, %78 : vector<16x32xf32>
      %81 = arith.divf %79, %80 : vector<16x32xf32>
      %82 = vector.extract_strided_slice %73 {offsets = [0, 128], sizes = [16, 32], strides = [1, 1]} : vector<16x384xf32> to vector<16x32xf32>
      %83 = vector.extract_strided_slice %72 {offsets = [0, 128], sizes = [16, 32], strides = [1, 1]} : vector<16x384xf32> to vector<16x32xf32>
      %84 = arith.addf %82, %83 : vector<16x32xf32>
      %85 = arith.negf %84 : vector<16x32xf32>
      %86 = math.exp %85 : vector<16x32xf32>
      %cst_44 = arith.constant 1.000000e+00 : f32
      %87 = vector.broadcast %cst_44 : f32 to vector<16x32xf32>
      %88 = arith.addf %87, %86 : vector<16x32xf32>
      %89 = arith.divf %87, %88 : vector<16x32xf32>
      %90 = vector.extract_strided_slice %73 {offsets = [0, 256], sizes = [16, 32], strides = [1, 1]} : vector<16x384xf32> to vector<16x32xf32>
      %91 = vector.extract_strided_slice %72 {offsets = [0, 256], sizes = [16, 32], strides = [1, 1]} : vector<16x384xf32> to vector<16x32xf32>
      %92 = arith.addf %91, %14 : vector<16x32xf32>
      %93 = arith.mulf %81, %92 : vector<16x32xf32>
      %94 = arith.addf %90, %93 : vector<16x32xf32>
      %95 = math.tanh %94 : vector<16x32xf32>
      %96 = arith.subf %66, %95 : vector<16x32xf32>
      %97 = arith.mulf %89, %96 : vector<16x32xf32>
      %98 = arith.addf %95, %97 : vector<16x32xf32>
      %c2_i32 = arith.constant 2 : i32
      %c16_i32_45 = arith.constant 16 : i32
      %99 = arith.muli %c2_i32, %c16_i32_45 : i32
      %100 = tpu.assume_multiple %99, 16 : i32
      %101 = arith.index_cast %100 : i32 to index
      %c0_46 = arith.constant 0 : index
      %102 = vector.load %arg14[%101, %c0_46] : memref<128x384xbf16, #tpu.memory_space<vmem>>, vector<16x384xbf16>
      %103 = arith.truncf %98 : vector<16x32xf32> to vector<16x32xbf16>
      %cst_47 = arith.constant dense<0.000000e+00> : vector<16x384xf32>
      %104 = tpu.matmul %103, %10, %cst_47 {dimension_numbers = #tpu.dot_dimension_numbers<[1], [0], [0], [1], [0, 0, 1, 1], [], []>} : vector<16x32xbf16>, vector<32x384xbf16>, vector<16x384xf32> -> vector<16x384xf32>
      %105 = arith.extf %102 : vector<16x384xbf16> to vector<16x384xf32>
      %106 = vector.extract_strided_slice %105 {offsets = [0, 0], sizes = [16, 32], strides = [1, 1]} : vector<16x384xf32> to vector<16x32xf32>
      %107 = vector.extract_strided_slice %104 {offsets = [0, 0], sizes = [16, 32], strides = [1, 1]} : vector<16x384xf32> to vector<16x32xf32>
      %108 = arith.addf %106, %107 : vector<16x32xf32>
      %109 = arith.negf %108 : vector<16x32xf32>
      %110 = math.exp %109 : vector<16x32xf32>
      %cst_48 = arith.constant 1.000000e+00 : f32
      %111 = vector.broadcast %cst_48 : f32 to vector<16x32xf32>
      %112 = arith.addf %111, %110 : vector<16x32xf32>
      %113 = arith.divf %111, %112 : vector<16x32xf32>
      %114 = vector.extract_strided_slice %105 {offsets = [0, 128], sizes = [16, 32], strides = [1, 1]} : vector<16x384xf32> to vector<16x32xf32>
      %115 = vector.extract_strided_slice %104 {offsets = [0, 128], sizes = [16, 32], strides = [1, 1]} : vector<16x384xf32> to vector<16x32xf32>
      %116 = arith.addf %114, %115 : vector<16x32xf32>
      %117 = arith.negf %116 : vector<16x32xf32>
      %118 = math.exp %117 : vector<16x32xf32>
      %cst_49 = arith.constant 1.000000e+00 : f32
      %119 = vector.broadcast %cst_49 : f32 to vector<16x32xf32>
      %120 = arith.addf %119, %118 : vector<16x32xf32>
      %121 = arith.divf %119, %120 : vector<16x32xf32>
      %122 = vector.extract_strided_slice %105 {offsets = [0, 256], sizes = [16, 32], strides = [1, 1]} : vector<16x384xf32> to vector<16x32xf32>
      %123 = vector.extract_strided_slice %104 {offsets = [0, 256], sizes = [16, 32], strides = [1, 1]} : vector<16x384xf32> to vector<16x32xf32>
      %124 = arith.addf %123, %14 : vector<16x32xf32>
      %125 = arith.mulf %113, %124 : vector<16x32xf32>
      %126 = arith.addf %122, %125 : vector<16x32xf32>
      %127 = math.tanh %126 : vector<16x32xf32>
      %128 = arith.subf %98, %127 : vector<16x32xf32>
      %129 = arith.mulf %121, %128 : vector<16x32xf32>
      %130 = arith.addf %127, %129 : vector<16x32xf32>
      %c3_i32 = arith.constant 3 : i32
      %c16_i32_50 = arith.constant 16 : i32
      %131 = arith.muli %c3_i32, %c16_i32_50 : i32
      %132 = tpu.assume_multiple %131, 16 : i32
      %133 = arith.index_cast %132 : i32 to index
      %c0_51 = arith.constant 0 : index
      %134 = vector.load %arg14[%133, %c0_51] : memref<128x384xbf16, #tpu.memory_space<vmem>>, vector<16x384xbf16>
      %135 = arith.truncf %130 : vector<16x32xf32> to vector<16x32xbf16>
      %cst_52 = arith.constant dense<0.000000e+00> : vector<16x384xf32>
      %136 = tpu.matmul %135, %10, %cst_52 {dimension_numbers = #tpu.dot_dimension_numbers<[1], [0], [0], [1], [0, 0, 1, 1], [], []>} : vector<16x32xbf16>, vector<32x384xbf16>, vector<16x384xf32> -> vector<16x384xf32>
      %137 = arith.extf %134 : vector<16x384xbf16> to vector<16x384xf32>
      %138 = vector.extract_strided_slice %137 {offsets = [0, 0], sizes = [16, 32], strides = [1, 1]} : vector<16x384xf32> to vector<16x32xf32>
      %139 = vector.extract_strided_slice %136 {offsets = [0, 0], sizes = [16, 32], strides = [1, 1]} : vector<16x384xf32> to vector<16x32xf32>
      %140 = arith.addf %138, %139 : vector<16x32xf32>
      %141 = arith.negf %140 : vector<16x32xf32>
      %142 = math.exp %141 : vector<16x32xf32>
      %cst_53 = arith.constant 1.000000e+00 : f32
      %143 = vector.broadcast %cst_53 : f32 to vector<16x32xf32>
      %144 = arith.addf %143, %142 : vector<16x32xf32>
      %145 = arith.divf %143, %144 : vector<16x32xf32>
      %146 = vector.extract_strided_slice %137 {offsets = [0, 128], sizes = [16, 32], strides = [1, 1]} : vector<16x384xf32> to vector<16x32xf32>
      %147 = vector.extract_strided_slice %136 {offsets = [0, 128], sizes = [16, 32], strides = [1, 1]} : vector<16x384xf32> to vector<16x32xf32>
      %148 = arith.addf %146, %147 : vector<16x32xf32>
      %149 = arith.negf %148 : vector<16x32xf32>
      %150 = math.exp %149 : vector<16x32xf32>
      %cst_54 = arith.constant 1.000000e+00 : f32
      %151 = vector.broadcast %cst_54 : f32 to vector<16x32xf32>
      %152 = arith.addf %151, %150 : vector<16x32xf32>
      %153 = arith.divf %151, %152 : vector<16x32xf32>
      %154 = vector.extract_strided_slice %137 {offsets = [0, 256], sizes = [16, 32], strides = [1, 1]} : vector<16x384xf32> to vector<16x32xf32>
      %155 = vector.extract_strided_slice %136 {offsets = [0, 256], sizes = [16, 32], strides = [1, 1]} : vector<16x384xf32> to vector<16x32xf32>
      %156 = arith.addf %155, %14 : vector<16x32xf32>
      %157 = arith.mulf %145, %156 : vector<16x32xf32>
      %158 = arith.addf %154, %157 : vector<16x32xf32>
      %159 = math.tanh %158 : vector<16x32xf32>
      %160 = arith.subf %130, %159 : vector<16x32xf32>
      %161 = arith.mulf %153, %160 : vector<16x32xf32>
      %162 = arith.addf %159, %161 : vector<16x32xf32>
      %c4_i32 = arith.constant 4 : i32
      %c16_i32_55 = arith.constant 16 : i32
      %163 = arith.muli %c4_i32, %c16_i32_55 : i32
      %164 = tpu.assume_multiple %163, 16 : i32
      %165 = arith.index_cast %164 : i32 to index
      %c0_56 = arith.constant 0 : index
      %166 = vector.load %arg14[%165, %c0_56] : memref<128x384xbf16, #tpu.memory_space<vmem>>, vector<16x384xbf16>
      %167 = arith.truncf %162 : vector<16x32xf32> to vector<16x32xbf16>
      %cst_57 = arith.constant dense<0.000000e+00> : vector<16x384xf32>
      %168 = tpu.matmul %167, %10, %cst_57 {dimension_numbers = #tpu.dot_dimension_numbers<[1], [0], [0], [1], [0, 0, 1, 1], [], []>} : vector<16x32xbf16>, vector<32x384xbf16>, vector<16x384xf32> -> vector<16x384xf32>
      %169 = arith.extf %166 : vector<16x384xbf16> to vector<16x384xf32>
      %170 = vector.extract_strided_slice %169 {offsets = [0, 0], sizes = [16, 32], strides = [1, 1]} : vector<16x384xf32> to vector<16x32xf32>
      %171 = vector.extract_strided_slice %168 {offsets = [0, 0], sizes = [16, 32], strides = [1, 1]} : vector<16x384xf32> to vector<16x32xf32>
      %172 = arith.addf %170, %171 : vector<16x32xf32>
      %173 = arith.negf %172 : vector<16x32xf32>
      %174 = math.exp %173 : vector<16x32xf32>
      %cst_58 = arith.constant 1.000000e+00 : f32
      %175 = vector.broadcast %cst_58 : f32 to vector<16x32xf32>
      %176 = arith.addf %175, %174 : vector<16x32xf32>
      %177 = arith.divf %175, %176 : vector<16x32xf32>
      %178 = vector.extract_strided_slice %169 {offsets = [0, 128], sizes = [16, 32], strides = [1, 1]} : vector<16x384xf32> to vector<16x32xf32>
      %179 = vector.extract_strided_slice %168 {offsets = [0, 128], sizes = [16, 32], strides = [1, 1]} : vector<16x384xf32> to vector<16x32xf32>
      %180 = arith.addf %178, %179 : vector<16x32xf32>
      %181 = arith.negf %180 : vector<16x32xf32>
      %182 = math.exp %181 : vector<16x32xf32>
      %cst_59 = arith.constant 1.000000e+00 : f32
      %183 = vector.broadcast %cst_59 : f32 to vector<16x32xf32>
      %184 = arith.addf %183, %182 : vector<16x32xf32>
      %185 = arith.divf %183, %184 : vector<16x32xf32>
      %186 = vector.extract_strided_slice %169 {offsets = [0, 256], sizes = [16, 32], strides = [1, 1]} : vector<16x384xf32> to vector<16x32xf32>
      %187 = vector.extract_strided_slice %168 {offsets = [0, 256], sizes = [16, 32], strides = [1, 1]} : vector<16x384xf32> to vector<16x32xf32>
      %188 = arith.addf %187, %14 : vector<16x32xf32>
      %189 = arith.mulf %177, %188 : vector<16x32xf32>
      %190 = arith.addf %186, %189 : vector<16x32xf32>
      %191 = math.tanh %190 : vector<16x32xf32>
      %192 = arith.subf %162, %191 : vector<16x32xf32>
      %193 = arith.mulf %185, %192 : vector<16x32xf32>
      %194 = arith.addf %191, %193 : vector<16x32xf32>
      %c5_i32 = arith.constant 5 : i32
      %c16_i32_60 = arith.constant 16 : i32
      %195 = arith.muli %c5_i32, %c16_i32_60 : i32
      %196 = tpu.assume_multiple %195, 16 : i32
      %197 = arith.index_cast %196 : i32 to index
      %c0_61 = arith.constant 0 : index
      %198 = vector.load %arg14[%197, %c0_61] : memref<128x384xbf16, #tpu.memory_space<vmem>>, vector<16x384xbf16>
      %199 = arith.truncf %194 : vector<16x32xf32> to vector<16x32xbf16>
      %cst_62 = arith.constant dense<0.000000e+00> : vector<16x384xf32>
      %200 = tpu.matmul %199, %10, %cst_62 {dimension_numbers = #tpu.dot_dimension_numbers<[1], [0], [0], [1], [0, 0, 1, 1], [], []>} : vector<16x32xbf16>, vector<32x384xbf16>, vector<16x384xf32> -> vector<16x384xf32>
      %201 = arith.extf %198 : vector<16x384xbf16> to vector<16x384xf32>
      %202 = vector.extract_strided_slice %201 {offsets = [0, 0], sizes = [16, 32], strides = [1, 1]} : vector<16x384xf32> to vector<16x32xf32>
      %203 = vector.extract_strided_slice %200 {offsets = [0, 0], sizes = [16, 32], strides = [1, 1]} : vector<16x384xf32> to vector<16x32xf32>
      %204 = arith.addf %202, %203 : vector<16x32xf32>
      %205 = arith.negf %204 : vector<16x32xf32>
      %206 = math.exp %205 : vector<16x32xf32>
      %cst_63 = arith.constant 1.000000e+00 : f32
      %207 = vector.broadcast %cst_63 : f32 to vector<16x32xf32>
      %208 = arith.addf %207, %206 : vector<16x32xf32>
      %209 = arith.divf %207, %208 : vector<16x32xf32>
      %210 = vector.extract_strided_slice %201 {offsets = [0, 128], sizes = [16, 32], strides = [1, 1]} : vector<16x384xf32> to vector<16x32xf32>
      %211 = vector.extract_strided_slice %200 {offsets = [0, 128], sizes = [16, 32], strides = [1, 1]} : vector<16x384xf32> to vector<16x32xf32>
      %212 = arith.addf %210, %211 : vector<16x32xf32>
      %213 = arith.negf %212 : vector<16x32xf32>
      %214 = math.exp %213 : vector<16x32xf32>
      %cst_64 = arith.constant 1.000000e+00 : f32
      %215 = vector.broadcast %cst_64 : f32 to vector<16x32xf32>
      %216 = arith.addf %215, %214 : vector<16x32xf32>
      %217 = arith.divf %215, %216 : vector<16x32xf32>
      %218 = vector.extract_strided_slice %201 {offsets = [0, 256], sizes = [16, 32], strides = [1, 1]} : vector<16x384xf32> to vector<16x32xf32>
      %219 = vector.extract_strided_slice %200 {offsets = [0, 256], sizes = [16, 32], strides = [1, 1]} : vector<16x384xf32> to vector<16x32xf32>
      %220 = arith.addf %219, %14 : vector<16x32xf32>
      %221 = arith.mulf %209, %220 : vector<16x32xf32>
      %222 = arith.addf %218, %221 : vector<16x32xf32>
      %223 = math.tanh %222 : vector<16x32xf32>
      %224 = arith.subf %194, %223 : vector<16x32xf32>
      %225 = arith.mulf %217, %224 : vector<16x32xf32>
      %226 = arith.addf %223, %225 : vector<16x32xf32>
      %c6_i32 = arith.constant 6 : i32
      %c16_i32_65 = arith.constant 16 : i32
      %227 = arith.muli %c6_i32, %c16_i32_65 : i32
      %228 = tpu.assume_multiple %227, 16 : i32
      %229 = arith.index_cast %228 : i32 to index
      %c0_66 = arith.constant 0 : index
      %230 = vector.load %arg14[%229, %c0_66] : memref<128x384xbf16, #tpu.memory_space<vmem>>, vector<16x384xbf16>
      %231 = arith.truncf %226 : vector<16x32xf32> to vector<16x32xbf16>
      %cst_67 = arith.constant dense<0.000000e+00> : vector<16x384xf32>
      %232 = tpu.matmul %231, %10, %cst_67 {dimension_numbers = #tpu.dot_dimension_numbers<[1], [0], [0], [1], [0, 0, 1, 1], [], []>} : vector<16x32xbf16>, vector<32x384xbf16>, vector<16x384xf32> -> vector<16x384xf32>
      %233 = arith.extf %230 : vector<16x384xbf16> to vector<16x384xf32>
      %234 = vector.extract_strided_slice %233 {offsets = [0, 0], sizes = [16, 32], strides = [1, 1]} : vector<16x384xf32> to vector<16x32xf32>
      %235 = vector.extract_strided_slice %232 {offsets = [0, 0], sizes = [16, 32], strides = [1, 1]} : vector<16x384xf32> to vector<16x32xf32>
      %236 = arith.addf %234, %235 : vector<16x32xf32>
      %237 = arith.negf %236 : vector<16x32xf32>
      %238 = math.exp %237 : vector<16x32xf32>
      %cst_68 = arith.constant 1.000000e+00 : f32
      %239 = vector.broadcast %cst_68 : f32 to vector<16x32xf32>
      %240 = arith.addf %239, %238 : vector<16x32xf32>
      %241 = arith.divf %239, %240 : vector<16x32xf32>
      %242 = vector.extract_strided_slice %233 {offsets = [0, 128], sizes = [16, 32], strides = [1, 1]} : vector<16x384xf32> to vector<16x32xf32>
      %243 = vector.extract_strided_slice %232 {offsets = [0, 128], sizes = [16, 32], strides = [1, 1]} : vector<16x384xf32> to vector<16x32xf32>
      %244 = arith.addf %242, %243 : vector<16x32xf32>
      %245 = arith.negf %244 : vector<16x32xf32>
      %246 = math.exp %245 : vector<16x32xf32>
      %cst_69 = arith.constant 1.000000e+00 : f32
      %247 = vector.broadcast %cst_69 : f32 to vector<16x32xf32>
      %248 = arith.addf %247, %246 : vector<16x32xf32>
      %249 = arith.divf %247, %248 : vector<16x32xf32>
      %250 = vector.extract_strided_slice %233 {offsets = [0, 256], sizes = [16, 32], strides = [1, 1]} : vector<16x384xf32> to vector<16x32xf32>
      %251 = vector.extract_strided_slice %232 {offsets = [0, 256], sizes = [16, 32], strides = [1, 1]} : vector<16x384xf32> to vector<16x32xf32>
      %252 = arith.addf %251, %14 : vector<16x32xf32>
      %253 = arith.mulf %241, %252 : vector<16x32xf32>
      %254 = arith.addf %250, %253 : vector<16x32xf32>
      %255 = math.tanh %254 : vector<16x32xf32>
      %256 = arith.subf %226, %255 : vector<16x32xf32>
      %257 = arith.mulf %249, %256 : vector<16x32xf32>
      %258 = arith.addf %255, %257 : vector<16x32xf32>
      %c7_i32 = arith.constant 7 : i32
      %c16_i32_70 = arith.constant 16 : i32
      %259 = arith.muli %c7_i32, %c16_i32_70 : i32
      %260 = tpu.assume_multiple %259, 16 : i32
      %261 = arith.index_cast %260 : i32 to index
      %c0_71 = arith.constant 0 : index
      %262 = vector.load %arg14[%261, %c0_71] : memref<128x384xbf16, #tpu.memory_space<vmem>>, vector<16x384xbf16>
      %263 = arith.truncf %258 : vector<16x32xf32> to vector<16x32xbf16>
      %cst_72 = arith.constant dense<0.000000e+00> : vector<16x384xf32>
      %264 = tpu.matmul %263, %10, %cst_72 {dimension_numbers = #tpu.dot_dimension_numbers<[1], [0], [0], [1], [0, 0, 1, 1], [], []>} : vector<16x32xbf16>, vector<32x384xbf16>, vector<16x384xf32> -> vector<16x384xf32>
      %265 = arith.extf %262 : vector<16x384xbf16> to vector<16x384xf32>
      %266 = vector.extract_strided_slice %265 {offsets = [0, 0], sizes = [16, 32], strides = [1, 1]} : vector<16x384xf32> to vector<16x32xf32>
      %267 = vector.extract_strided_slice %264 {offsets = [0, 0], sizes = [16, 32], strides = [1, 1]} : vector<16x384xf32> to vector<16x32xf32>
      %268 = arith.addf %266, %267 : vector<16x32xf32>
      %269 = arith.negf %268 : vector<16x32xf32>
      %270 = math.exp %269 : vector<16x32xf32>
      %cst_73 = arith.constant 1.000000e+00 : f32
      %271 = vector.broadcast %cst_73 : f32 to vector<16x32xf32>
      %272 = arith.addf %271, %270 : vector<16x32xf32>
      %273 = arith.divf %271, %272 : vector<16x32xf32>
      %274 = vector.extract_strided_slice %265 {offsets = [0, 128], sizes = [16, 32], strides = [1, 1]} : vector<16x384xf32> to vector<16x32xf32>
      %275 = vector.extract_strided_slice %264 {offsets = [0, 128], sizes = [16, 32], strides = [1, 1]} : vector<16x384xf32> to vector<16x32xf32>
      %276 = arith.addf %274, %275 : vector<16x32xf32>
      %277 = arith.negf %276 : vector<16x32xf32>
      %278 = math.exp %277 : vector<16x32xf32>
      %cst_74 = arith.constant 1.000000e+00 : f32
      %279 = vector.broadcast %cst_74 : f32 to vector<16x32xf32>
      %280 = arith.addf %279, %278 : vector<16x32xf32>
      %281 = arith.divf %279, %280 : vector<16x32xf32>
      %282 = vector.extract_strided_slice %265 {offsets = [0, 256], sizes = [16, 32], strides = [1, 1]} : vector<16x384xf32> to vector<16x32xf32>
      %283 = vector.extract_strided_slice %264 {offsets = [0, 256], sizes = [16, 32], strides = [1, 1]} : vector<16x384xf32> to vector<16x32xf32>
      %284 = arith.addf %283, %14 : vector<16x32xf32>
      %285 = arith.mulf %273, %284 : vector<16x32xf32>
      %286 = arith.addf %282, %285 : vector<16x32xf32>
      %287 = math.tanh %286 : vector<16x32xf32>
      %288 = arith.subf %258, %287 : vector<16x32xf32>
      %289 = arith.mulf %281, %288 : vector<16x32xf32>
      %290 = arith.addf %287, %289 : vector<16x32xf32>
      %c8_i32 = arith.constant 8 : i32
      %c0_i32_75 = arith.constant 0 : i32
      %c16_i32_76 = arith.constant 16 : i32
      %291 = arith.muli %c0_i32_75, %c16_i32_76 : i32
      %292 = tpu.assume_multiple %291, 16 : i32
      %293 = arith.index_cast %292 : i32 to index
      %c0_77 = arith.constant 0 : index
      %294 = vector.load %arg15[%293, %c0_77] : memref<112x384xbf16, #tpu.memory_space<vmem>>, vector<16x384xbf16>
      %295 = arith.truncf %290 : vector<16x32xf32> to vector<16x32xbf16>
      %cst_78 = arith.constant dense<0.000000e+00> : vector<16x384xf32>
      %296 = tpu.matmul %295, %11, %cst_78 {dimension_numbers = #tpu.dot_dimension_numbers<[1], [0], [0], [1], [0, 0, 1, 1], [], []>} : vector<16x32xbf16>, vector<32x384xbf16>, vector<16x384xf32> -> vector<16x384xf32>
      %297 = arith.extf %294 : vector<16x384xbf16> to vector<16x384xf32>
      %298 = vector.extract_strided_slice %297 {offsets = [0, 0], sizes = [16, 32], strides = [1, 1]} : vector<16x384xf32> to vector<16x32xf32>
      %299 = vector.extract_strided_slice %296 {offsets = [0, 0], sizes = [16, 32], strides = [1, 1]} : vector<16x384xf32> to vector<16x32xf32>
      %300 = arith.addf %298, %299 : vector<16x32xf32>
      %301 = arith.negf %300 : vector<16x32xf32>
      %302 = math.exp %301 : vector<16x32xf32>
      %cst_79 = arith.constant 1.000000e+00 : f32
      %303 = vector.broadcast %cst_79 : f32 to vector<16x32xf32>
      %304 = arith.addf %303, %302 : vector<16x32xf32>
      %305 = arith.divf %303, %304 : vector<16x32xf32>
      %306 = vector.extract_strided_slice %297 {offsets = [0, 128], sizes = [16, 32], strides = [1, 1]} : vector<16x384xf32> to vector<16x32xf32>
      %307 = vector.extract_strided_slice %296 {offsets = [0, 128], sizes = [16, 32], strides = [1, 1]} : vector<16x384xf32> to vector<16x32xf32>
      %308 = arith.addf %306, %307 : vector<16x32xf32>
      %309 = arith.negf %308 : vector<16x32xf32>
      %310 = math.exp %309 : vector<16x32xf32>
      %cst_80 = arith.constant 1.000000e+00 : f32
      %311 = vector.broadcast %cst_80 : f32 to vector<16x32xf32>
      %312 = arith.addf %311, %310 : vector<16x32xf32>
      %313 = arith.divf %311, %312 : vector<16x32xf32>
      %314 = vector.extract_strided_slice %297 {offsets = [0, 256], sizes = [16, 32], strides = [1, 1]} : vector<16x384xf32> to vector<16x32xf32>
      %315 = vector.extract_strided_slice %296 {offsets = [0, 256], sizes = [16, 32], strides = [1, 1]} : vector<16x384xf32> to vector<16x32xf32>
      %316 = arith.addf %315, %17 : vector<16x32xf32>
      %317 = arith.mulf %305, %316 : vector<16x32xf32>
      %318 = arith.addf %314, %317 : vector<16x32xf32>
      %319 = math.tanh %318 : vector<16x32xf32>
      %320 = arith.subf %290, %319 : vector<16x32xf32>
      %321 = arith.mulf %313, %320 : vector<16x32xf32>
      %322 = arith.addf %319, %321 : vector<16x32xf32>
      %323 = arith.truncf %322 : vector<16x32xf32> to vector<16x32xbf16>
      %324 = arith.index_cast %292 : i32 to index
      %c0_81 = arith.constant 0 : index
      %325 = vector.load %arg16[%324, %c0_81] : memref<112x32xbf16, #tpu.memory_space<vmem>>, vector<16x32xbf16>
      tpu.vector_store %arg16[%324, %c0_81], %323 {strides = array<i32>} : memref<112x32xbf16, #tpu.memory_space<vmem>>, vector<16x32xbf16>,
      %c1_i32_82 = arith.constant 1 : i32
      %c16_i32_83 = arith.constant 16 : i32
      %326 = arith.muli %c1_i32_82, %c16_i32_83 : i32
      %327 = tpu.assume_multiple %326, 16 : i32
      %328 = arith.index_cast %327 : i32 to index
      %c0_84 = arith.constant 0 : index
      %329 = vector.load %arg15[%328, %c0_84] : memref<112x384xbf16, #tpu.memory_space<vmem>>, vector<16x384xbf16>
      %330 = arith.truncf %322 : vector<16x32xf32> to vector<16x32xbf16>
      %cst_85 = arith.constant dense<0.000000e+00> : vector<16x384xf32>
      %331 = tpu.matmul %330, %11, %cst_85 {dimension_numbers = #tpu.dot_dimension_numbers<[1], [0], [0], [1], [0, 0, 1, 1], [], []>} : vector<16x32xbf16>, vector<32x384xbf16>, vector<16x384xf32> -> vector<16x384xf32>
      %332 = arith.extf %329 : vector<16x384xbf16> to vector<16x384xf32>
      %333 = vector.extract_strided_slice %332 {offsets = [0, 0], sizes = [16, 32], strides = [1, 1]} : vector<16x384xf32> to vector<16x32xf32>
      %334 = vector.extract_strided_slice %331 {offsets = [0, 0], sizes = [16, 32], strides = [1, 1]} : vector<16x384xf32> to vector<16x32xf32>
      %335 = arith.addf %333, %334 : vector<16x32xf32>
      %336 = arith.negf %335 : vector<16x32xf32>
      %337 = math.exp %336 : vector<16x32xf32>
      %cst_86 = arith.constant 1.000000e+00 : f32
      %338 = vector.broadcast %cst_86 : f32 to vector<16x32xf32>
      %339 = arith.addf %338, %337 : vector<16x32xf32>
      %340 = arith.divf %338, %339 : vector<16x32xf32>
      %341 = vector.extract_strided_slice %332 {offsets = [0, 128], sizes = [16, 32], strides = [1, 1]} : vector<16x384xf32> to vector<16x32xf32>
      %342 = vector.extract_strided_slice %331 {offsets = [0, 128], sizes = [16, 32], strides = [1, 1]} : vector<16x384xf32> to vector<16x32xf32>
      %343 = arith.addf %341, %342 : vector<16x32xf32>
      %344 = arith.negf %343 : vector<16x32xf32>
      %345 = math.exp %344 : vector<16x32xf32>
      %cst_87 = arith.constant 1.000000e+00 : f32
      %346 = vector.broadcast %cst_87 : f32 to vector<16x32xf32>
      %347 = arith.addf %346, %345 : vector<16x32xf32>
      %348 = arith.divf %346, %347 : vector<16x32xf32>
      %349 = vector.extract_strided_slice %332 {offsets = [0, 256], sizes = [16, 32], strides = [1, 1]} : vector<16x384xf32> to vector<16x32xf32>
      %350 = vector.extract_strided_slice %331 {offsets = [0, 256], sizes = [16, 32], strides = [1, 1]} : vector<16x384xf32> to vector<16x32xf32>
      %351 = arith.addf %350, %17 : vector<16x32xf32>
      %352 = arith.mulf %340, %351 : vector<16x32xf32>
      %353 = arith.addf %349, %352 : vector<16x32xf32>
      %354 = math.tanh %353 : vector<16x32xf32>
      %355 = arith.subf %322, %354 : vector<16x32xf32>
      %356 = arith.mulf %348, %355 : vector<16x32xf32>
      %357 = arith.addf %354, %356 : vector<16x32xf32>
      %358 = arith.truncf %357 : vector<16x32xf32> to vector<16x32xbf16>
      %359 = arith.index_cast %327 : i32 to index
      %c0_88 = arith.constant 0 : index
      %360 = vector.load %arg16[%359, %c0_88] : memref<112x32xbf16, #tpu.memory_space<vmem>>, vector<16x32xbf16>
      tpu.vector_store %arg16[%359, %c0_88], %358 {strides = array<i32>} : memref<112x32xbf16, #tpu.memory_space<vmem>>, vector<16x32xbf16>,
      %c2_i32_89 = arith.constant 2 : i32
      %c16_i32_90 = arith.constant 16 : i32
      %361 = arith.muli %c2_i32_89, %c16_i32_90 : i32
      %362 = tpu.assume_multiple %361, 16 : i32
      %363 = arith.index_cast %362 : i32 to index
      %c0_91 = arith.constant 0 : index
      %364 = vector.load %arg15[%363, %c0_91] : memref<112x384xbf16, #tpu.memory_space<vmem>>, vector<16x384xbf16>
      %365 = arith.truncf %357 : vector<16x32xf32> to vector<16x32xbf16>
      %cst_92 = arith.constant dense<0.000000e+00> : vector<16x384xf32>
      %366 = tpu.matmul %365, %11, %cst_92 {dimension_numbers = #tpu.dot_dimension_numbers<[1], [0], [0], [1], [0, 0, 1, 1], [], []>} : vector<16x32xbf16>, vector<32x384xbf16>, vector<16x384xf32> -> vector<16x384xf32>
      %367 = arith.extf %364 : vector<16x384xbf16> to vector<16x384xf32>
      %368 = vector.extract_strided_slice %367 {offsets = [0, 0], sizes = [16, 32], strides = [1, 1]} : vector<16x384xf32> to vector<16x32xf32>
      %369 = vector.extract_strided_slice %366 {offsets = [0, 0], sizes = [16, 32], strides = [1, 1]} : vector<16x384xf32> to vector<16x32xf32>
      %370 = arith.addf %368, %369 : vector<16x32xf32>
      %371 = arith.negf %370 : vector<16x32xf32>
      %372 = math.exp %371 : vector<16x32xf32>
      %cst_93 = arith.constant 1.000000e+00 : f32
      %373 = vector.broadcast %cst_93 : f32 to vector<16x32xf32>
      %374 = arith.addf %373, %372 : vector<16x32xf32>
      %375 = arith.divf %373, %374 : vector<16x32xf32>
      %376 = vector.extract_strided_slice %367 {offsets = [0, 128], sizes = [16, 32], strides = [1, 1]} : vector<16x384xf32> to vector<16x32xf32>
      %377 = vector.extract_strided_slice %366 {offsets = [0, 128], sizes = [16, 32], strides = [1, 1]} : vector<16x384xf32> to vector<16x32xf32>
      %378 = arith.addf %376, %377 : vector<16x32xf32>
      %379 = arith.negf %378 : vector<16x32xf32>
      %380 = math.exp %379 : vector<16x32xf32>
      %cst_94 = arith.constant 1.000000e+00 : f32
      %381 = vector.broadcast %cst_94 : f32 to vector<16x32xf32>
      %382 = arith.addf %381, %380 : vector<16x32xf32>
      %383 = arith.divf %381, %382 : vector<16x32xf32>
      %384 = vector.extract_strided_slice %367 {offsets = [0, 256], sizes = [16, 32], strides = [1, 1]} : vector<16x384xf32> to vector<16x32xf32>
      %385 = vector.extract_strided_slice %366 {offsets = [0, 256], sizes = [16, 32], strides = [1, 1]} : vector<16x384xf32> to vector<16x32xf32>
      %386 = arith.addf %385, %17 : vector<16x32xf32>
      %387 = arith.mulf %375, %386 : vector<16x32xf32>
      %388 = arith.addf %384, %387 : vector<16x32xf32>
      %389 = math.tanh %388 : vector<16x32xf32>
      %390 = arith.subf %357, %389 : vector<16x32xf32>
      %391 = arith.mulf %383, %390 : vector<16x32xf32>
      %392 = arith.addf %389, %391 : vector<16x32xf32>
      %393 = arith.truncf %392 : vector<16x32xf32> to vector<16x32xbf16>
      %394 = arith.index_cast %362 : i32 to index
      %c0_95 = arith.constant 0 : index
      %395 = vector.load %arg16[%394, %c0_95] : memref<112x32xbf16, #tpu.memory_space<vmem>>, vector<16x32xbf16>
      tpu.vector_store %arg16[%394, %c0_95], %393 {strides = array<i32>} : memref<112x32xbf16, #tpu.memory_space<vmem>>, vector<16x32xbf16>,
      %c3_i32_96 = arith.constant 3 : i32
      %c16_i32_97 = arith.constant 16 : i32
      %396 = arith.muli %c3_i32_96, %c16_i32_97 : i32
      %397 = tpu.assume_multiple %396, 16 : i32
      %398 = arith.index_cast %397 : i32 to index
      %c0_98 = arith.constant 0 : index
      %399 = vector.load %arg15[%398, %c0_98] : memref<112x384xbf16, #tpu.memory_space<vmem>>, vector<16x384xbf16>
      %400 = arith.truncf %392 : vector<16x32xf32> to vector<16x32xbf16>
      %cst_99 = arith.constant dense<0.000000e+00> : vector<16x384xf32>
      %401 = tpu.matmul %400, %11, %cst_99 {dimension_numbers = #tpu.dot_dimension_numbers<[1], [0], [0], [1], [0, 0, 1, 1], [], []>} : vector<16x32xbf16>, vector<32x384xbf16>, vector<16x384xf32> -> vector<16x384xf32>
      %402 = arith.extf %399 : vector<16x384xbf16> to vector<16x384xf32>
      %403 = vector.extract_strided_slice %402 {offsets = [0, 0], sizes = [16, 32], strides = [1, 1]} : vector<16x384xf32> to vector<16x32xf32>
      %404 = vector.extract_strided_slice %401 {offsets = [0, 0], sizes = [16, 32], strides = [1, 1]} : vector<16x384xf32> to vector<16x32xf32>
      %405 = arith.addf %403, %404 : vector<16x32xf32>
      %406 = arith.negf %405 : vector<16x32xf32>
      %407 = math.exp %406 : vector<16x32xf32>
      %cst_100 = arith.constant 1.000000e+00 : f32
      %408 = vector.broadcast %cst_100 : f32 to vector<16x32xf32>
      %409 = arith.addf %408, %407 : vector<16x32xf32>
      %410 = arith.divf %408, %409 : vector<16x32xf32>
      %411 = vector.extract_strided_slice %402 {offsets = [0, 128], sizes = [16, 32], strides = [1, 1]} : vector<16x384xf32> to vector<16x32xf32>
      %412 = vector.extract_strided_slice %401 {offsets = [0, 128], sizes = [16, 32], strides = [1, 1]} : vector<16x384xf32> to vector<16x32xf32>
      %413 = arith.addf %411, %412 : vector<16x32xf32>
      %414 = arith.negf %413 : vector<16x32xf32>
      %415 = math.exp %414 : vector<16x32xf32>
      %cst_101 = arith.constant 1.000000e+00 : f32
      %416 = vector.broadcast %cst_101 : f32 to vector<16x32xf32>
      %417 = arith.addf %416, %415 : vector<16x32xf32>
      %418 = arith.divf %416, %417 : vector<16x32xf32>
      %419 = vector.extract_strided_slice %402 {offsets = [0, 256], sizes = [16, 32], strides = [1, 1]} : vector<16x384xf32> to vector<16x32xf32>
      %420 = vector.extract_strided_slice %401 {offsets = [0, 256], sizes = [16, 32], strides = [1, 1]} : vector<16x384xf32> to vector<16x32xf32>
      %421 = arith.addf %420, %17 : vector<16x32xf32>
      %422 = arith.mulf %410, %421 : vector<16x32xf32>
      %423 = arith.addf %419, %422 : vector<16x32xf32>
      %424 = math.tanh %423 : vector<16x32xf32>
      %425 = arith.subf %392, %424 : vector<16x32xf32>
      %426 = arith.mulf %418, %425 : vector<16x32xf32>
      %427 = arith.addf %424, %426 : vector<16x32xf32>
      %428 = arith.truncf %427 : vector<16x32xf32> to vector<16x32xbf16>
      %429 = arith.index_cast %397 : i32 to index
      %c0_102 = arith.constant 0 : index
      %430 = vector.load %arg16[%429, %c0_102] : memref<112x32xbf16, #tpu.memory_space<vmem>>, vector<16x32xbf16>
      tpu.vector_store %arg16[%429, %c0_102], %428 {strides = array<i32>} : memref<112x32xbf16, #tpu.memory_space<vmem>>, vector<16x32xbf16>,
      %c4_i32_103 = arith.constant 4 : i32
      %c16_i32_104 = arith.constant 16 : i32
      %431 = arith.muli %c4_i32_103, %c16_i32_104 : i32
      %432 = tpu.assume_multiple %431, 16 : i32
      %433 = arith.index_cast %432 : i32 to index
      %c0_105 = arith.constant 0 : index
      %434 = vector.load %arg15[%433, %c0_105] : memref<112x384xbf16, #tpu.memory_space<vmem>>, vector<16x384xbf16>
      %435 = arith.truncf %427 : vector<16x32xf32> to vector<16x32xbf16>
      %cst_106 = arith.constant dense<0.000000e+00> : vector<16x384xf32>
      %436 = tpu.matmul %435, %11, %cst_106 {dimension_numbers = #tpu.dot_dimension_numbers<[1], [0], [0], [1], [0, 0, 1, 1], [], []>} : vector<16x32xbf16>, vector<32x384xbf16>, vector<16x384xf32> -> vector<16x384xf32>
      %437 = arith.extf %434 : vector<16x384xbf16> to vector<16x384xf32>
      %438 = vector.extract_strided_slice %437 {offsets = [0, 0], sizes = [16, 32], strides = [1, 1]} : vector<16x384xf32> to vector<16x32xf32>
      %439 = vector.extract_strided_slice %436 {offsets = [0, 0], sizes = [16, 32], strides = [1, 1]} : vector<16x384xf32> to vector<16x32xf32>
      %440 = arith.addf %438, %439 : vector<16x32xf32>
      %441 = arith.negf %440 : vector<16x32xf32>
      %442 = math.exp %441 : vector<16x32xf32>
      %cst_107 = arith.constant 1.000000e+00 : f32
      %443 = vector.broadcast %cst_107 : f32 to vector<16x32xf32>
      %444 = arith.addf %443, %442 : vector<16x32xf32>
      %445 = arith.divf %443, %444 : vector<16x32xf32>
      %446 = vector.extract_strided_slice %437 {offsets = [0, 128], sizes = [16, 32], strides = [1, 1]} : vector<16x384xf32> to vector<16x32xf32>
      %447 = vector.extract_strided_slice %436 {offsets = [0, 128], sizes = [16, 32], strides = [1, 1]} : vector<16x384xf32> to vector<16x32xf32>
      %448 = arith.addf %446, %447 : vector<16x32xf32>
      %449 = arith.negf %448 : vector<16x32xf32>
      %450 = math.exp %449 : vector<16x32xf32>
      %cst_108 = arith.constant 1.000000e+00 : f32
      %451 = vector.broadcast %cst_108 : f32 to vector<16x32xf32>
      %452 = arith.addf %451, %450 : vector<16x32xf32>
      %453 = arith.divf %451, %452 : vector<16x32xf32>
      %454 = vector.extract_strided_slice %437 {offsets = [0, 256], sizes = [16, 32], strides = [1, 1]} : vector<16x384xf32> to vector<16x32xf32>
      %455 = vector.extract_strided_slice %436 {offsets = [0, 256], sizes = [16, 32], strides = [1, 1]} : vector<16x384xf32> to vector<16x32xf32>
      %456 = arith.addf %455, %17 : vector<16x32xf32>
      %457 = arith.mulf %445, %456 : vector<16x32xf32>
      %458 = arith.addf %454, %457 : vector<16x32xf32>
      %459 = math.tanh %458 : vector<16x32xf32>
      %460 = arith.subf %427, %459 : vector<16x32xf32>
      %461 = arith.mulf %453, %460 : vector<16x32xf32>
      %462 = arith.addf %459, %461 : vector<16x32xf32>
      %463 = arith.truncf %462 : vector<16x32xf32> to vector<16x32xbf16>
      %464 = arith.index_cast %432 : i32 to index
      %c0_109 = arith.constant 0 : index
      %465 = vector.load %arg16[%464, %c0_109] : memref<112x32xbf16, #tpu.memory_space<vmem>>, vector<16x32xbf16>
      tpu.vector_store %arg16[%464, %c0_109], %463 {strides = array<i32>} : memref<112x32xbf16, #tpu.memory_space<vmem>>, vector<16x32xbf16>,
      %c5_i32_110 = arith.constant 5 : i32
      %c16_i32_111 = arith.constant 16 : i32
      %466 = arith.muli %c5_i32_110, %c16_i32_111 : i32
      %467 = tpu.assume_multiple %466, 16 : i32
      %468 = arith.index_cast %467 : i32 to index
      %c0_112 = arith.constant 0 : index
      %469 = vector.load %arg15[%468, %c0_112] : memref<112x384xbf16, #tpu.memory_space<vmem>>, vector<16x384xbf16>
      %470 = arith.truncf %462 : vector<16x32xf32> to vector<16x32xbf16>
      %cst_113 = arith.constant dense<0.000000e+00> : vector<16x384xf32>
      %471 = tpu.matmul %470, %11, %cst_113 {dimension_numbers = #tpu.dot_dimension_numbers<[1], [0], [0], [1], [0, 0, 1, 1], [], []>} : vector<16x32xbf16>, vector<32x384xbf16>, vector<16x384xf32> -> vector<16x384xf32>
      %472 = arith.extf %469 : vector<16x384xbf16> to vector<16x384xf32>
      %473 = vector.extract_strided_slice %472 {offsets = [0, 0], sizes = [16, 32], strides = [1, 1]} : vector<16x384xf32> to vector<16x32xf32>
      %474 = vector.extract_strided_slice %471 {offsets = [0, 0], sizes = [16, 32], strides = [1, 1]} : vector<16x384xf32> to vector<16x32xf32>
      %475 = arith.addf %473, %474 : vector<16x32xf32>
      %476 = arith.negf %475 : vector<16x32xf32>
      %477 = math.exp %476 : vector<16x32xf32>
      %cst_114 = arith.constant 1.000000e+00 : f32
      %478 = vector.broadcast %cst_114 : f32 to vector<16x32xf32>
      %479 = arith.addf %478, %477 : vector<16x32xf32>
      %480 = arith.divf %478, %479 : vector<16x32xf32>
      %481 = vector.extract_strided_slice %472 {offsets = [0, 128], sizes = [16, 32], strides = [1, 1]} : vector<16x384xf32> to vector<16x32xf32>
      %482 = vector.extract_strided_slice %471 {offsets = [0, 128], sizes = [16, 32], strides = [1, 1]} : vector<16x384xf32> to vector<16x32xf32>
      %483 = arith.addf %481, %482 : vector<16x32xf32>
      %484 = arith.negf %483 : vector<16x32xf32>
      %485 = math.exp %484 : vector<16x32xf32>
      %cst_115 = arith.constant 1.000000e+00 : f32
      %486 = vector.broadcast %cst_115 : f32 to vector<16x32xf32>
      %487 = arith.addf %486, %485 : vector<16x32xf32>
      %488 = arith.divf %486, %487 : vector<16x32xf32>
      %489 = vector.extract_strided_slice %472 {offsets = [0, 256], sizes = [16, 32], strides = [1, 1]} : vector<16x384xf32> to vector<16x32xf32>
      %490 = vector.extract_strided_slice %471 {offsets = [0, 256], sizes = [16, 32], strides = [1, 1]} : vector<16x384xf32> to vector<16x32xf32>
      %491 = arith.addf %490, %17 : vector<16x32xf32>
      %492 = arith.mulf %480, %491 : vector<16x32xf32>
      %493 = arith.addf %489, %492 : vector<16x32xf32>
      %494 = math.tanh %493 : vector<16x32xf32>
      %495 = arith.subf %462, %494 : vector<16x32xf32>
      %496 = arith.mulf %488, %495 : vector<16x32xf32>
      %497 = arith.addf %494, %496 : vector<16x32xf32>
      %498 = arith.truncf %497 : vector<16x32xf32> to vector<16x32xbf16>
      %499 = arith.index_cast %467 : i32 to index
      %c0_116 = arith.constant 0 : index
      %500 = vector.load %arg16[%499, %c0_116] : memref<112x32xbf16, #tpu.memory_space<vmem>>, vector<16x32xbf16>
      tpu.vector_store %arg16[%499, %c0_116], %498 {strides = array<i32>} : memref<112x32xbf16, #tpu.memory_space<vmem>>, vector<16x32xbf16>,
      %c6_i32_117 = arith.constant 6 : i32
      %c16_i32_118 = arith.constant 16 : i32
      %501 = arith.muli %c6_i32_117, %c16_i32_118 : i32
      %502 = tpu.assume_multiple %501, 16 : i32
      %503 = arith.index_cast %502 : i32 to index
      %c0_119 = arith.constant 0 : index
      %504 = vector.load %arg15[%503, %c0_119] : memref<112x384xbf16, #tpu.memory_space<vmem>>, vector<16x384xbf16>
      %505 = arith.truncf %497 : vector<16x32xf32> to vector<16x32xbf16>
      %cst_120 = arith.constant dense<0.000000e+00> : vector<16x384xf32>
      %506 = tpu.matmul %505, %11, %cst_120 {dimension_numbers = #tpu.dot_dimension_numbers<[1], [0], [0], [1], [0, 0, 1, 1], [], []>} : vector<16x32xbf16>, vector<32x384xbf16>, vector<16x384xf32> -> vector<16x384xf32>
      %507 = arith.extf %504 : vector<16x384xbf16> to vector<16x384xf32>
      %508 = vector.extract_strided_slice %507 {offsets = [0, 0], sizes = [16, 32], strides = [1, 1]} : vector<16x384xf32> to vector<16x32xf32>
      %509 = vector.extract_strided_slice %506 {offsets = [0, 0], sizes = [16, 32], strides = [1, 1]} : vector<16x384xf32> to vector<16x32xf32>
      %510 = arith.addf %508, %509 : vector<16x32xf32>
      %511 = arith.negf %510 : vector<16x32xf32>
      %512 = math.exp %511 : vector<16x32xf32>
      %cst_121 = arith.constant 1.000000e+00 : f32
      %513 = vector.broadcast %cst_121 : f32 to vector<16x32xf32>
      %514 = arith.addf %513, %512 : vector<16x32xf32>
      %515 = arith.divf %513, %514 : vector<16x32xf32>
      %516 = vector.extract_strided_slice %507 {offsets = [0, 128], sizes = [16, 32], strides = [1, 1]} : vector<16x384xf32> to vector<16x32xf32>
      %517 = vector.extract_strided_slice %506 {offsets = [0, 128], sizes = [16, 32], strides = [1, 1]} : vector<16x384xf32> to vector<16x32xf32>
      %518 = arith.addf %516, %517 : vector<16x32xf32>
      %519 = arith.negf %518 : vector<16x32xf32>
      %520 = math.exp %519 : vector<16x32xf32>
      %cst_122 = arith.constant 1.000000e+00 : f32
      %521 = vector.broadcast %cst_122 : f32 to vector<16x32xf32>
      %522 = arith.addf %521, %520 : vector<16x32xf32>
      %523 = arith.divf %521, %522 : vector<16x32xf32>
      %524 = vector.extract_strided_slice %507 {offsets = [0, 256], sizes = [16, 32], strides = [1, 1]} : vector<16x384xf32> to vector<16x32xf32>
      %525 = vector.extract_strided_slice %506 {offsets = [0, 256], sizes = [16, 32], strides = [1, 1]} : vector<16x384xf32> to vector<16x32xf32>
      %526 = arith.addf %525, %17 : vector<16x32xf32>
      %527 = arith.mulf %515, %526 : vector<16x32xf32>
      %528 = arith.addf %524, %527 : vector<16x32xf32>
      %529 = math.tanh %528 : vector<16x32xf32>
      %530 = arith.subf %497, %529 : vector<16x32xf32>
      %531 = arith.mulf %523, %530 : vector<16x32xf32>
      %532 = arith.addf %529, %531 : vector<16x32xf32>
      %533 = arith.truncf %532 : vector<16x32xf32> to vector<16x32xbf16>
      %534 = arith.index_cast %502 : i32 to index
      %c0_123 = arith.constant 0 : index
      %535 = vector.load %arg16[%534, %c0_123] : memref<112x32xbf16, #tpu.memory_space<vmem>>, vector<16x32xbf16>
      tpu.vector_store %arg16[%534, %c0_123], %533 {strides = array<i32>} : memref<112x32xbf16, #tpu.memory_space<vmem>>, vector<16x32xbf16>,
      %c7_i32_124 = arith.constant 7 : i32
    } else {
    }
    %c0 = arith.constant 0 : index
    %c0_1 = arith.constant 0 : index
    %3 = vector.load %arg16[%c0, %c0_1] : memref<112x32xbf16, #tpu.memory_space<vmem>>, vector<112x32xbf16>
    %c0_2 = arith.constant 0 : index
    %c0_3 = arith.constant 0 : index
    %4 = vector.load %arg11[%c0_2, %c0_3] : memref<32x128xbf16, #tpu.memory_space<vmem>>, vector<32x128xbf16>
    %cst = arith.constant dense<0.000000e+00> : vector<112x128xf32>
    %5 = tpu.matmul %3, %4, %cst {dimension_numbers = #tpu.dot_dimension_numbers<[1], [0], [0], [1], [0, 0, 1, 1], [], []>} : vector<112x32xbf16>, vector<32x128xbf16>, vector<112x128xf32> -> vector<112x128xf32>
    %c0_4 = arith.constant 0 : index
    %c0_5 = arith.constant 0 : index
    %6 = vector.load %arg12[%c0_4, %c0_5] : memref<1x128xf32, #tpu.memory_space<vmem>>, vector<1x128xf32>
    %7 = vector.broadcast %6 : vector<1x128xf32> to vector<112x128xf32>
    %8 = arith.addf %5, %7 : vector<112x128xf32>
    %c0_6 = arith.constant 0 : index
    %c0_7 = arith.constant 0 : index
    %9 = vector.load %arg13[%c0_6, %c0_7] : memref<112x128xf32, #tpu.memory_space<vmem>>, vector<112x128xf32>
    tpu.vector_store %arg13[%c0_6, %c0_7], %8 {strides = array<i32>} : memref<112x128xf32, #tpu.memory_space<vmem>>, vector<112x128xf32>,
    return
  }
  func.func @transform_0(%arg0: i32) -> (i32, i32) {
    %c0_i32 = arith.constant 0 : i32
    %c0_i32_0 = arith.constant 0 : i32
    %c0_i32_1 = arith.constant 0 : i32
    return %c0_i32, %c0_i32_0 : i32, i32
  }
  func.func @transform_1(%arg0: i32) -> (i32, i32) {
    %c0_i32 = arith.constant 0 : i32
    %c0_i32_0 = arith.constant 0 : i32
    %c0_i32_1 = arith.constant 0 : i32
    return %c0_i32, %c0_i32_0 : i32, i32
  }
  func.func @transform_2(%arg0: i32) -> (i32, i32) {
    %c0_i32 = arith.constant 0 : i32
    %c0_i32_0 = arith.constant 0 : i32
    %c0_i32_1 = arith.constant 0 : i32
    return %c0_i32, %c0_i32_0 : i32, i32
  }
  func.func @transform_3(%arg0: i32) -> (i32, i32) {
    %c0_i32 = arith.constant 0 : i32
    %c0_i32_0 = arith.constant 0 : i32
    %c0_i32_1 = arith.constant 0 : i32
    return %c0_i32, %c0_i32_0 : i32, i32
  }
  func.func @transform_4(%arg0: i32) -> (i32, i32) {
    %c0_i32 = arith.constant 0 : i32
    %c0_i32_0 = arith.constant 0 : i32
    %c0_i32_1 = arith.constant 0 : i32
    return %c0_i32, %c0_i32_0 : i32, i32
  }
  func.func @transform_5(%arg0: i32) -> (i32, i32) {
    %c0_i32 = arith.constant 0 : i32
    %c0_i32_0 = arith.constant 0 : i32
    %c0_i32_1 = arith.constant 0 : i32
    return %c0_i32, %c0_i32_0 : i32, i32
  }
  func.func @transform_6(%arg0: i32) -> (i32, i32) {
    %c0_i32 = arith.constant 0 : i32
    %c0_i32_0 = arith.constant 0 : i32
    %c0_i32_1 = arith.constant 0 : i32
    return %c0_i32, %c0_i32_0 : i32, i32
  }
  func.func @transform_7(%arg0: i32) -> (i32, i32) {
    %c0_i32 = arith.constant 0 : i32
    %c0_i32_0 = arith.constant 0 : i32
    %c0_i32_1 = arith.constant 0 : i32
    return %c0_i32, %c0_i32_0 : i32, i32
  }
  func.func @transform_8(%arg0: i32) -> (i32, i32) {
    %c0_i32 = arith.constant 0 : i32
    %c0_i32_0 = arith.constant 0 : i32
    %c0_i32_1 = arith.constant 0 : i32
    return %c0_i32, %c0_i32_0 : i32, i32
  }
  func.func @transform_9(%arg0: i32) -> (i32, i32) {
    %c0_i32 = arith.constant 0 : i32
    %c0_i32_0 = arith.constant 0 : i32
    %c0_i32_1 = arith.constant 0 : i32
    return %c0_i32, %c0_i32_0 : i32, i32
  }
  func.func @transform_10(%arg0: i32) -> (i32, i32) {
    %c0_i32 = arith.constant 0 : i32
    %c0_i32_0 = arith.constant 0 : i32
    return %c0_i32, %arg0 : i32, i32
  }
  func.func @transform_11(%arg0: i32) -> (i32, i32) {
    %c0_i32 = arith.constant 0 : i32
    %c0_i32_0 = arith.constant 0 : i32
    return %c0_i32, %arg0 : i32, i32
  }
  func.func @transform_12(%arg0: i32) -> (i32, i32) {
    %c0_i32 = arith.constant 0 : i32
    %c0_i32_0 = arith.constant 0 : i32
    return %c0_i32, %arg0 : i32, i32
  }
}

</mosaic_0001>

<bundles_post_ra>
// kernel: seq2seq_forward.1
= control target key start
LH: loop header
LB: loop body
LE: loop exit
PB: predicated region body
PF: predicated region fallthrough
CT: control target
= control target key end

     0   :  { %v5080_v1 = vmov 0   ;;  %vm189_vm0 = vcmask 261120   ;;  %v5082_v9 = vmov 0.0   ;;  %vm4016_vm1 = vmmov 0   ;;  %s5067_s2 = inlined_call_operand.vmem [shape: bf16[32,384], index: 2, kind: input, shape index: {}]   ;;  %s5068_s0 = inlined_call_operand.vmem [shape: bf16[128,32], index: 0, kind: input, shape index: {}]   ;;  %s5069_s6 = inlined_call_operand.vmem [shape: bf16[32,384], index: 6, kind: input, shape index: {}]   ;;  %s5070_s1 = inlined_call_operand.vmem [shape: bf16[112,32], index: 1, kind: input, shape index: {}]   ;;  %s5071_s3 = inlined_call_operand.vmem [shape: bf16[32,384], index: 3, kind: input, shape index: {}]   ;;  %s5072_s4 = inlined_call_operand.vmem [shape: f32[1,384], index: 4, kind: input, shape index: {}]   ;;  %s5073_s8 = inlined_call_operand.vmem [shape: f32[1,384], index: 8, kind: input, shape index: {}]   ;;  %s5074_s5 = inlined_call_operand.vmem [shape: f32[1,32], index: 5, kind: input, shape index: {}]   ;;  %s5075_s7 = inlined_call_operand.vmem [shape: bf16[32,384], index: 7, kind: input, shape index: {}]   ;;  %s5076_s9 = inlined_call_operand.vmem [shape: f32[1,32], index: 9, kind: input, shape index: {}]   ;;  %s5077_s10 = inlined_call_operand.vmem [shape: bf16[32,128], index: 10, kind: input, shape index: {}]   ;;  %s5078_s11 = inlined_call_operand.vmem [shape: f32[1,128], index: 11, kind: input, shape index: {}]   ;;  %s5079_s12 = inlined_call_operand.vmem [shape: f32[112,128], index: 12, kind: output, shape index: {}]  }
   0x1   :  { %v3658_v0 = vld [vmem:[%s5067_s2 + $0x4] ss:$12 sps:$4 sm:$0xff]   ;;  %296 = vmatprep.mubr.bf16.mxu1 %v5080_v1  ;;  %246 = vmatprep.mubr.bf16.mxu0 %v5080_v1  ;;  %v3660_v2 = vld [vmem:[%s5067_s2] ss:$12 sps:$4 sm:$0xff]   ;;  %v3661_v3 = vld [vmem:[%s5067_s2 + $0x1c] ss:$12 sps:$4 sm:$0xff]   ;;  %v102_v33 = vlaneseq }
   0x2   :  { %3651 = vmatprep.subr.bf16.mxu1 %v3658_v0  ;;  %214 = vmatprep.subr.bf16.mxu0 %v3658_v0  ;;  %v3663_v4 = vld [vmem:[%s5067_s2 + $0x18] ss:$12 sps:$4 sm:$0xff]   ;;  %v3665_v5 = vld [vmem:[%s5067_s2 + $0x8] ss:$12 sps:$4 sm:$0xff]   ;;  %v3667_v7 = vld [vmem:[%s5067_s2 + $0x20] ss:$12 sps:$4 sm:$0xff]  }
   0x3   :  { %3653 = vmatpush1.bf16.msra.mxu1 %v3660_v2  ;;  %215 = vmatpush1.bf16.msra.mxu0 %v3660_v2  ;;  %v3664_v6 = vld [vmem:[%s5068_s0 + $0x28] sm:$0xff]   ;;  %v3669_v8 = vld [vmem:[%s5068_s0] sm:$0xff]   ;;  %v3666_v11 = vld [vmem:[%s5068_s0 + $0x30] sm:$0xff]   ;;  %v4268_v34 = vshrl.u32 %v102_v33, 7 }
   0x4   :  { %3652 = vmatprep.subr.bf16.mxu1 %v3661_v3  ;;  %216 = vmatprep.subr.bf16.mxu0 %v3661_v3  ;;  %v3673_v10 = vld [vmem:[%s5069_s6 + $0x4] ss:$12 sps:$4 sm:$0xff]   ;;  %v3670_v12 = vld [vmem:[%s5068_s0 + $0x8] sm:$0xff]   ;;  %v3668_v13 = vld [vmem:[%s5068_s0 + $0x38] sm:$0xff]  }
   0x5   :  { %v3674_v14 = vld [vmem:[%s5068_s0 + $0x10] sm:$0xff]   ;;  %v3671_v15 = vld [vmem:[%s5069_s6] ss:$12 sps:$4 sm:$0xff]   ;;  %v3675_v16 = vld [vmem:[%s5068_s0 + $0x18] sm:$0xff]   ;;  %v104_v35 = vsub.s32 0, %v4268_v34  ;;  %v108_v37 = vsub.s32 1, %v4268_v34 }
   0x6   :  { %v3679_v17 = vld [vmem:[%s5069_s6 + $0x1c] ss:$12 sps:$4 sm:$0xff]   ;;  %v3677_v18 = vld [vmem:[%s5069_s6 + $0x18] ss:$12 sps:$4 sm:$0xff]   ;;  %v4178_v22 = vld [vmem:[%s5071_s3] ss:$12 sps:$4 sm:$0xff]  }
   0x7   :  { %3654 = vmatpush1.bf16.msra.mxu1 %v3663_v4  ;;  %217 = vmatpush1.bf16.msra.mxu0 %v3663_v4  ;;  %v4154_v19 = vld [vmem:[%s5071_s3 + $0x4] ss:$12 sps:$4 sm:$0xff]   ;;  %v4183_v23 = vld [vmem:[%s5071_s3 + $0x1c] ss:$12 sps:$4 sm:$0xff]   ;;  %v4255_v32 = vld [vmem:[%s5071_s3 + $0x20] ss:$12 sps:$4 sm:$0xff]  }
   0x8   :  { %3447 = vmatprep.subr.bf16.mxu1 %v3665_v5  ;;  %3467 = vmatprep.subr.bf16.mxu0 %v5082_v9  ;;  %v3676_v20 = vld [vmem:[%s5068_s0 + $0x20] sm:$0xff]   ;;  %v4198_v25 = vld [vmem:[%s5070_s1 + $0x8] sm:$0xff]   ;;  %v4208_v26 = vld [vmem:[%s5070_s1 + $0x10] sm:$0xff]  }
   0x9   :  { %v4173_v21 = vld [vmem:[%s5070_s1] sm:$0xff]   ;;  %v4216_v27 = vld [vmem:[%s5070_s1 + $0x18] sm:$0xff]   ;;  %v4232_v29 = vld [vmem:[%s5070_s1 + $0x28] sm:$0xff]  }
   0xa   :  { %3226 = vmatmul.mubr.msk.bf16.vlgmr.msra.gmra.mrb[0].mxu1 %vm189_vm0, %v3664_v6  ;;  %3221 = vmatmul.mubr.msk.bf16.vlgmr.msra.gmra.mrb[0].mxu0 %vm189_vm0, %v3669_v8  ;;  %v4192_v24 = vld [vmem:[%s5071_s3 + $0x18] ss:$12 sps:$4 sm:$0xff]   ;;  %v4240_v30 = vld [vmem:[%s5070_s1 + $0x30] sm:$0xff]   ;;  %v100_v36 = vld [vmem:[%s5072_s4] sm:$0x7] }
   0xb   :  { %3448 = vmatpush3.bf16.msra.mxu1 %v3665_v5  ;;  %306 = vmatprep.mubr.bf16.mxu1 %v5080_v1  ;;  %v4224_v28 = vld [vmem:[%s5070_s1 + $0x20] sm:$0xff]   ;;  %v4248_v31 = vld [vmem:[%s5071_s3 + $0x8] ss:$12 sps:$4 sm:$0xff]   ;;  %v4277_v38 = vrot.slane %v100_v36, %v104_v35  ;;  %v4281_v40 = vrot.slane %v100_v36, %v108_v37 }
   0xc   :  { %3449 = vmatprep.subr.bf16.mxu1 %v3667_v7  ;;  %256 = vmatprep.mubr.bf16.mxu0 %v5080_v1 }
   0xf   :  { %3450 = vmatpush3.bf16.msra.mxu1 %v3667_v7 }
  0x10   :  { %599 = vmatprep.subr.bf16.mxu1 %v3673_v10  ;;  %v112_v10 = vsub.s32 2, %v4268_v34 }
  0x12   :  { %3227 = vmatmul.mubr.msk.bf16.gmra.mrb[4].mxu1 %vm189_vm0, %v3666_v11  ;;  %3222 = vmatmul.mubr.msk.bf16.gmra.mrb[4].mxu0 %vm189_vm0, %v3670_v12 }
  0x13   :  { %316 = vmatprep.mubr.bf16.mxu1 %v5080_v1  ;;  %266 = vmatprep.mubr.bf16.mxu0 %v5080_v1 }
  0x1a   :  { %3228 = vmatmul.mubr.msk.bf16.gmra.mrb[8].mxu1 %vm189_vm0, %v3668_v13  ;;  %3223 = vmatmul.mubr.msk.bf16.gmra.mrb[8].mxu0 %vm189_vm0, %v3674_v14 }
  0x1b   :  { %3451 = vmatprep.mubr.msk.bf16.mxu1 %vm189_vm0, %v3669_v8  ;;  %276 = vmatprep.mubr.bf16.mxu0 %v5080_v1 }
  0x22   :  { %3452 = vmatmul.mubr.msk.bf16.vlgmr.msra.gmra.mrb[12].mxu1 %vm189_vm0, %v3670_v12  ;;  %3224 = vmatmul.mubr.msk.bf16.gmra.mrb[12].mxu0 %vm189_vm0, %v3675_v16 }
  0x23   :  { %600 = vmatpush1.bf16.msra.mxu1 %v3671_v15  ;;  %3455 = vmatprep.mubr.msk.bf16.mxu1 %vm189_vm0, %v3674_v14 }
  0x24   :  { %601 = vmatprep.subr.bf16.mxu1 %v3679_v17  ;;  %286 = vmatprep.mubr.bf16.mxu0 %v5080_v1 }
  0x27   :  { %602 = vmatpush1.bf16.msra.mxu1 %v3677_v18  ;;  %v113_v18 = vrot.slane %v100_v36, %v112_v10 }
  0x28   :  { %874 = vmatprep.subr.bf16.mxu1 %v4154_v19 }
  0x2a   :  { %3456 = vmatmul.mubr.msk.bf16.gmra.mrb[16].mxu1 %vm189_vm0, %v3675_v16  ;;  %3225 = vmatmul.mubr.msk.bf16.gmra.mrb[16].mxu0 %vm189_vm0, %v3676_v20 }
  0x2b   :  { %3459 = vmatprep.mubr.msk.bf16.mxu1 %vm189_vm0, %v3676_v20  ;;  %3471 = vmatprep.mubr.msk.bf16.mxu0 %vm4016_vm1, %v5082_v9 }
  0x32   :  { %3460 = vmatmul.mubr.msk.bf16.gmra.mrb[20].mxu1 %vm189_vm0, %v3664_v6 }
  0x33   :  { %3463 = vmatprep.mubr.msk.bf16.mxu1 %vm189_vm0, %v3666_v11 }
  0x3a   :  { %3464 = vmatmul.mubr.msk.bf16.gmra.mrb[24].mxu1 %vm189_vm0, %v3668_v13 }
  0x3b   :  { %631 = vmatprep.mubr.bf16.mxu1 %v5080_v1 }
  0x42   :  { %3250 = vmatmul.mubr.msk.bf16.vlgmr.msra.gmra.mrb[28].mxu1 %vm189_vm0, %v4173_v21 }
  0x43   :  { %875 = vmatpush1.bf16.msra.mxu1 %v4178_v22  ;;  %641 = vmatprep.mubr.bf16.mxu1 %v5080_v1 }
  0x44   :  { %876 = vmatprep.subr.bf16.mxu1 %v4183_v23 }
  0x47   :  { %877 = vmatpush1.bf16.msra.mxu1 %v4192_v24 }
  0x48   :  { %3499 = vmatprep.subr.bf16.mxu1 %v5082_v9 }
  0x4a   :  { %3251 = vmatmul.mubr.msk.bf16.gmra.mrb[32].mxu1 %vm189_vm0, %v4198_v25 }
  0x4b   :  { %651 = vmatprep.mubr.bf16.mxu1 %v5080_v1 }
  0x52   :  { %3252 = vmatmul.mubr.msk.bf16.gmra.mrb[36].mxu1 %vm189_vm0, %v4208_v26 }
  0x53   :  { %661 = vmatprep.mubr.bf16.mxu1 %v5080_v1 }
  0x5a   :  { %3253 = vmatmul.mubr.msk.bf16.gmra.mrb[40].mxu1 %vm189_vm0, %v4216_v27 }
  0x5b   :  { %671 = vmatprep.mubr.bf16.mxu1 %v5080_v1 }
  0x62   :  { %3254 = vmatmul.mubr.msk.bf16.gmra.mrb[44].mxu1 %vm189_vm0, %v4224_v28 }
  0x63   :  { %681 = vmatprep.mubr.bf16.mxu1 %v5080_v1 }
  0x6a   :  { %3255 = vmatmul.mubr.msk.bf16.gmra.mrb[48].mxu1 %vm189_vm0, %v4232_v29 }
  0x6b   :  { %691 = vmatprep.mubr.bf16.mxu1 %v5080_v1 }
  0x72   :  { %3256 = vmatmul.mubr.msk.bf16.gmra.mrb[52].mxu1 %vm189_vm0, %v4240_v30 }
  0x73   :  { %906 = vmatprep.mubr.bf16.mxu1 %v5080_v1 }
  0x7a   :  { %907 = vmatmul.mubr.bf16.vlgmr.msra.gmra.mrb[56].mxu1 %v5080_v1 }
  0x7b   :  { %3500 = vmatpush3.bf16.msra.mxu1 %v4248_v31  ;;  %3503 = vmatprep.mubr.msk.bf16.mxu1 %vm4016_vm1, %v5082_v9 }
  0x7c   :  { %3501 = vmatprep.subr.bf16.mxu1 %v5082_v9 }
  0x7f   :  { %3502 = vmatpush3.bf16.msra.mxu1 %v4255_v32 }
  0x80   :  { %1016 = vmatprep.subr.bf16.mxu1 %v4154_v19 }
  0x82   :  { %3504 = vmatmul.mubr.bf16.vlgmr.msra.gmra.mrb[60].mxu1 %v5080_v1 }
  0x83   :  { %1017 = vmatpush1.bf16.msra.mxu1 %v4178_v22  ;;  %1048 = vmatprep.mubr.bf16.mxu1 %v5080_v1 }
  0x84   :  { %1018 = vmatprep.subr.bf16.mxu1 %v4183_v23 }
  0x87   :  { %1019 = vmatpush1.bf16.msra.mxu1 %v4192_v24 }
  0x88   :  { %3507 = vmatprep.subr.bf16.mxu1 %v5082_v9 }
  0xdd   :  { %v298_v39 = vpop.f32.mrb[0].mxu1  ;;  %v248_v41 = vpop.f32.mrb[0].mxu0 }
  0xde   :  { %v300_v42 = vpop.f32.mrb[1].mxu1  ;;  %v249_v43 = vadd.f32 %v248_v41, %v4277_v38  ;;  %v250_v44 = vpop.f32.mrb[1].mxu0  ;;  %v299_v48 = vadd.f32 %v298_v39, %v4277_v38 }
  0xdf   :  { %v302_v45 = vpop.f32.mrb[2].mxu1  ;;  %v251_v46 = vadd.f32 %v250_v44, %v4281_v40  ;;  %v252_v47 = vpop.f32.mrb[2].mxu0  ;;  %v301_v53 = vadd.f32 %v300_v42, %v4281_v40 }
  0xe0   :  { %v303_v49 = vadd.f32 %v302_v45, %v4277_v38  ;;  %v304_v50 = vpop.f32.mrb[3].mxu1  ;;  %v253_v51 = vadd.f32 %v252_v47, %v4277_v38  ;;  %v254_v52 = vpop.f32.mrb[3].mxu0 }
  0xe1   :  { %v305_v54 = vadd.f32 %v304_v50, %v4281_v40  ;;  %v255_v55 = vadd.f32 %v254_v52, %v4281_v40 }
  0xe2   :  { %v4291_v56 = vpack.c.bf16 %v303_v49, %v299_v48  ;;  %v4293_v57 = vpack.c.bf16 %v253_v51, %v249_v43 }
  0xe3   :  { %v4295_v58 = vpack.c.bf16 %v305_v54, %v301_v53  ;;  %v4297_v59 = vpack.c.bf16 %v255_v55, %v251_v46 }
  0xe5   :  { %v308_v60 = vpop.f32.mrb[4].mxu1 }
  0xe6   :  { %v310_v61 = vpop.f32.mrb[5].mxu1  ;;  %v309_v63 = vadd.f32 %v308_v60, %v4277_v38 }
  0xe7   :  { %v312_v62 = vpop.f32.mrb[6].mxu1  ;;  %v311_v3 = vadd.f32 %v310_v61, %v4281_v40 }
  0xe8   :  { %v313_v0 = vadd.f32 %v312_v62, %v4277_v38  ;;  %v314_v2 = vpop.f32.mrb[7].mxu1 }
  0xe9   :  { %v315_v4 = vadd.f32 %v314_v2, %v4281_v40 }
  0xea   :  { %v4303_v5 = vpack.c.bf16 %v313_v0, %v309_v63 }
  0xeb   :  { %v4305_v6 = vpack.c.bf16 %v315_v4, %v311_v3 }
  0xed   :  { %v318_v7 = vpop.f32.mrb[8].mxu1 }
  0xee   :  { %v320_v8 = vpop.f32.mrb[9].mxu1  ;;  %v319_v12 = vadd.f32 %v318_v7, %v4277_v38 }
  0xef   :  { %v322_v11 = vpop.f32.mrb[10].mxu1  ;;  %v321_v15 = vadd.f32 %v320_v8, %v4281_v40 }
  0xf0   :  { %v323_v13 = vadd.f32 %v322_v11, %v4277_v38  ;;  %v324_v14 = vpop.f32.mrb[11].mxu1 }
  0xf1   :  { %v325_v16 = vadd.f32 %v324_v14, %v4281_v40  ;;  %v258_v14 = vpop.f32.mrb[4].mxu0 }
  0xf2   :  { %v4312_v17 = vpack.c.bf16 %v323_v13, %v319_v12  ;;  %v3695_v13 = vld [vmem:[%s5069_s6 + $0x8] ss:$12 sps:$4 sm:$0xff]  }
  0xf3   :  { %v4316_v20 = vpack.c.bf16 %v325_v16, %v321_v15  ;;  %v259_v15 = vadd.f32 %v258_v14, %v4277_v38  ;;  %v260_v16 = vpop.f32.mrb[5].mxu0  ;;  %3468 = vmatpush3.bf16.msra.mxu0 %v3695_v13 }
  0xf4   :  { %3469 = vmatprep.subr.bf16.mxu0 %v5082_v9 }
  0xf5   :  { %v3453_v33 = vpop.f32.mrb[12].mxu1 }
  0xf6   :  { %v370_v39 = vadd.f32 %v3453_v33, %v113_v18  ;;  %v361_v41 = vpop.f32.mrb[13].mxu1 }
  0xf7   :  { %v3454_v42 = vpop.f32.mrb[14].mxu1  ;;  %v362_v45 = vadd.f32 %v361_v41, %v113_v18  ;;  %v261_v41 = vadd.f32 %v260_v16, %v4281_v40 }
  0xf8   :  { %v373_v43 = vadd.f32 %v3454_v42, %v113_v18  ;;  %v364_v44 = vpop.f32.mrb[15].mxu1  ;;  %v262_v42 = vpop.f32.mrb[6].mxu0 }
  0xf9   :  { %v365_v46 = vadd.f32 %v364_v44, %v113_v18 }
  0xfa   :  { %v4318_v47 = vpack.c.bf16 %v373_v43, %v370_v39  ;;  %v3696_v39 = vld [vmem:[%s5069_s6 + $0x20] ss:$12 sps:$4 sm:$0xff]  }
  0xfb   :  { %v4320_v48 = vpack.c.bf16 %v365_v46, %v362_v45  ;;  %v263_v45 = vadd.f32 %v262_v42, %v4277_v38  ;;  %v264_v46 = vpop.f32.mrb[7].mxu0  ;;  %3470 = vmatpush3.bf16.msra.mxu0 %v3696_v39 }
  0xfc   :  { %1158 = vmatprep.subr.bf16.mxu0 %v4154_v19 }
  0xfd   :  { %v3457_v49 = vpop.f32.mrb[16].mxu1 }
  0xfe   :  { %v386_v50 = vadd.f32 %v3457_v49, %v113_v18  ;;  %v377_v51 = vpop.f32.mrb[17].mxu1  ;;  %3472 = vmatmul.mubr.msk.bf16.vlgmr.msra.gmra.mrb[20].mxu0 %vm189_vm0, %v4173_v21 }
  0xff   :  { %v378_v52 = vadd.f32 %v377_v51, %v113_v18  ;;  %v3458_v53 = vpop.f32.mrb[18].mxu1  ;;  %v265_v51 = vadd.f32 %v264_v46, %v4281_v40  ;;  %1159 = vmatpush1.bf16.msra.mxu0 %v4178_v22  ;;  %3475 = vmatprep.mubr.msk.bf16.mxu0 %vm4016_vm1, %v5082_v9 }
 0x100   :  { %v389_v36 = vadd.f32 %v3458_v53, %v113_v18  ;;  %v380_v54 = vpop.f32.mrb[19].mxu1  ;;  %1160 = vmatprep.subr.bf16.mxu0 %v4183_v23 }
 0x101   :  { %v381_v55 = vadd.f32 %v380_v54, %v113_v18  ;;  %v4346_v54 = vpack.c.bf16 %v263_v45, %v259_v15 }
 0x102   :  { %v4322_v60 = vpack.c.bf16 %v389_v36, %v386_v50  ;;  %v4344_v36 = vld [vmem:[%s5073_s8] sm:$0x7] }
 0x103   :  { %v4324_v61 = vpack.c.bf16 %v381_v55, %v378_v52  ;;  %1161 = vmatpush1.bf16.msra.mxu0 %v4192_v24 }
 0x104   :  { %1300 = vmatprep.subr.bf16.mxu0 %v4154_v19 }
 0x105   :  { %v3461_v62 = vpop.f32.mrb[20].mxu1 }
 0x106   :  { %v402_v63 = vadd.f32 %v3461_v62, %v113_v18  ;;  %v393_v0 = vpop.f32.mrb[21].mxu1  ;;  %v4348_v62 = vpack.c.bf16 %v265_v51, %v261_v41  ;;  %3476 = vmatmul.mubr.msk.bf16.gmra.mrb[24].mxu0 %vm189_vm0, %v4198_v25 }
 0x107   :  { %v394_v2 = vadd.f32 %v393_v0, %v113_v18  ;;  %v3462_v3 = vpop.f32.mrb[22].mxu1  ;;  %3479 = vmatprep.mubr.msk.bf16.mxu0 %vm4016_vm1, %v5082_v9 }
 0x108   :  { %v405_v4 = vadd.f32 %v3462_v3, %v113_v18  ;;  %v396_v7 = vpop.f32.mrb[23].mxu1  ;;  %v4363_v3 = vrot.slane %v4344_v36, %v104_v35 }
 0x109   :  { %v397_v8 = vadd.f32 %v396_v7, %v113_v18 }
 0x10a   :  { %v4326_v11 = vpack.c.bf16 %v405_v4, %v402_v63 }
 0x10b   :  { %v4328_v12 = vpack.c.bf16 %v397_v8, %v394_v2  ;;  %v4358_v2 = vrot.slane %v4344_v36, %v108_v37 }
 0x10d   :  { %v3465_v33 = vpop.f32.mrb[24].mxu1 }
 0x10e   :  { %v418_v43 = vadd.f32 %v3465_v33, %v113_v18  ;;  %v409_v44 = vpop.f32.mrb[25].mxu1  ;;  %3480 = vmatmul.mubr.msk.bf16.gmra.mrb[28].mxu0 %vm189_vm0, %v4208_v26 }
 0x10f   :  { %v410_v49 = vadd.f32 %v409_v44, %v113_v18  ;;  %v3466_v50 = vpop.f32.mrb[26].mxu1  ;;  %3483 = vmatprep.mubr.msk.bf16.mxu0 %vm4016_vm1, %v5082_v9 }
 0x110   :  { %v421_v52 = vadd.f32 %v3466_v50, %v113_v18  ;;  %v412_v53 = vpop.f32.mrb[27].mxu1 }
 0x111   :  { %v413_v55 = vadd.f32 %v412_v53, %v113_v18 }
 0x112   :  { %v4350_v63 = vpack.c.bf16 %v421_v52, %v418_v43 }
 0x113   :  { %v4353_v0 = vpack.c.bf16 %v413_v55, %v410_v49 }
 0x115   :  { %v633_v18 = vpop.f32.mrb[28].mxu1 }
 0x116   :  { %v635_v4 = vpop.f32.mrb[29].mxu1  ;;  %v634_v8 = vadd.f32 %v633_v18, %v4363_v3  ;;  %3484 = vmatmul.mubr.msk.bf16.gmra.mrb[32].mxu0 %vm189_vm0, %v4216_v27 }
 0x117   :  { %v636_v37 = vadd.f32 %v635_v4, %v4358_v2  ;;  %v637_v7 = vpop.f32.mrb[30].mxu1  ;;  %3487 = vmatprep.mubr.msk.bf16.mxu0 %vm4016_vm1, %v5082_v9 }
 0x118   :  { %v638_v35 = vadd.f32 %v637_v7, %v4363_v3  ;;  %v639_v13 = vpop.f32.mrb[31].mxu1 }
 0x119   :  { %v640_v14 = vadd.f32 %v639_v13, %v4358_v2 }
 0x11a   :  { %v4376_v21 = vpack.c.bf16 %v638_v35, %v634_v8 }
 0x11b   :  { %v4379_v15 = vpack.c.bf16 %v640_v14, %v636_v37 }
 0x11d   :  { %v643_v16 = vpop.f32.mrb[32].mxu1 }
 0x11e   :  { %v644_v33 = vadd.f32 %v643_v16, %v4363_v3  ;;  %v645_v39 = vpop.f32.mrb[33].mxu1  ;;  %3488 = vmatmul.mubr.msk.bf16.gmra.mrb[36].mxu0 %vm189_vm0, %v4224_v28 }
 0x11f   :  { %v646_v41 = vadd.f32 %v645_v39, %v4358_v2  ;;  %v647_v42 = vpop.f32.mrb[34].mxu1  ;;  %3491 = vmatprep.mubr.msk.bf16.mxu0 %vm4016_vm1, %v5082_v9 }
 0x120   :  { %v648_v43 = vadd.f32 %v647_v42, %v4363_v3  ;;  %v649_v44 = vpop.f32.mrb[35].mxu1 }
 0x121   :  { %v650_v45 = vadd.f32 %v649_v44, %v4358_v2 }
 0x122   :  { %v4389_v46 = vpack.c.bf16 %v648_v43, %v644_v33 }
 0x123   :  { %v4391_v49 = vpack.c.bf16 %v650_v45, %v646_v41 }
 0x125   :  { %v653_v25 = vpop.f32.mrb[36].mxu1 }
 0x126   :  { %v654_v50 = vadd.f32 %v653_v25, %v4363_v3  ;;  %v655_v51 = vpop.f32.mrb[37].mxu1  ;;  %3492 = vmatmul.mubr.msk.bf16.gmra.mrb[40].mxu0 %vm189_vm0, %v4232_v29 }
 0x127   :  { %v656_v52 = vadd.f32 %v655_v51, %v4358_v2  ;;  %v657_v53 = vpop.f32.mrb[38].mxu1  ;;  %3495 = vmatprep.mubr.msk.bf16.mxu0 %vm4016_vm1, %v5082_v9 }
 0x128   :  { %v658_v55 = vadd.f32 %v657_v53, %v4363_v3  ;;  %v659_v18 = vpop.f32.mrb[39].mxu1 }
 0x129   :  { %v660_v4 = vadd.f32 %v659_v18, %v4358_v2 }
 0x12a   :  { %v4401_v37 = vpack.c.bf16 %v658_v55, %v654_v50 }
 0x12b   :  { %v4403_v7 = vpack.c.bf16 %v660_v4, %v656_v52 }
 0x12d   :  { %v663_v26 = vpop.f32.mrb[40].mxu1 }
 0x12e   :  { %v664_v8 = vadd.f32 %v663_v26, %v4363_v3  ;;  %v665_v35 = vpop.f32.mrb[41].mxu1  ;;  %3496 = vmatmul.mubr.msk.bf16.gmra.mrb[44].mxu0 %vm189_vm0, %v4240_v30  ;;  %v959_v30 = vunpack.c.l.bf16 %v4297_v59 }
 0x12f   :  { %v666_v13 = vadd.f32 %v665_v35, %v4358_v2  ;;  %v667_v14 = vpop.f32.mrb[42].mxu1  ;;  %1190 = vmatprep.mubr.bf16.mxu0 %v5080_v1 }
 0x130   :  { %v668_v16 = vadd.f32 %v667_v14, %v4363_v3  ;;  %v669_v33 = vpop.f32.mrb[43].mxu1 }
 0x131   :  { %v670_v39 = vadd.f32 %v669_v33, %v4358_v2 }
 0x132   :  { %v4413_v41 = vpack.c.bf16 %v668_v16, %v664_v8 }
 0x133   :  { %v4415_v42 = vpack.c.bf16 %v670_v39, %v666_v13 }
 0x135   :  { %v673_v27 = vpop.f32.mrb[44].mxu1 }
 0x136   :  { %v674_v43 = vadd.f32 %v673_v27, %v4363_v3  ;;  %v675_v44 = vpop.f32.mrb[45].mxu1 }
 0x137   :  { %v676_v45 = vadd.f32 %v675_v44, %v4358_v2  ;;  %v677_v25 = vpop.f32.mrb[46].mxu1 }
 0x138   :  { %v678_v50 = vadd.f32 %v677_v25, %v4363_v3  ;;  %v679_v51 = vpop.f32.mrb[47].mxu1 }
 0x139   :  { %v680_v52 = vadd.f32 %v679_v51, %v4358_v2 }
 0x13a   :  { %v4425_v53 = vpack.c.bf16 %v678_v50, %v674_v43 }
 0x13b   :  { %v4427_v55 = vpack.c.bf16 %v680_v52, %v676_v45  ;;  %v958_v52 = vunpack.c.l.bf16 %v4293_v57 }
 0x13d   :  { %v683_v28 = vpop.f32.mrb[48].mxu1 }
 0x13e   :  { %v684_v18 = vadd.f32 %v683_v28, %v4363_v3  ;;  %v685_v4 = vpop.f32.mrb[49].mxu1 }
 0x13f   :  { %v686_v26 = vadd.f32 %v685_v4, %v4358_v2  ;;  %v687_v8 = vpop.f32.mrb[50].mxu1 }
 0x140   :  { %v688_v35 = vadd.f32 %v687_v8, %v4363_v3  ;;  %v689_v13 = vpop.f32.mrb[51].mxu1  ;;  %v961_v8 = vunpack.c.h.bf16 %v4293_v57 }
 0x141   :  { %v690_v14 = vadd.f32 %v689_v13, %v4358_v2 }
 0x142   :  { %v4437_v16 = vpack.c.bf16 %v688_v35, %v684_v18 }
 0x143   :  { %v4439_v33 = vpack.c.bf16 %v690_v14, %v686_v26 }
 0x144   :  { %5091 = vst [vmem:[#allocation5_spill] sm:$0xff] %v4437_v16 }
 0x145   :  { %5092 = vst [vmem:[#allocation6_spill] sm:$0xff] %v4439_v33  ;;  %v693_v29 = vpop.f32.mrb[52].mxu1 }
 0x146   :  { %v694_v39 = vadd.f32 %v693_v29, %v4363_v3  ;;  %v695_v27 = vpop.f32.mrb[53].mxu1 }
 0x147   :  { %v696_v43 = vadd.f32 %v695_v27, %v4358_v2  ;;  %v697_v44 = vpop.f32.mrb[54].mxu1 }
 0x148   :  { %v698_v45 = vadd.f32 %v697_v44, %v4363_v3  ;;  %v699_v25 = vpop.f32.mrb[55].mxu1  ;;  %v962_v3 = vunpack.c.h.bf16 %v4297_v59  ;;  %v4459_v59 = vld [vmem:[%s5074_s5] ss:$0 sm:$0xff] }
 0x149   :  { %v700_v50 = vadd.f32 %v699_v25, %v4358_v2 }
 0x14a   :  { %v4448_v51 = vpack.c.bf16 %v698_v45, %v694_v39 }
 0x14b   :  { %v4451_v28 = vpack.c.bf16 %v700_v50, %v696_v43 }
 0x14c   :  { %5093 = vst [vmem:[#allocation7_spill] sm:$0xff] %v4448_v51 }
 0x14d   :  { %5094 = vst [vmem:[#allocation8_spill] sm:$0xff] %v4451_v28  ;;  %v908_v18 = vpop.f32.mrb[56].mxu1 }
 0x14e   :  { %v964_v4 = vadd.f32 %v958_v52, %v908_v18  ;;  %v910_v26 = vpop.f32.mrb[57].mxu1 }
 0x14f   :  { %v978_v35 = vadd.f32 %v959_v30, %v910_v26  ;;  %v912_v13 = vpop.f32.mrb[58].mxu1 }
 0x150   :  { %v3270_v14 = vmul.f32 -1.442695, %v964_v4  ;;  %v965_v29 = vadd.f32 %v961_v8, %v912_v13  ;;  %v914_v2 = vpop.f32.mrb[59].mxu1 }
 0x151   :  { %v979_v39 = vadd.f32 %v962_v3, %v914_v2  ;;  %v3272_v50 = vmul.f32 -1.442695, %v978_v35  ;;  %v960_v35 = vunpack.c.l.bf16 %v4320_v48  ;;  %v963_v2 = vunpack.c.h.bf16 %v4320_v48 }
 0x152   :  { %3707 = vpow2.f32 %v3270_v14  ;;  %v3271_v27 = vmul.f32 -1.442695, %v965_v29 }
 0x153   :  { %v3273_v18 = vmul.f32 -1.442695, %v979_v39 }
 0x154   :  { %3709 = vpow2.f32 %v3271_v27 }
 0x155   :  { %v951_v43 = vpop.f32.mrb[60].mxu1  ;;  %3711 = vpow2.f32 %v3272_v50 }
 0x156   :  { %v3505_v44 = vpop.f32.mrb[61].mxu1  ;;  %v992_v4 = vadd.f32 %v4459_v59, %v951_v43 }
 0x157   :  { %v954_v45 = vpop.f32.mrb[62].mxu1 }
 0x158   :  { %v3506_v25 = vpop.f32.mrb[63].mxu1  ;;  %v993_v14 = vadd.f32 %v4459_v59, %v954_v45 }
 0x15c   :  { %v3708_v52 = vpop.eup %3707 }
 0x15d   :  { %v972_v1 = vadd.f32 1.0, %v3708_v52 }
 0x15e   :  { %v3710_v57 = vpop.eup %3709 }
 0x15f   :  { %3713 = vrcp.f32 %v972_v1  ;;  %v973_v30 = vadd.f32 1.0, %v3710_v57  ;;  %v3712_v26 = vpop.eup %3711 }
 0x160   :  { %3715 = vpow2.f32 %v3273_v18  ;;  %v986_v1 = vadd.f32 1.0, %v3712_v26 }
 0x161   :  { %3717 = vrcp.f32 %v973_v30 }
 0x169   :  { %v3714_v8 = vpop.eup %3713 }
 0x16a   :  { %v3716_v13 = vpop.eup %3715  ;;  %v994_v3 = vmul.f32 %v3714_v8, %v992_v4 }
 0x16b   :  { %v3718_v29 = vpop.eup %3717  ;;  %v987_v44 = vadd.f32 1.0, %v3716_v13  ;;  %v268_v13 = vpop.f32.mrb[8].mxu0 }
 0x16c   :  { %v996_v39 = vadd.f32 %v994_v3, %v960_v35  ;;  %v995_v27 = vmul.f32 %v3718_v29, %v993_v14  ;;  %v269_v35 = vadd.f32 %v268_v13, %v4277_v38  ;;  %v270_v3 = vpop.f32.mrb[9].mxu0 }
 0x16d   :  { %v271_v14 = vadd.f32 %v270_v3, %v4281_v40  ;;  %v272_v29 = vpop.f32.mrb[10].mxu0  ;;  %v507_v3 = vrot.slane %v4344_v36, %v112_v10 }
 0x16e   :  { %3719 = vtanh.f32 %v996_v39  ;;  %v997_v25 = vadd.f32 %v995_v27, %v963_v2  ;;  %v274_v2 = vpop.f32.mrb[11].mxu0 }
 0x16f   :  { %3721 = vrcp.f32 %v986_v1  ;;  %v273_v1 = vadd.f32 %v272_v29, %v4277_v38  ;;  %v275_v39 = vadd.f32 %v274_v2, %v4281_v40  ;;  %v278_v27 = vpop.f32.mrb[12].mxu0 }
 0x170   :  { %3723 = vtanh.f32 %v997_v25  ;;  %v279_v25 = vadd.f32 %v278_v27, %v4277_v38 }
 0x171   :  { %3725 = vrcp.f32 %v987_v44  ;;  %v4489_v44 = vpack.c.bf16 %v273_v1, %v269_v35 }
 0x178   :  { %v3720_v43 = vpop.eup %3719 }
 0x179   :  { %v3722_v50 = vpop.eup %3721  ;;  %v1000_v52 = vsub.f32 0.0, %v3720_v43 }
 0x17a   :  { %v3724_v18 = vpop.eup %3723 }
 0x17b   :  { %v1001_v57 = vsub.f32 0.0, %v3724_v18  ;;  %v1002_v30 = vmul.f32 %v3722_v50, %v1000_v52  ;;  %v3726_v4 = vpop.eup %3725  ;;  %v4492_v50 = vpack.c.bf16 %v275_v39, %v271_v14 }
 0x17d   :  { %v1003_v45 = vmul.f32 %v3726_v4, %v1001_v57  ;;  %v4465_v8 = vadd.f32 %v3720_v43, %v1002_v30  ;;  %v280_v43 = vpop.f32.mrb[13].mxu0 }
 0x17e   :  { %v281_v52 = vadd.f32 %v280_v43, %v4281_v40 }
 0x17f   :  { %v4467_v26 = vadd.f32 %v3724_v18, %v1003_v45  ;;  %v282_v18 = vpop.f32.mrb[14].mxu0 }
 0x180   :  { %v283_v57 = vadd.f32 %v282_v18, %v4277_v38  ;;  %v284_v30 = vpop.f32.mrb[15].mxu0 }
 0x181   :  { %v1012_v48 = vpack.c.bf16 %v4467_v26, %v4465_v8  ;;  %v285_v4 = vadd.f32 %v284_v30, %v4281_v40  ;;  %v288_v45 = vpop.f32.mrb[16].mxu0 }
 0x182   :  { %v289_v13 = vadd.f32 %v288_v45, %v4277_v38  ;;  %v290_v35 = vpop.f32.mrb[17].mxu0 }
 0x183   :  { %3274 = vmatmul.mubr.msk.bf16.vlgmr.msra.gmra.mrb[64].mxu1 %vm189_vm0, %v1012_v48  ;;  %v4503_v14 = vpack.c.bf16 %v285_v4, %v281_v52  ;;  %v291_v29 = vadd.f32 %v290_v35, %v4281_v40  ;;  %v292_v1 = vpop.f32.mrb[18].mxu0 }
 0x184   :  { %3508 = vmatpush3.bf16.msra.mxu1 %v4248_v31  ;;  %3511 = vmatprep.mubr.msk.bf16.mxu1 %vm4016_vm1, %v5082_v9  ;;  %v293_v2 = vadd.f32 %v292_v1, %v4277_v38  ;;  %v294_v39 = vpop.f32.mrb[19].mxu0 }
 0x185   :  { %3509 = vmatprep.subr.bf16.mxu1 %v5082_v9  ;;  %v295_v27 = vadd.f32 %v294_v39, %v4281_v40 }
 0x187   :  { %v4510_v30 = vpack.c.bf16 %v295_v27, %v291_v29 }
 0x188   :  { %3510 = vmatpush3.bf16.msra.mxu1 %v4255_v32 }
 0x189   :  { %3515 = vmatprep.subr.bf16.mxu1 %v5082_v9 }
 0x18b   :  { %3512 = vmatmul.mubr.msk.bf16.vlgmr.msra.gmra.mrb[68].mxu1 %vm189_vm0, %v1012_v48  ;;  %v4497_v48 = vpack.c.bf16 %v283_v57, %v279_v25  ;;  %v4508_v25 = vpack.c.bf16 %v293_v2, %v289_v13 }
 0x18c   :  { %3516 = vmatpush3.bf16.msra.mxu1 %v4248_v31  ;;  %3519 = vmatprep.mubr.msk.bf16.mxu1 %vm4016_vm1, %v5082_v9 }
 0x18d   :  { %3517 = vmatprep.subr.bf16.mxu1 %v5082_v9 }
 0x190   :  { %3518 = vmatpush3.bf16.msra.mxu1 %v4255_v32 }
 0x191   :  { %3523 = vmatprep.subr.bf16.mxu1 %v5082_v9 }
 0x1d1   :  { %v736_v43 = vpop.f32.mrb[20].mxu0 }
 0x1d2   :  { %v737_v18 = vadd.f32 %v736_v43, %v507_v3  ;;  %v3473_v57 = vpop.f32.mrb[21].mxu0 }
 0x1d3   :  { %v739_v34 = vpop.f32.mrb[22].mxu0 }
 0x1d4   :  { %v740_v45 = vadd.f32 %v739_v34, %v507_v3  ;;  %v3474_v10 = vpop.f32.mrb[23].mxu0 }
 0x1d6   :  { %v4512_v52 = vpack.c.bf16 %v740_v45, %v737_v18 }
 0x1d9   :  { %v744_v36 = vpop.f32.mrb[24].mxu0 }
 0x1da   :  { %v745_v4 = vadd.f32 %v744_v36, %v507_v3  ;;  %v3477_v35 = vpop.f32.mrb[25].mxu0 }
 0x1db   :  { %v747_v9 = vpop.f32.mrb[26].mxu0 }
 0x1dc   :  { %v748_v38 = vadd.f32 %v747_v9, %v507_v3  ;;  %v3478_v1 = vpop.f32.mrb[27].mxu0 }
 0x1de   :  { %v4514_v40 = vpack.c.bf16 %v748_v38, %v745_v4 }
 0x1e1   :  { %v752_v28 = vpop.f32.mrb[28].mxu0 }
 0x1e2   :  { %v753_v13 = vadd.f32 %v752_v28, %v507_v3  ;;  %v3481_v2 = vpop.f32.mrb[29].mxu0 }
 0x1e3   :  { %v755_v39 = vpop.f32.mrb[30].mxu0 }
 0x1e4   :  { %v756_v43 = vadd.f32 %v755_v39, %v507_v3  ;;  %v3482_v29 = vpop.f32.mrb[31].mxu0 }
 0x1e6   :  { %v4516_v57 = vpack.c.bf16 %v756_v43, %v753_v13 }
 0x1e9   :  { %v760_v27 = vpop.f32.mrb[32].mxu0 }
 0x1ea   :  { %v761_v34 = vadd.f32 %v760_v27, %v507_v3  ;;  %v3485_v10 = vpop.f32.mrb[33].mxu0 }
 0x1eb   :  { %v763_v18 = vpop.f32.mrb[34].mxu0 }
 0x1ec   :  { %v764_v45 = vadd.f32 %v763_v18, %v507_v3  ;;  %v3486_v36 = vpop.f32.mrb[35].mxu0 }
 0x1ee   :  { %v4518_v51 = vpack.c.bf16 %v764_v45, %v761_v34 }
 0x1f1   :  { %v768_v35 = vpop.f32.mrb[36].mxu0 }
 0x1f2   :  { %v769_v9 = vadd.f32 %v768_v35, %v507_v3  ;;  %v3489_v1 = vpop.f32.mrb[37].mxu0 }
 0x1f3   :  { %v771_v4 = vpop.f32.mrb[38].mxu0 }
 0x1f4   :  { %v772_v38 = vadd.f32 %v771_v4, %v507_v3  ;;  %v3490_v28 = vpop.f32.mrb[39].mxu0  ;;  %v1100_v4 = vunpack.c.l.bf16 %v4346_v54 }
 0x1f6   :  { %v4520_v33 = vpack.c.bf16 %v772_v38, %v769_v9  ;;  %v1101_v9 = vunpack.c.l.bf16 %v4348_v62 }
 0x1f8   :  { %5095 = vst [vmem:[#allocation9_spill] sm:$0xff] %v4520_v33 }
 0x1f9   :  { %v776_v2 = vpop.f32.mrb[40].mxu0 }
 0x1fa   :  { %v777_v39 = vadd.f32 %v776_v2, %v507_v3  ;;  %v3493_v29 = vpop.f32.mrb[41].mxu0 }
 0x1fb   :  { %v779_v13 = vpop.f32.mrb[42].mxu0  ;;  %v1103_v29 = vunpack.c.h.bf16 %v4346_v54 }
 0x1fc   :  { %v780_v43 = vadd.f32 %v779_v13, %v507_v3  ;;  %v3494_v27 = vpop.f32.mrb[43].mxu0 }
 0x1fe   :  { %v4522_v16 = vpack.c.bf16 %v780_v43, %v777_v39  ;;  %v1104_v39 = vunpack.c.h.bf16 %v4348_v62 }
 0x200   :  { %5096 = vst [vmem:[#allocation10_spill] sm:$0xff] %v4522_v16 }
 0x201   :  { %v784_v10 = vpop.f32.mrb[44].mxu0 }
 0x202   :  { %v785_v18 = vadd.f32 %v784_v10, %v507_v3  ;;  %v3497_v36 = vpop.f32.mrb[45].mxu0 }
 0x203   :  { %v787_v34 = vpop.f32.mrb[46].mxu0 }
 0x204   :  { %v788_v45 = vadd.f32 %v787_v34, %v507_v3  ;;  %v3498_v35 = vpop.f32.mrb[47].mxu0 }
 0x206   :  { %v4524_v1 = vpack.c.bf16 %v788_v45, %v785_v18 }
 0x208   :  { %5097 = vst [vmem:[#allocation11_spill] sm:$0xff] %v4524_v1 }
 0x256   :  { %v1050_v38 = vpop.f32.mrb[64].mxu1 }
 0x257   :  { %v1106_v28 = vadd.f32 %v1100_v4, %v1050_v38  ;;  %v1052_v2 = vpop.f32.mrb[65].mxu1 }
 0x258   :  { %v1120_v13 = vadd.f32 %v1101_v9, %v1052_v2  ;;  %v1054_v27 = vpop.f32.mrb[66].mxu1 }
 0x259   :  { %v3276_v43 = vmul.f32 -1.442695, %v1106_v28  ;;  %v1107_v10 = vadd.f32 %v1103_v29, %v1054_v27  ;;  %v1056_v36 = vpop.f32.mrb[67].mxu1  ;;  %v1102_v27 = vunpack.c.l.bf16 %v4318_v47 }
 0x25a   :  { %v1121_v3 = vadd.f32 %v1104_v39, %v1056_v36  ;;  %v3278_v16 = vmul.f32 -1.442695, %v1120_v13 }
 0x25b   :  { %3727 = vpow2.f32 %v3276_v43  ;;  %v3277_v18 = vmul.f32 -1.442695, %v1107_v10  ;;  %v1105_v10 = vunpack.c.h.bf16 %v4318_v47 }
 0x25c   :  { %v3279_v38 = vmul.f32 -1.442695, %v1121_v3 }
 0x25d   :  { %3729 = vpow2.f32 %v3277_v18 }
 0x25e   :  { %v1093_v34 = vpop.f32.mrb[68].mxu1  ;;  %3731 = vpow2.f32 %v3278_v16 }
 0x25f   :  { %v3513_v45 = vpop.f32.mrb[69].mxu1  ;;  %v1134_v28 = vadd.f32 %v4459_v59, %v1093_v34 }
 0x260   :  { %v1096_v35 = vpop.f32.mrb[70].mxu1 }
 0x261   :  { %v3514_v1 = vpop.f32.mrb[71].mxu1 }
 0x262   :  { %v1135_v1 = vadd.f32 %v4459_v59, %v1096_v35 }
 0x265   :  { %v3728_v4 = vpop.eup %3727 }
 0x266   :  { %v1114_v33 = vadd.f32 1.0, %v3728_v4 }
 0x267   :  { %v3730_v54 = vpop.eup %3729 }
 0x268   :  { %3733 = vrcp.f32 %v1114_v33  ;;  %v1115_v9 = vadd.f32 1.0, %v3730_v54  ;;  %v3732_v62 = vpop.eup %3731 }
 0x269   :  { %3735 = vpow2.f32 %v3279_v38  ;;  %v1128_v43 = vadd.f32 1.0, %v3732_v62 }
 0x26a   :  { %3737 = vrcp.f32 %v1115_v9 }
 0x272   :  { %v3734_v2 = vpop.eup %3733 }
 0x273   :  { %v3736_v29 = vpop.eup %3735  ;;  %v1136_v39 = vmul.f32 %v3734_v2, %v1134_v28 }
 0x274   :  { %v3738_v13 = vpop.eup %3737  ;;  %v1129_v33 = vadd.f32 1.0, %v3736_v29 }
 0x275   :  { %v1138_v36 = vadd.f32 %v1136_v39, %v1102_v27  ;;  %v1137_v16 = vmul.f32 %v3738_v13, %v1135_v1  ;;  %v1245_v13 = vunpack.c.h.bf16 %v4489_v44 }
 0x277   :  { %3739 = vtanh.f32 %v1138_v36  ;;  %v1139_v3 = vadd.f32 %v1137_v16, %v1105_v10  ;;  %v1246_v36 = vunpack.c.h.bf16 %v4492_v50 }
 0x278   :  { %3741 = vrcp.f32 %v1128_v43 }
 0x279   :  { %3743 = vtanh.f32 %v1139_v3 }
 0x27a   :  { %3745 = vrcp.f32 %v1129_v33 }
 0x281   :  { %v3740_v18 = vpop.eup %3739 }
 0x282   :  { %v3742_v34 = vpop.eup %3741  ;;  %v1142_v45 = vsub.f32 %v4465_v8, %v3740_v18  ;;  %v5098_v8 = vmov 0.0  }
 0x283   :  { %v3744_v4 = vpop.eup %3743 }
 0x284   :  { %v1144_v38 = vmul.f32 %v3742_v34, %v1142_v45  ;;  %v1143_v35 = vsub.f32 %v4467_v26, %v3744_v4  ;;  %v3746_v54 = vpop.eup %3745  ;;  %v5099_v26 = vmov 0  }
 0x286   :  { %v4536_v9 = vadd.f32 %v3740_v18, %v1144_v38  ;;  %v1145_v47 = vmul.f32 %v3746_v54, %v1143_v35 }
 0x288   :  { %v4538_v62 = vadd.f32 %v3744_v4, %v1145_v47 }
 0x28a   :  { %v1154_v28 = vpack.c.bf16 %v4538_v62, %v4536_v9 }
 0x28c   :  { %3280 = vmatmul.mubr.msk.bf16.vlgmr.msra.gmra.mrb[48].mxu0 %vm189_vm0, %v1154_v28  ;;  %3520 = vmatmul.mubr.msk.bf16.vlgmr.msra.gmra.mrb[72].mxu1 %vm189_vm0, %v1154_v28 }
 0x28d   :  { %1301 = vmatpush1.bf16.msra.mxu0 %v4178_v22  ;;  %3524 = vmatpush3.bf16.msra.mxu1 %v4248_v31  ;;  %v1242_v22 = vunpack.c.l.bf16 %v4489_v44 }
 0x28e   :  { %1302 = vmatprep.subr.bf16.mxu0 %v4183_v23  ;;  %3525 = vmatprep.subr.bf16.mxu1 %v5098_v8  ;;  %v1243_v23 = vunpack.c.l.bf16 %v4492_v50 }
 0x28f   :  { %1332 = vmatprep.mubr.bf16.mxu0 %v5099_v26  ;;  %3527 = vmatprep.mubr.msk.bf16.mxu1 %vm4016_vm1, %v5098_v8 }
 0x291   :  { %1303 = vmatpush1.bf16.msra.mxu0 %v4192_v24  ;;  %3526 = vmatpush3.bf16.msra.mxu1 %v4255_v32 }
 0x292   :  { %1442 = vmatprep.subr.bf16.mxu0 %v4154_v19  ;;  %3531 = vmatprep.subr.bf16.mxu1 %v5098_v8 }
 0x35f   :  { %v1192_v2 = vpop.f32.mrb[48].mxu0  ;;  %v1235_v29 = vpop.f32.mrb[72].mxu1 }
 0x360   :  { %v1248_v27 = vadd.f32 %v1242_v22, %v1192_v2  ;;  %v1194_v39 = vpop.f32.mrb[49].mxu0  ;;  %v3521_v1 = vpop.f32.mrb[73].mxu1  ;;  %v1276_v50 = vadd.f32 %v4459_v59, %v1235_v29  ;;  %v1244_v2 = vunpack.c.l.bf16 %v4324_v61 }
 0x361   :  { %v1262_v43 = vadd.f32 %v1243_v23, %v1194_v39  ;;  %v1196_v10 = vpop.f32.mrb[50].mxu0  ;;  %v1238_v24 = vpop.f32.mrb[74].mxu1 }
 0x362   :  { %v3282_v16 = vmul.f32 -1.442695, %v1248_v27  ;;  %v1249_v19 = vadd.f32 %v1245_v13, %v1196_v10  ;;  %v1198_v33 = vpop.f32.mrb[51].mxu0  ;;  %v3522_v3 = vpop.f32.mrb[75].mxu1  ;;  %v1277_v27 = vadd.f32 %v4459_v59, %v1238_v24  ;;  %v1247_v13 = vunpack.c.h.bf16 %v4324_v61 }
 0x363   :  { %v1263_v18 = vadd.f32 %v1246_v36, %v1198_v33  ;;  %v3284_v45 = vmul.f32 -1.442695, %v1262_v43 }
 0x364   :  { %3747 = vpow2.f32 %v3282_v16  ;;  %v3283_v34 = vmul.f32 -1.442695, %v1249_v19 }
 0x365   :  { %v3285_v38 = vmul.f32 -1.442695, %v1263_v18 }
 0x366   :  { %3749 = vpow2.f32 %v3283_v34 }
 0x367   :  { %3751 = vpow2.f32 %v3284_v45 }
 0x36e   :  { %v3748_v4 = vpop.eup %3747 }
 0x36f   :  { %v1256_v35 = vadd.f32 1.0, %v3748_v4 }
 0x370   :  { %v3750_v54 = vpop.eup %3749 }
 0x371   :  { %3753 = vrcp.f32 %v1256_v35  ;;  %v1257_v44 = vadd.f32 1.0, %v3750_v54  ;;  %v3752_v47 = vpop.eup %3751  ;;  %v4593_v35 = vld [vmem:[%s5071_s3 + $0x18] ss:$12 sps:$4 sm:$0xff]   ;;  %v1384_v54 = vunpack.c.l.bf16 %v4497_v48 }
 0x372   :  { %3755 = vpow2.f32 %v3285_v38  ;;  %v1270_v1 = vadd.f32 1.0, %v3752_v47 }
 0x373   :  { %3757 = vrcp.f32 %v1257_v44 }
 0x37b   :  { %v3754_v28 = vpop.eup %3753 }
 0x37c   :  { %v3756_v22 = vpop.eup %3755  ;;  %v1278_v23 = vmul.f32 %v3754_v28, %v1276_v50  ;;  %v1385_v50 = vunpack.c.l.bf16 %v4503_v14 }
 0x37d   :  { %v3758_v39 = vpop.eup %3757  ;;  %v1271_v16 = vadd.f32 1.0, %v3756_v22 }
 0x37e   :  { %v1280_v43 = vadd.f32 %v1278_v23, %v1244_v2  ;;  %v1279_v10 = vmul.f32 %v3758_v39, %v1277_v27 }
 0x380   :  { %3759 = vtanh.f32 %v1280_v43  ;;  %v1281_v36 = vadd.f32 %v1279_v10, %v1247_v13 }
 0x381   :  { %3761 = vrcp.f32 %v1270_v1  ;;  %v1388_v1 = vunpack.c.h.bf16 %v4503_v14 }
 0x382   :  { %3763 = vtanh.f32 %v1281_v36 }
 0x383   :  { %3765 = vrcp.f32 %v1271_v16 }
 0x38a   :  { %v3760_v29 = vpop.eup %3759 }
 0x38b   :  { %v3762_v19 = vpop.eup %3761  ;;  %v1284_v33 = vsub.f32 %v4536_v9, %v3760_v29  ;;  %v4576_v9 = vld [vmem:[%s5071_s3] ss:$12 sps:$4 sm:$0xff]  }
 0x38c   :  { %v3764_v3 = vpop.eup %3763 }
 0x38d   :  { %v1286_v18 = vmul.f32 %v3762_v19, %v1284_v33  ;;  %v1285_v24 = vsub.f32 %v4538_v62, %v3764_v3  ;;  %v3766_v34 = vpop.eup %3765  ;;  %v4583_v62 = vld [vmem:[%s5071_s3 + $0x1c] ss:$12 sps:$4 sm:$0xff]  }
 0x38f   :  { %v1287_v45 = vmul.f32 %v3766_v34, %v1285_v24  ;;  %v4565_v4 = vadd.f32 %v3760_v29, %v1286_v18 }
 0x391   :  { %v4567_v61 = vadd.f32 %v3764_v3, %v1287_v45 }
 0x393   :  { %v1296_v38 = vpack.c.bf16 %v4567_v61, %v4565_v4 }
 0x395   :  { %3286 = vmatmul.mubr.msk.bf16.vlgmr.msra.gmra.mrb[52].mxu0 %vm189_vm0, %v1296_v38  ;;  %3528 = vmatmul.mubr.msk.bf16.vlgmr.msra.gmra.mrb[76].mxu1 %vm189_vm0, %v1296_v38 }
 0x396   :  { %1443 = vmatpush1.bf16.msra.mxu0 %v4576_v9  ;;  %3532 = vmatpush3.bf16.msra.mxu1 %v4248_v31  ;;  %v4600_v31 = vld [vmem:[%s5071_s3 + $0x4] ss:$12 sps:$4 sm:$0xff]  }
 0x397   :  { %1444 = vmatprep.subr.bf16.mxu0 %v4583_v62  ;;  %3533 = vmatprep.subr.bf16.mxu1 %v5098_v8 }
 0x398   :  { %1474 = vmatprep.mubr.bf16.mxu0 %v5099_v26  ;;  %3535 = vmatprep.mubr.msk.bf16.mxu1 %vm4016_vm1, %v5098_v8 }
 0x39a   :  { %1445 = vmatpush1.bf16.msra.mxu0 %v4593_v35  ;;  %3534 = vmatpush3.bf16.msra.mxu1 %v4255_v32  ;;  %v1387_v32 = vunpack.c.h.bf16 %v4497_v48 }
 0x39b   :  { %1584 = vmatprep.subr.bf16.mxu0 %v4600_v31  ;;  %3539 = vmatprep.subr.bf16.mxu1 %v5098_v8 }
 0x468   :  { %v1334_v44 = vpop.f32.mrb[52].mxu0  ;;  %v1377_v47 = vpop.f32.mrb[76].mxu1 }
 0x469   :  { %v1390_v28 = vadd.f32 %v1384_v54, %v1334_v44  ;;  %v1336_v22 = vpop.f32.mrb[53].mxu0  ;;  %v3529_v2 = vpop.f32.mrb[77].mxu1  ;;  %v1418_v14 = vadd.f32 %v4459_v59, %v1377_v47  ;;  %v1386_v54 = vunpack.c.l.bf16 %v4322_v60 }
 0x46a   :  { %v1404_v23 = vadd.f32 %v1385_v50, %v1336_v22  ;;  %v1338_v27 = vpop.f32.mrb[54].mxu0  ;;  %v1380_v39 = vpop.f32.mrb[78].mxu1  ;;  %v1389_v2 = vunpack.c.h.bf16 %v4322_v60 }
 0x46b   :  { %v3288_v13 = vmul.f32 -1.442695, %v1390_v28  ;;  %v1391_v43 = vadd.f32 %v1387_v32, %v1338_v27  ;;  %v1340_v10 = vpop.f32.mrb[55].mxu0  ;;  %v3530_v36 = vpop.f32.mrb[79].mxu1  ;;  %v1419_v50 = vadd.f32 %v4459_v59, %v1380_v39 }
 0x46c   :  { %v1405_v16 = vadd.f32 %v1388_v1, %v1340_v10  ;;  %v3290_v19 = vmul.f32 -1.442695, %v1404_v23 }
 0x46d   :  { %3767 = vpow2.f32 %v3288_v13  ;;  %v3289_v29 = vmul.f32 -1.442695, %v1391_v43 }
 0x46e   :  { %v3291_v3 = vmul.f32 -1.442695, %v1405_v16 }
 0x46f   :  { %3769 = vpow2.f32 %v3289_v29 }
 0x470   :  { %3771 = vpow2.f32 %v3290_v19 }
 0x477   :  { %v3768_v33 = vpop.eup %3767 }
 0x478   :  { %v1398_v18 = vadd.f32 1.0, %v3768_v33 }
 0x479   :  { %v3770_v24 = vpop.eup %3769 }
 0x47a   :  { %3773 = vrcp.f32 %v1398_v18  ;;  %v1399_v48 = vadd.f32 1.0, %v3770_v24  ;;  %v3772_v34 = vpop.eup %3771 }
 0x47b   :  { %3775 = vpow2.f32 %v3291_v3  ;;  %v1412_v22 = vadd.f32 1.0, %v3772_v34  ;;  %v1526_v3 = vunpack.c.l.bf16 %v4508_v25 }
 0x47c   :  { %3777 = vrcp.f32 %v1399_v48  ;;  %v1527_v48 = vunpack.c.l.bf16 %v4510_v30 }
 0x484   :  { %v3774_v45 = vpop.eup %3773 }
 0x485   :  { %v3776_v38 = vpop.eup %3775  ;;  %v1420_v44 = vmul.f32 %v3774_v45, %v1418_v14 }
 0x486   :  { %v3778_v28 = vpop.eup %3777  ;;  %v1413_v1 = vadd.f32 1.0, %v3776_v38  ;;  %v1529_v38 = vunpack.c.h.bf16 %v4508_v25 }
 0x487   :  { %v1422_v32 = vadd.f32 %v1420_v44, %v1386_v54  ;;  %v1421_v23 = vmul.f32 %v3778_v28, %v1419_v50  ;;  %v1530_v28 = vunpack.c.h.bf16 %v4510_v30 }
 0x489   :  { %3779 = vtanh.f32 %v1422_v32  ;;  %v1423_v27 = vadd.f32 %v1421_v23, %v1389_v2 }
 0x48a   :  { %3781 = vrcp.f32 %v1412_v22 }
 0x48b   :  { %3783 = vtanh.f32 %v1423_v27 }
 0x48c   :  { %3785 = vrcp.f32 %v1413_v1 }
 0x493   :  { %v3780_v47 = vpop.eup %3779 }
 0x494   :  { %v3782_v13 = vpop.eup %3781  ;;  %v1426_v43 = vsub.f32 %v4565_v4, %v3780_v47  ;;  %v4626_v4 = vld [vmem:[%s5071_s3 + $0x8] ss:$12 sps:$4 sm:$0xff]  }
 0x495   :  { %v3784_v10 = vpop.eup %3783 }
 0x496   :  { %v1428_v36 = vmul.f32 %v3782_v13, %v1426_v43  ;;  %v1427_v39 = vsub.f32 %v4567_v61, %v3784_v10  ;;  %v3786_v16 = vpop.eup %3785  ;;  %v4638_v61 = vld [vmem:[%s5071_s3 + $0x20] ss:$12 sps:$4 sm:$0xff]  }
 0x498   :  { %v1429_v29 = vmul.f32 %v3786_v16, %v1427_v39  ;;  %v4614_v19 = vadd.f32 %v3780_v47, %v1428_v36 }
 0x49a   :  { %v4616_v60 = vadd.f32 %v3784_v10, %v1429_v29 }
 0x49c   :  { %v1438_v33 = vpack.c.bf16 %v4616_v60, %v4614_v19 }
 0x49e   :  { %3292 = vmatmul.mubr.msk.bf16.vlgmr.msra.gmra.mrb[56].mxu0 %vm189_vm0, %v1438_v33  ;;  %3536 = vmatmul.mubr.msk.bf16.vlgmr.msra.gmra.mrb[80].mxu1 %vm189_vm0, %v1438_v33  ;;  %v1528_v33 = vunpack.c.l.bf16 %v4328_v12 }
 0x49f   :  { %1585 = vmatpush1.bf16.msra.mxu0 %v4576_v9  ;;  %3540 = vmatpush3.bf16.msra.mxu1 %v4626_v4 }
 0x4a0   :  { %1586 = vmatprep.subr.bf16.mxu0 %v4583_v62  ;;  %3541 = vmatprep.subr.bf16.mxu1 %v5098_v8 }
 0x4a1   :  { %1616 = vmatprep.mubr.bf16.mxu0 %v5099_v26  ;;  %3543 = vmatprep.mubr.msk.bf16.mxu1 %vm4016_vm1, %v5098_v8 }
 0x4a3   :  { %1587 = vmatpush1.bf16.msra.mxu0 %v4593_v35  ;;  %3542 = vmatpush3.bf16.msra.mxu1 %v4638_v61 }
 0x4a4   :  { %1726 = vmatprep.subr.bf16.mxu0 %v4600_v31  ;;  %3547 = vmatprep.subr.bf16.mxu1 %v5098_v8 }
 0x571   :  { %v1476_v18 = vpop.f32.mrb[56].mxu0  ;;  %v1519_v24 = vpop.f32.mrb[80].mxu1 }
 0x572   :  { %v1532_v34 = vadd.f32 %v1526_v3, %v1476_v18  ;;  %v1478_v14 = vpop.f32.mrb[57].mxu0  ;;  %v3537_v45 = vpop.f32.mrb[81].mxu1  ;;  %v1560_v30 = vadd.f32 %v4459_v59, %v1519_v24 }
 0x573   :  { %v1546_v54 = vadd.f32 %v1527_v48, %v1478_v14  ;;  %v1480_v44 = vpop.f32.mrb[58].mxu0  ;;  %v1522_v50 = vpop.f32.mrb[82].mxu1  ;;  %v1531_v14 = vunpack.c.h.bf16 %v4328_v12 }
 0x574   :  { %v3294_v22 = vmul.f32 -1.442695, %v1532_v34  ;;  %v1533_v2 = vadd.f32 %v1529_v38, %v1480_v44  ;;  %v1482_v32 = vpop.f32.mrb[59].mxu0  ;;  %v3538_v23 = vpop.f32.mrb[83].mxu1  ;;  %v1561_v18 = vadd.f32 %v4459_v59, %v1522_v50 }
 0x575   :  { %v1547_v27 = vadd.f32 %v1530_v28, %v1482_v32  ;;  %v3296_v47 = vmul.f32 -1.442695, %v1546_v54 }
 0x576   :  { %3787 = vpow2.f32 %v3294_v22  ;;  %v3295_v1 = vmul.f32 -1.442695, %v1533_v2 }
 0x577   :  { %v3297_v43 = vmul.f32 -1.442695, %v1547_v27 }
 0x578   :  { %3789 = vpow2.f32 %v3295_v1 }
 0x579   :  { %3791 = vpow2.f32 %v3296_v47 }
 0x580   :  { %v3788_v13 = vpop.eup %3787 }
 0x581   :  { %v1540_v10 = vadd.f32 1.0, %v3788_v13 }
 0x582   :  { %v3790_v36 = vpop.eup %3789 }
 0x583   :  { %3793 = vrcp.f32 %v1540_v10  ;;  %v1541_v25 = vadd.f32 1.0, %v3790_v36  ;;  %v3792_v39 = vpop.eup %3791 }
 0x584   :  { %3795 = vpow2.f32 %v3297_v43  ;;  %v1554_v34 = vadd.f32 1.0, %v3792_v39  ;;  %v1669_v43 = vunpack.c.l.bf16 %v4295_v58  ;;  %v1671_v39 = vunpack.c.h.bf16 %v4291_v56 }
 0x585   :  { %3797 = vrcp.f32 %v1541_v25 }
 0x58d   :  { %v3794_v16 = vpop.eup %3793 }
 0x58e   :  { %v3796_v29 = vpop.eup %3795  ;;  %v1562_v3 = vmul.f32 %v3794_v16, %v1560_v30 }
 0x58f   :  { %v3798_v48 = vpop.eup %3797  ;;  %v1555_v44 = vadd.f32 1.0, %v3796_v29 }
 0x590   :  { %v1564_v45 = vadd.f32 %v1562_v3, %v1528_v33  ;;  %v1563_v38 = vmul.f32 %v3798_v48, %v1561_v18  ;;  %v1672_v33 = vunpack.c.h.bf16 %v4295_v58 }
 0x592   :  { %3799 = vtanh.f32 %v1564_v45  ;;  %v1565_v54 = vadd.f32 %v1563_v38, %v1531_v14 }
 0x593   :  { %3801 = vrcp.f32 %v1554_v34 }
 0x594   :  { %3803 = vtanh.f32 %v1565_v54 }
 0x595   :  { %3805 = vrcp.f32 %v1555_v44 }
 0x59c   :  { %v3800_v24 = vpop.eup %3799 }
 0x59d   :  { %v3802_v28 = vpop.eup %3801  ;;  %v1568_v22 = vsub.f32 %v4614_v19, %v3800_v24  ;;  %v1668_v19 = vunpack.c.l.bf16 %v4291_v56 }
 0x59e   :  { %v3804_v2 = vpop.eup %3803 }
 0x59f   :  { %v1570_v32 = vmul.f32 %v3802_v28, %v1568_v22  ;;  %v1569_v50 = vsub.f32 %v4616_v60, %v3804_v2  ;;  %v3806_v23 = vpop.eup %3805 }
 0x5a1   :  { %v1571_v27 = vmul.f32 %v3806_v23, %v1569_v50  ;;  %v4653_v1 = vadd.f32 %v3800_v24, %v1570_v32  ;;  %v1670_v32 = vunpack.c.l.bf16 %v4326_v11 }
 0x5a3   :  { %v4655_v12 = vadd.f32 %v3804_v2, %v1571_v27 }
 0x5a5   :  { %v1580_v47 = vpack.c.bf16 %v4655_v12, %v4653_v1 }
 0x5a7   :  { %3298 = vmatmul.mubr.msk.bf16.vlgmr.msra.gmra.mrb[60].mxu0 %vm189_vm0, %v1580_v47  ;;  %3544 = vmatmul.mubr.msk.bf16.vlgmr.msra.gmra.mrb[84].mxu1 %vm189_vm0, %v1580_v47 }
 0x5a8   :  { %1727 = vmatpush1.bf16.msra.mxu0 %v4576_v9  ;;  %3548 = vmatpush3.bf16.msra.mxu1 %v4626_v4 }
 0x5a9   :  { %1728 = vmatprep.subr.bf16.mxu0 %v4583_v62  ;;  %3549 = vmatprep.subr.bf16.mxu1 %v5098_v8 }
 0x5aa   :  { %1758 = vmatprep.mubr.bf16.mxu0 %v5099_v26  ;;  %3551 = vmatprep.mubr.msk.bf16.mxu1 %vm4016_vm1, %v5098_v8 }
 0x5ac   :  { %1729 = vmatpush1.bf16.msra.mxu0 %v4593_v35  ;;  %3550 = vmatpush3.bf16.msra.mxu1 %v4638_v61 }
 0x5ad   :  { %1868 = vmatprep.subr.bf16.mxu0 %v4600_v31  ;;  %3555 = vmatprep.subr.bf16.mxu1 %v5098_v8 }
 0x67a   :  { %v1618_v60 = vpop.f32.mrb[60].mxu0  ;;  %v1661_v13 = vpop.f32.mrb[84].mxu1 }
 0x67b   :  { %v1674_v10 = vadd.f32 %v1668_v19, %v1618_v60  ;;  %v1620_v36 = vpop.f32.mrb[61].mxu0  ;;  %v3545_v25 = vpop.f32.mrb[85].mxu1  ;;  %v1702_v58 = vadd.f32 %v4459_v59, %v1661_v13  ;;  %v1673_v19 = vunpack.c.h.bf16 %v4326_v11 }
 0x67c   :  { %v1688_v30 = vadd.f32 %v1669_v43, %v1620_v36  ;;  %v1622_v16 = vpop.f32.mrb[62].mxu0  ;;  %v1664_v29 = vpop.f32.mrb[86].mxu1 }
 0x67d   :  { %v3300_v3 = vmul.f32 -1.442695, %v1674_v10  ;;  %v1675_v31 = vadd.f32 %v1671_v39, %v1622_v16  ;;  %v1624_v18 = vpop.f32.mrb[63].mxu0  ;;  %v3546_v48 = vpop.f32.mrb[87].mxu1  ;;  %v1703_v23 = vadd.f32 %v4459_v59, %v1664_v29 }
 0x67e   :  { %v1689_v34 = vadd.f32 %v1672_v33, %v1624_v18  ;;  %v3302_v45 = vmul.f32 -1.442695, %v1688_v30 }
 0x67f   :  { %3807 = vpow2.f32 %v3300_v3  ;;  %v3301_v14 = vmul.f32 -1.442695, %v1675_v31 }
 0x680   :  { %v3303_v54 = vmul.f32 -1.442695, %v1689_v34 }
 0x681   :  { %3809 = vpow2.f32 %v3301_v14  ;;  %v1813_v14 = vunpack.c.h.bf16 %v4303_v5 }
 0x682   :  { %3811 = vpow2.f32 %v3302_v45 }
 0x689   :  { %v3808_v38 = vpop.eup %3807 }
 0x68a   :  { %v1682_v44 = vadd.f32 1.0, %v3808_v38 }
 0x68b   :  { %v3810_v24 = vpop.eup %3809 }
 0x68c   :  { %3813 = vrcp.f32 %v1682_v44  ;;  %v1683_v56 = vadd.f32 1.0, %v3810_v24  ;;  %v3812_v28 = vpop.eup %3811 }
 0x68d   :  { %3815 = vpow2.f32 %v3303_v54  ;;  %v1696_v47 = vadd.f32 1.0, %v3812_v28 }
 0x68e   :  { %3817 = vrcp.f32 %v1683_v56 }
 0x696   :  { %v3814_v22 = vpop.eup %3813 }
 0x697   :  { %v3816_v2 = vpop.eup %3815  ;;  %v1704_v50 = vmul.f32 %v3814_v22, %v1702_v58 }
 0x698   :  { %v3818_v27 = vpop.eup %3817  ;;  %v1697_v36 = vadd.f32 1.0, %v3816_v2 }
 0x699   :  { %v1706_v60 = vadd.f32 %v1704_v50, %v1670_v32  ;;  %v1705_v43 = vmul.f32 %v3818_v27, %v1703_v23 }
 0x69b   :  { %3819 = vtanh.f32 %v1706_v60  ;;  %v1707_v10 = vadd.f32 %v1705_v43, %v1673_v19  ;;  %v1812_v60 = vunpack.c.l.bf16 %v4353_v0 }
 0x69c   :  { %3821 = vrcp.f32 %v1696_v47 }
 0x69d   :  { %3823 = vtanh.f32 %v1707_v10  ;;  %v4709_v10 = vld [vmem:[%s5074_s5] ss:$0 sm:$0xff] }
 0x69e   :  { %3825 = vrcp.f32 %v1697_v36 }
 0x6a5   :  { %v3820_v13 = vpop.eup %3819 }
 0x6a6   :  { %v3822_v25 = vpop.eup %3821  ;;  %v1710_v39 = vsub.f32 %v4653_v1, %v3820_v13  ;;  %v1810_v1 = vunpack.c.l.bf16 %v4303_v5 }
 0x6a7   :  { %v3824_v30 = vpop.eup %3823 }
 0x6a8   :  { %v1712_v16 = vmul.f32 %v3822_v25, %v1710_v39  ;;  %v1711_v29 = vsub.f32 %v4655_v12, %v3824_v30  ;;  %v3826_v33 = vpop.eup %3825  ;;  %v1815_v39 = vunpack.c.h.bf16 %v4353_v0 }
 0x6aa   :  { %v1713_v3 = vmul.f32 %v3826_v33, %v1711_v29  ;;  %v4682_v31 = vadd.f32 %v3820_v13, %v1712_v16 }
 0x6ac   :  { %v4684_v11 = vadd.f32 %v3824_v30, %v1713_v3 }
 0x6ae   :  { %v1722_v18 = vpack.c.bf16 %v4684_v11, %v4682_v31 }
 0x6b0   :  { %3304 = vmatmul.mubr.msk.bf16.vlgmr.msra.gmra.mrb[64].mxu0 %vm189_vm0, %v1722_v18  ;;  %3552 = vmatmul.mubr.msk.bf16.vlgmr.msra.gmra.mrb[88].mxu1 %vm189_vm0, %v1722_v18 }
 0x6b1   :  { %1869 = vmatpush1.bf16.msra.mxu0 %v4576_v9  ;;  %3556 = vmatpush3.bf16.msra.mxu1 %v4626_v4  ;;  %v1811_v4 = vunpack.c.l.bf16 %v4305_v6 }
 0x6b2   :  { %1870 = vmatprep.subr.bf16.mxu0 %v4583_v62  ;;  %3557 = vmatprep.subr.bf16.mxu1 %v5098_v8 }
 0x6b3   :  { %1900 = vmatprep.mubr.bf16.mxu0 %v5099_v26  ;;  %3559 = vmatprep.mubr.msk.bf16.mxu1 %vm4016_vm1, %v5098_v8 }
 0x6b5   :  { %1871 = vmatpush1.bf16.msra.mxu0 %v4593_v35  ;;  %3558 = vmatpush3.bf16.msra.mxu1 %v4638_v61  ;;  %v1814_v35 = vunpack.c.h.bf16 %v4305_v6 }
 0x6b6   :  { %3563 = vmatprep.subr.bf16.mxu1 %v5098_v8 }
 0x783   :  { %v1760_v9 = vpop.f32.mrb[64].mxu0  ;;  %v1803_v12 = vpop.f32.mrb[88].mxu1 }
 0x784   :  { %v1816_v62 = vadd.f32 %v1810_v1, %v1760_v9  ;;  %v1762_v48 = vpop.f32.mrb[65].mxu0  ;;  %v3553_v34 = vpop.f32.mrb[89].mxu1  ;;  %v1844_v6 = vadd.f32 %v4459_v59, %v1803_v12 }
 0x785   :  { %v1830_v45 = vadd.f32 %v1811_v4, %v1762_v48  ;;  %v1764_v38 = vpop.f32.mrb[66].mxu0  ;;  %v1806_v54 = vpop.f32.mrb[90].mxu1 }
 0x786   :  { %v3306_v44 = vmul.f32 -1.442695, %v1816_v62  ;;  %v1817_v61 = vadd.f32 %v1813_v14, %v1764_v38  ;;  %v1766_v24 = vpop.f32.mrb[67].mxu0  ;;  %v3554_v56 = vpop.f32.mrb[91].mxu1  ;;  %v1845_v36 = vadd.f32 %v4709_v10, %v1806_v54  ;;  %v4740_v14 = vld [vmem:[%s5075_s7 + $0x8] ss:$12 sps:$4 sm:$0xff]  }
 0x787   :  { %v1831_v28 = vadd.f32 %v1814_v35, %v1766_v24  ;;  %v3308_v22 = vmul.f32 -1.442695, %v1830_v45  ;;  %v4747_v45 = vld [vmem:[%s5075_s7 + $0x1c] ss:$12 sps:$4 sm:$0xff]   ;;  %v4752_v38 = vld [vmem:[%s5075_s7 + $0x18] ss:$12 sps:$4 sm:$0xff]   ;;  %v1952_v35 = vunpack.c.l.bf16 %v4312_v17  ;;  %v1953_v24 = vunpack.c.l.bf16 %v4316_v20 }
 0x788   :  { %3827 = vpow2.f32 %v3306_v44  ;;  %v3307_v58 = vmul.f32 -1.442695, %v1817_v61  ;;  %v4757_v54 = vld [vmem:[%s5075_s7 + $0x20] ss:$12 sps:$4 sm:$0xff]  }
 0x789   :  { %v3309_v32 = vmul.f32 -1.442695, %v1831_v28 }
 0x78a   :  { %3829 = vpow2.f32 %v3307_v58 }
 0x78b   :  { %3831 = vpow2.f32 %v3308_v22  ;;  %v1955_v22 = vunpack.c.h.bf16 %v4312_v17 }
 0x792   :  { %v3828_v2 = vpop.eup %3827 }
 0x793   :  { %v1824_v50 = vadd.f32 1.0, %v3828_v2 }
 0x794   :  { %v3830_v23 = vpop.eup %3829 }
 0x795   :  { %3833 = vrcp.f32 %v1824_v50  ;;  %v1825_v5 = vadd.f32 1.0, %v3830_v23  ;;  %v3832_v27 = vpop.eup %3831  ;;  %v1956_v23 = vunpack.c.h.bf16 %v4316_v20 }
 0x796   :  { %3835 = vpow2.f32 %v3309_v32  ;;  %v1838_v25 = vadd.f32 1.0, %v3832_v27 }
 0x797   :  { %3837 = vrcp.f32 %v1825_v5 }
 0x79f   :  { %v3834_v47 = vpop.eup %3833 }
 0x7a0   :  { %v3836_v19 = vpop.eup %3835  ;;  %v1846_v43 = vmul.f32 %v3834_v47, %v1844_v6 }
 0x7a1   :  { %v3838_v13 = vpop.eup %3837  ;;  %v1839_v29 = vadd.f32 1.0, %v3836_v19 }
 0x7a2   :  { %v1848_v30 = vadd.f32 %v1846_v43, %v1812_v60  ;;  %v1847_v16 = vmul.f32 %v3838_v13, %v1845_v36 }
 0x7a4   :  { %3839 = vtanh.f32 %v1848_v30  ;;  %v1849_v59 = vadd.f32 %v1847_v16, %v1815_v39 }
 0x7a5   :  { %3841 = vrcp.f32 %v1838_v25 }
 0x7a6   :  { %3843 = vtanh.f32 %v1849_v59 }
 0x7a7   :  { %3845 = vrcp.f32 %v1839_v29  ;;  %v1954_v29 = vunpack.c.l.bf16 %v4350_v63 }
 0x7ae   :  { %v3840_v33 = vpop.eup %3839 }
 0x7af   :  { %v3842_v3 = vpop.eup %3841  ;;  %v1852_v18 = vsub.f32 %v4682_v31, %v3840_v33  ;;  %v4729_v31 = vld [vmem:[%s5075_s7 + $0x4] ss:$12 sps:$4 sm:$0xff]  }
 0x7b0   :  { %v3844_v1 = vpop.eup %3843  ;;  %2041 = vmatprep.subr.bf16.mxu0 %v4729_v31 }
 0x7b1   :  { %v1854_v9 = vmul.f32 %v3842_v3, %v1852_v18  ;;  %v1853_v12 = vsub.f32 %v4684_v11, %v3844_v1  ;;  %v3846_v4 = vpop.eup %3845  ;;  %v4734_v11 = vld [vmem:[%s5075_s7] ss:$12 sps:$4 sm:$0xff]  }
 0x7b3   :  { %v1855_v62 = vmul.f32 %v3846_v4, %v1853_v12  ;;  %v4715_v48 = vadd.f32 %v3840_v33, %v1854_v9  ;;  %v1957_v9 = vunpack.c.h.bf16 %v4350_v63 }
 0x7b5   :  { %v4717_v0 = vadd.f32 %v3844_v1, %v1855_v62 }
 0x7b7   :  { %v1864_v34 = vpack.c.bf16 %v4717_v0, %v4715_v48 }
 0x7b9   :  { %3310 = vmatmul.mubr.msk.bf16.vlgmr.msra.gmra.mrb[68].mxu0 %vm189_vm0, %v1864_v34  ;;  %3560 = vmatmul.mubr.msk.bf16.vlgmr.msra.gmra.mrb[92].mxu1 %vm189_vm0, %v1864_v34 }
 0x7ba   :  { %2073 = vmatprep.mubr.bf16.mxu0 %v5099_v26  ;;  %3567 = vmatprep.mubr.msk.bf16.mxu1 %vm4016_vm1, %v5098_v8 }
 0x7bb   :  { %2042 = vmatpush1.bf16.msra.mxu0 %v4734_v11  ;;  %3564 = vmatpush3.bf16.msra.mxu1 %v4740_v14 }
 0x7bc   :  { %3565 = vmatprep.subr.bf16.mxu1 %v5098_v8  ;;  %2043 = vmatprep.subr.bf16.mxu0 %v4747_v45 }
 0x7bf   :  { %2044 = vmatpush1.bf16.msra.mxu0 %v4752_v38  ;;  %3566 = vmatpush3.bf16.msra.mxu1 %v4757_v54 }
 0x7c0   :  { %2183 = vmatprep.subr.bf16.mxu0 %v4729_v31  ;;  %3571 = vmatprep.subr.bf16.mxu1 %v5098_v8 }
 0x88c   :  { %v1902_v44 = vpop.f32.mrb[68].mxu0  ;;  %v1945_v61 = vpop.f32.mrb[92].mxu1 }
 0x88d   :  { %v1958_v56 = vadd.f32 %v1952_v35, %v1902_v44  ;;  %v1904_v28 = vpop.f32.mrb[69].mxu0  ;;  %v3561_v58 = vpop.f32.mrb[93].mxu1  ;;  %v1986_v20 = vadd.f32 %v4709_v10, %v1945_v61 }
 0x88e   :  { %v1972_v2 = vadd.f32 %v1953_v24, %v1904_v28  ;;  %v1906_v32 = vpop.f32.mrb[70].mxu0  ;;  %v1948_v50 = vpop.f32.mrb[94].mxu1 }
 0x88f   :  { %v3312_v5 = vmul.f32 -1.442695, %v1958_v56  ;;  %v1959_v27 = vadd.f32 %v1955_v22, %v1906_v32  ;;  %v1908_v6 = vpop.f32.mrb[71].mxu0  ;;  %v3562_v47 = vpop.f32.mrb[95].mxu1  ;;  %v1987_v3 = vadd.f32 %v4709_v10, %v1948_v50  ;;  %v2126_v50 = vunpack.c.l.bf16 %v4379_v15 }
 0x890   :  { %v1973_v19 = vadd.f32 %v1956_v23, %v1908_v6  ;;  %v3314_v43 = vmul.f32 -1.442695, %v1972_v2  ;;  %v2128_v6 = vunpack.c.h.bf16 %v4376_v21 }
 0x891   :  { %3847 = vpow2.f32 %v3312_v5  ;;  %v3313_v60 = vmul.f32 -1.442695, %v1959_v27 }
 0x892   :  { %v3315_v13 = vmul.f32 -1.442695, %v1973_v19 }
 0x893   :  { %3849 = vpow2.f32 %v3313_v60 }
 0x894   :  { %3851 = vpow2.f32 %v3314_v43  ;;  %v2129_v43 = vunpack.c.h.bf16 %v4379_v15  ;;  %v4801_v15 = vld [vmem:[%s5076_s9] ss:$0 sm:$0xff] }
 0x89b   :  { %v3848_v36 = vpop.eup %3847 }
 0x89c   :  { %v1966_v25 = vadd.f32 1.0, %v3848_v36 }
 0x89d   :  { %v3850_v39 = vpop.eup %3849 }
 0x89e   :  { %3853 = vrcp.f32 %v1966_v25  ;;  %v1967_v17 = vadd.f32 1.0, %v3850_v39  ;;  %v3852_v30 = vpop.eup %3851 }
 0x89f   :  { %3855 = vpow2.f32 %v3315_v13  ;;  %v1980_v1 = vadd.f32 1.0, %v3852_v30 }
 0x8a0   :  { %3857 = vrcp.f32 %v1967_v17 }
 0x8a8   :  { %v3854_v16 = vpop.eup %3853 }
 0x8a9   :  { %v3856_v59 = vpop.eup %3855  ;;  %v1988_v33 = vmul.f32 %v3854_v16, %v1986_v20 }
 0x8aa   :  { %v3858_v18 = vpop.eup %3857  ;;  %v1981_v34 = vadd.f32 1.0, %v3856_v59 }
 0x8ab   :  { %v1990_v12 = vadd.f32 %v1988_v33, %v1954_v29  ;;  %v1989_v4 = vmul.f32 %v3858_v18, %v1987_v3 }
 0x8ad   :  { %3859 = vtanh.f32 %v1990_v12  ;;  %v1991_v62 = vadd.f32 %v1989_v4, %v1957_v9  ;;  %v2127_v12 = vunpack.c.l.bf16 %v4512_v52 }
 0x8ae   :  { %3861 = vrcp.f32 %v1980_v1 }
 0x8af   :  { %3863 = vtanh.f32 %v1991_v62 }
 0x8b0   :  { %3865 = vrcp.f32 %v1981_v34 }
 0x8b7   :  { %v3860_v35 = vpop.eup %3859 }
 0x8b8   :  { %v3862_v44 = vpop.eup %3861  ;;  %v1994_v61 = vsub.f32 %v4715_v48, %v3860_v35  ;;  %v2125_v48 = vunpack.c.l.bf16 %v4376_v21 }
 0x8b9   :  { %v3864_v24 = vpop.eup %3863 }
 0x8ba   :  { %v1996_v56 = vmul.f32 %v3862_v44, %v1994_v61  ;;  %v1995_v10 = vsub.f32 %v4717_v0, %v3864_v24  ;;  %v3866_v28 = vpop.eup %3865  ;;  %v2130_v44 = vunpack.c.h.bf16 %v4512_v52 }
 0x8bc   :  { %v1997_v58 = vmul.f32 %v3866_v28, %v1995_v10  ;;  %v4775_v22 = vadd.f32 %v3860_v35, %v1996_v56 }
 0x8be   :  { %v4777_v63 = vadd.f32 %v3864_v24, %v1997_v58 }
 0x8c0   :  { %v2005_v2 = vpack.c.bf16 %v4777_v63, %v4775_v22 }
 0x8c2   :  { %3322 = vmatmul.mubr.msk.bf16.vlgmr.msra.gmra.mrb[72].mxu0 %vm189_vm0, %v2005_v2  ;;  %3568 = vmatmul.mubr.msk.bf16.vlgmr.msra.gmra.mrb[96].mxu1 %vm189_vm0, %v2005_v2 }
 0x8c3   :  { %2184 = vmatpush1.bf16.msra.mxu0 %v4734_v11  ;;  %3572 = vmatpush3.bf16.msra.mxu1 %v4740_v14 }
 0x8c4   :  { %2185 = vmatprep.subr.bf16.mxu0 %v4747_v45  ;;  %3573 = vmatprep.subr.bf16.mxu1 %v5098_v8 }
 0x8c5   :  { %2215 = vmatprep.mubr.bf16.mxu0 %v5099_v26  ;;  %3575 = vmatprep.mubr.msk.bf16.mxu1 %vm4016_vm1, %v5098_v8 }
 0x8c7   :  { %2186 = vmatpush1.bf16.msra.mxu0 %v4752_v38  ;;  %3574 = vmatpush3.bf16.msra.mxu1 %v4757_v54 }
 0x8c8   :  { %2326 = vmatprep.subr.bf16.mxu0 %v4729_v31  ;;  %3579 = vmatprep.subr.bf16.mxu1 %v5098_v8 }
 0x995   :  { %v2075_v0 = vpop.f32.mrb[72].mxu0  ;;  %v2118_v32 = vpop.f32.mrb[96].mxu1 }
 0x996   :  { %v2131_v23 = vadd.f32 %v2125_v48, %v2075_v0  ;;  %v2077_v5 = vpop.f32.mrb[73].mxu0  ;;  %v3569_v27 = vpop.f32.mrb[97].mxu1  ;;  %v2159_v18 = vadd.f32 %v4801_v15, %v2118_v32 }
 0x997   :  { %v2145_v47 = vadd.f32 %v2126_v50, %v2077_v5  ;;  %v2079_v19 = vpop.f32.mrb[74].mxu0  ;;  %v2121_v60 = vpop.f32.mrb[98].mxu1 }
 0x998   :  { %v3324_v36 = vmul.f32 -1.442695, %v2131_v23  ;;  %v2132_v13 = vadd.f32 %v2128_v6, %v2079_v19  ;;  %v2081_v25 = vpop.f32.mrb[75].mxu0  ;;  %v3570_v39 = vpop.f32.mrb[99].mxu1  ;;  %v2160_v62 = vadd.f32 %v4801_v15, %v2121_v60 }
 0x999   :  { %v2146_v17 = vadd.f32 %v2129_v43, %v2081_v25  ;;  %v3326_v20 = vmul.f32 -1.442695, %v2145_v47  ;;  %v2268_v47 = vunpack.c.l.bf16 %v4391_v49 }
 0x99a   :  { %3867 = vpow2.f32 %v3324_v36  ;;  %v3325_v30 = vmul.f32 -1.442695, %v2132_v13  ;;  %v2270_v36 = vunpack.c.h.bf16 %v4389_v46 }
 0x99b   :  { %v3327_v59 = vmul.f32 -1.442695, %v2146_v17  ;;  %v2271_v17 = vunpack.c.h.bf16 %v4391_v49 }
 0x99c   :  { %3869 = vpow2.f32 %v3325_v30 }
 0x99d   :  { %3871 = vpow2.f32 %v3326_v20 }
 0x9a4   :  { %v3868_v16 = vpop.eup %3867 }
 0x9a5   :  { %v2139_v29 = vadd.f32 1.0, %v3868_v16 }
 0x9a6   :  { %v3870_v33 = vpop.eup %3869 }
 0x9a7   :  { %3873 = vrcp.f32 %v2139_v29  ;;  %v2140_v21 = vadd.f32 1.0, %v3870_v33  ;;  %v3872_v3 = vpop.eup %3871 }
 0x9a8   :  { %3875 = vpow2.f32 %v3327_v59  ;;  %v2153_v35 = vadd.f32 1.0, %v3872_v3 }
 0x9a9   :  { %3877 = vrcp.f32 %v2140_v21 }
 0x9b1   :  { %v3874_v1 = vpop.eup %3873 }
 0x9b2   :  { %v3876_v9 = vpop.eup %3875  ;;  %v2161_v4 = vmul.f32 %v3874_v1, %v2159_v18 }
 0x9b3   :  { %v3878_v34 = vpop.eup %3877  ;;  %v2154_v10 = vadd.f32 1.0, %v3876_v9 }
 0x9b4   :  { %v2163_v61 = vadd.f32 %v2161_v4, %v2127_v12  ;;  %v2162_v24 = vmul.f32 %v3878_v34, %v2160_v62  ;;  %v2269_v34 = vunpack.c.l.bf16 %v4514_v40 }
 0x9b6   :  { %3879 = vtanh.f32 %v2163_v61  ;;  %v2164_v56 = vadd.f32 %v2162_v24, %v2130_v44 }
 0x9b7   :  { %3881 = vrcp.f32 %v2153_v35 }
 0x9b8   :  { %3883 = vtanh.f32 %v2164_v56  ;;  %v2272_v56 = vunpack.c.h.bf16 %v4514_v40 }
 0x9b9   :  { %3885 = vrcp.f32 %v2154_v10 }
 0x9c0   :  { %v3880_v28 = vpop.eup %3879 }
 0x9c1   :  { %v3882_v58 = vpop.eup %3881  ;;  %v2167_v2 = vsub.f32 %v4775_v22, %v3880_v28  ;;  %v2267_v22 = vunpack.c.l.bf16 %v4389_v46 }
 0x9c2   :  { %v3884_v48 = vpop.eup %3883 }
 0x9c3   :  { %v2169_v0 = vmul.f32 %v3882_v58, %v2167_v2  ;;  %v2168_v32 = vsub.f32 %v4777_v63, %v3884_v48  ;;  %v3886_v50 = vpop.eup %3885 }
 0x9c5   :  { %v2170_v23 = vmul.f32 %v3886_v50, %v2168_v32  ;;  %v4809_v5 = vadd.f32 %v3880_v28, %v2169_v0 }
 0x9c7   :  { %v4811_v52 = vadd.f32 %v3884_v48, %v2170_v23 }
 0x9c9   :  { %v2173_v27 = vpack.c.bf16 %v4811_v52, %v4809_v5 }
 0x9cb   :  { %2174 = vst.msk [vmem:[#allocation4] sm:$0xff] %vm189_vm0, %v2173_v27  ;;  %3328 = vmatmul.mubr.msk.bf16.vlgmr.msra.gmra.mrb[76].mxu0 %vm189_vm0, %v2173_v27  ;;  %3576 = vmatmul.mubr.msk.bf16.vlgmr.msra.gmra.mrb[100].mxu1 %vm189_vm0, %v2173_v27 }
 0x9cc   :  { %2327 = vmatpush1.bf16.msra.mxu0 %v4734_v11  ;;  %3580 = vmatpush3.bf16.msra.mxu1 %v4740_v14 }
 0x9cd   :  { %2328 = vmatprep.subr.bf16.mxu0 %v4747_v45  ;;  %3581 = vmatprep.subr.bf16.mxu1 %v5098_v8 }
 0x9ce   :  { %2358 = vmatprep.mubr.bf16.mxu0 %v5099_v26  ;;  %3583 = vmatprep.mubr.msk.bf16.mxu1 %vm4016_vm1, %v5098_v8 }
 0x9d0   :  { %2329 = vmatpush1.bf16.msra.mxu0 %v4752_v38  ;;  %3582 = vmatpush3.bf16.msra.mxu1 %v4757_v54 }
 0x9d1   :  { %2469 = vmatprep.subr.bf16.mxu0 %v4729_v31  ;;  %3587 = vmatprep.subr.bf16.mxu1 %v5098_v8 }
 0xa9e   :  { %v2217_v63 = vpop.f32.mrb[76].mxu0  ;;  %v2260_v6 = vpop.f32.mrb[100].mxu1 }
 0xa9f   :  { %v2273_v19 = vadd.f32 %v2267_v22, %v2217_v63  ;;  %v2219_v60 = vpop.f32.mrb[77].mxu0  ;;  %v3577_v43 = vpop.f32.mrb[101].mxu1  ;;  %v2301_v49 = vadd.f32 %v4801_v15, %v2260_v6 }
 0xaa0   :  { %v2287_v13 = vadd.f32 %v2268_v47, %v2219_v60  ;;  %v2221_v25 = vpop.f32.mrb[78].mxu0  ;;  %v2263_v39 = vpop.f32.mrb[102].mxu1  ;;  %v2411_v60 = vunpack.c.l.bf16 %v4403_v7 }
 0xaa1   :  { %v3330_v30 = vmul.f32 -1.442695, %v2273_v19  ;;  %v2274_v20 = vadd.f32 %v2270_v36, %v2221_v25  ;;  %v2223_v16 = vpop.f32.mrb[79].mxu0  ;;  %v3578_v59 = vpop.f32.mrb[103].mxu1  ;;  %v2302_v44 = vadd.f32 %v4801_v15, %v2263_v39  ;;  %v2413_v25 = vunpack.c.h.bf16 %v4401_v37 }
 0xaa2   :  { %v2288_v29 = vadd.f32 %v2271_v17, %v2223_v16  ;;  %v3332_v21 = vmul.f32 -1.442695, %v2287_v13 }
 0xaa3   :  { %3887 = vpow2.f32 %v3330_v30  ;;  %v3331_v33 = vmul.f32 -1.442695, %v2274_v20  ;;  %v2414_v20 = vunpack.c.h.bf16 %v4403_v7 }
 0xaa4   :  { %v3333_v18 = vmul.f32 -1.442695, %v2288_v29 }
 0xaa5   :  { %3889 = vpow2.f32 %v3331_v33 }
 0xaa6   :  { %3891 = vpow2.f32 %v3332_v21 }
 0xaad   :  { %v3888_v3 = vpop.eup %3887 }
 0xaae   :  { %v2281_v1 = vadd.f32 1.0, %v3888_v3 }
 0xaaf   :  { %v3890_v9 = vpop.eup %3889 }
 0xab0   :  { %3893 = vrcp.f32 %v2281_v1  ;;  %v2282_v46 = vadd.f32 1.0, %v3890_v9  ;;  %v3892_v12 = vpop.eup %3891 }
 0xab1   :  { %3895 = vpow2.f32 %v3333_v18  ;;  %v2295_v24 = vadd.f32 1.0, %v3892_v12 }
 0xab2   :  { %3897 = vrcp.f32 %v2282_v46 }
 0xaba   :  { %v3894_v4 = vpop.eup %3893 }
 0xabb   :  { %v3896_v62 = vpop.eup %3895  ;;  %v2303_v35 = vmul.f32 %v3894_v4, %v2301_v49 }
 0xabc   :  { %v3898_v61 = vpop.eup %3897  ;;  %v2296_v2 = vadd.f32 1.0, %v3896_v62 }
 0xabd   :  { %v2305_v10 = vadd.f32 %v2303_v35, %v2269_v34  ;;  %v2304_v28 = vmul.f32 %v3898_v61, %v2302_v44  ;;  %v2412_v34 = vunpack.c.l.bf16 %v4516_v57 }
 0xabf   :  { %3899 = vtanh.f32 %v2305_v10  ;;  %v2306_v58 = vadd.f32 %v2304_v28, %v2272_v56  ;;  %v2415_v56 = vunpack.c.h.bf16 %v4516_v57 }
 0xac0   :  { %3901 = vrcp.f32 %v2295_v24 }
 0xac1   :  { %3903 = vtanh.f32 %v2306_v58 }
 0xac2   :  { %3905 = vrcp.f32 %v2296_v2 }
 0xac9   :  { %v3900_v48 = vpop.eup %3899 }
 0xaca   :  { %v3902_v0 = vpop.eup %3901  ;;  %v2309_v32 = vsub.f32 %v4809_v5, %v3900_v48  ;;  %v2410_v5 = vunpack.c.l.bf16 %v4401_v37 }
 0xacb   :  { %v3904_v50 = vpop.eup %3903 }
 0xacc   :  { %v2311_v23 = vmul.f32 %v3902_v0, %v2309_v32  ;;  %v2310_v27 = vsub.f32 %v4811_v52, %v3904_v50  ;;  %v3906_v22 = vpop.eup %3905 }
 0xace   :  { %v2312_v63 = vmul.f32 %v3906_v22, %v2310_v27  ;;  %v4839_v6 = vadd.f32 %v3900_v48, %v2311_v23 }
 0xad0   :  { %v4841_v40 = vadd.f32 %v3904_v50, %v2312_v63 }
 0xad2   :  { %v2315_v47 = vpack.c.bf16 %v4841_v40, %v4839_v6 }
 0xad4   :  { %2317 = vst.msk [vmem:[#allocation4 + $0x8] sm:$0xff] %vm189_vm0, %v2315_v47  ;;  %3334 = vmatmul.mubr.msk.bf16.vlgmr.msra.gmra.mrb[80].mxu0 %vm189_vm0, %v2315_v47  ;;  %3584 = vmatmul.mubr.msk.bf16.vlgmr.msra.gmra.mrb[104].mxu1 %vm189_vm0, %v2315_v47 }
 0xad5   :  { %2470 = vmatpush1.bf16.msra.mxu0 %v4734_v11  ;;  %3588 = vmatpush3.bf16.msra.mxu1 %v4740_v14 }
 0xad6   :  { %2471 = vmatprep.subr.bf16.mxu0 %v4747_v45  ;;  %3589 = vmatprep.subr.bf16.mxu1 %v5098_v8 }
 0xad7   :  { %2501 = vmatprep.mubr.bf16.mxu0 %v5099_v26  ;;  %3591 = vmatprep.mubr.msk.bf16.mxu1 %vm4016_vm1, %v5098_v8 }
 0xad9   :  { %2472 = vmatpush1.bf16.msra.mxu0 %v4752_v38  ;;  %3590 = vmatpush3.bf16.msra.mxu1 %v4757_v54 }
 0xada   :  { %2612 = vmatprep.subr.bf16.mxu0 %v4729_v31  ;;  %3595 = vmatprep.subr.bf16.mxu1 %v5098_v8 }
 0xba7   :  { %v2360_v52 = vpop.f32.mrb[80].mxu0  ;;  %v2403_v19 = vpop.f32.mrb[104].mxu1 }
 0xba8   :  { %v2416_v43 = vadd.f32 %v2410_v5, %v2360_v52  ;;  %v2362_v36 = vpop.f32.mrb[81].mxu0  ;;  %v3585_v13 = vpop.f32.mrb[105].mxu1  ;;  %v2444_v7 = vadd.f32 %v4801_v15, %v2403_v19  ;;  %v2554_v19 = vunpack.c.l.bf16 %v4415_v42 }
 0xba9   :  { %v2430_v39 = vadd.f32 %v2411_v60, %v2362_v36  ;;  %v2364_v17 = vpop.f32.mrb[82].mxu0  ;;  %v2406_v30 = vpop.f32.mrb[106].mxu1  ;;  %v2556_v13 = vunpack.c.h.bf16 %v4413_v41 }
 0xbaa   :  { %v3336_v16 = vmul.f32 -1.442695, %v2416_v43  ;;  %v2417_v59 = vadd.f32 %v2413_v25, %v2364_v17  ;;  %v2366_v29 = vpop.f32.mrb[83].mxu0  ;;  %v3586_v33 = vpop.f32.mrb[107].mxu1  ;;  %v2445_v44 = vadd.f32 %v4801_v15, %v2406_v30  ;;  %v2557_v30 = vunpack.c.h.bf16 %v4415_v42 }
 0xbab   :  { %v2431_v21 = vadd.f32 %v2414_v20, %v2366_v29  ;;  %v3338_v18 = vmul.f32 -1.442695, %v2430_v39 }
 0xbac   :  { %3907 = vpow2.f32 %v3336_v16  ;;  %v3337_v3 = vmul.f32 -1.442695, %v2417_v59 }
 0xbad   :  { %v3339_v9 = vmul.f32 -1.442695, %v2431_v21 }
 0xbae   :  { %3909 = vpow2.f32 %v3337_v3 }
 0xbaf   :  { %3911 = vpow2.f32 %v3338_v18 }
 0xbb6   :  { %v3908_v1 = vpop.eup %3907 }
 0xbb7   :  { %v2424_v46 = vadd.f32 1.0, %v3908_v1 }
 0xbb8   :  { %v3910_v12 = vpop.eup %3909 }
 0xbb9   :  { %3913 = vrcp.f32 %v2424_v46  ;;  %v2425_v37 = vadd.f32 1.0, %v3910_v12  ;;  %v3912_v49 = vpop.eup %3911 }
 0xbba   :  { %3915 = vpow2.f32 %v3339_v9  ;;  %v2438_v24 = vadd.f32 1.0, %v3912_v49 }
 0xbbb   :  { %3917 = vrcp.f32 %v2425_v37 }
 0xbc3   :  { %v3914_v4 = vpop.eup %3913 }
 0xbc4   :  { %v3916_v62 = vpop.eup %3915  ;;  %v2446_v35 = vmul.f32 %v3914_v4, %v2444_v7  ;;  %v2555_v7 = vunpack.c.l.bf16 %v4518_v51 }
 0xbc5   :  { %v3918_v61 = vpop.eup %3917  ;;  %v2439_v2 = vadd.f32 1.0, %v3916_v62 }
 0xbc6   :  { %v2448_v10 = vadd.f32 %v2446_v35, %v2412_v34  ;;  %v2447_v28 = vmul.f32 %v3918_v61, %v2445_v44  ;;  %v2558_v44 = vunpack.c.h.bf16 %v4518_v51 }
 0xbc8   :  { %3919 = vtanh.f32 %v2448_v10  ;;  %v2449_v58 = vadd.f32 %v2447_v28, %v2415_v56 }
 0xbc9   :  { %3921 = vrcp.f32 %v2438_v24 }
 0xbca   :  { %3923 = vtanh.f32 %v2449_v58 }
 0xbcb   :  { %3925 = vrcp.f32 %v2439_v2 }
 0xbd2   :  { %v3920_v48 = vpop.eup %3919 }
 0xbd3   :  { %v3922_v0 = vpop.eup %3921  ;;  %v2452_v32 = vsub.f32 %v4839_v6, %v3920_v48  ;;  %v2553_v6 = vunpack.c.l.bf16 %v4413_v41 }
 0xbd4   :  { %v3924_v50 = vpop.eup %3923 }
 0xbd5   :  { %v2454_v23 = vmul.f32 %v3922_v0, %v2452_v32  ;;  %v2453_v27 = vsub.f32 %v4841_v40, %v3924_v50  ;;  %v3926_v22 = vpop.eup %3925 }
 0xbd7   :  { %v2455_v63 = vmul.f32 %v3926_v22, %v2453_v27  ;;  %v4869_v47 = vadd.f32 %v3920_v48, %v2454_v23 }
 0xbd9   :  { %v4871_v57 = vadd.f32 %v3924_v50, %v2455_v63  ;;  %v2696_v63 = vunpack.c.l.bf16 %v4425_v53 }
 0xbdb   :  { %v2458_v5 = vpack.c.bf16 %v4871_v57, %v4869_v47 }
 0xbdd   :  { %2460 = vst.msk [vmem:[#allocation4 + $0x10] sm:$0xff] %vm189_vm0, %v2458_v5  ;;  %3340 = vmatmul.mubr.msk.bf16.vlgmr.msra.gmra.mrb[84].mxu0 %vm189_vm0, %v2458_v5  ;;  %3592 = vmatmul.mubr.msk.bf16.vlgmr.msra.gmra.mrb[108].mxu1 %vm189_vm0, %v2458_v5  ;;  %v2697_v5 = vunpack.c.l.bf16 %v4427_v55 }
 0xbde   :  { %2613 = vmatpush1.bf16.msra.mxu0 %v4734_v11  ;;  %3596 = vmatpush3.bf16.msra.mxu1 %v4740_v14 }
 0xbdf   :  { %2614 = vmatprep.subr.bf16.mxu0 %v4747_v45  ;;  %3597 = vmatprep.subr.bf16.mxu1 %v5098_v8 }
 0xbe0   :  { %2644 = vmatprep.mubr.bf16.mxu0 %v5099_v26  ;;  %3599 = vmatprep.mubr.msk.bf16.mxu1 %vm4016_vm1, %v5098_v8 }
 0xbe2   :  { %2615 = vmatpush1.bf16.msra.mxu0 %v4752_v38  ;;  %3598 = vmatpush3.bf16.msra.mxu1 %v4757_v54 }
 0xbe3   :  { %2755 = vmatprep.subr.bf16.mxu0 %v4729_v31  ;;  %3603 = vmatprep.subr.bf16.mxu1 %v5098_v8 }
 0xcb0   :  { %v2503_v40 = vpop.f32.mrb[84].mxu0  ;;  %v2546_v52 = vpop.f32.mrb[108].mxu1 }
 0xcb1   :  { %v2559_v60 = vadd.f32 %v2553_v6, %v2503_v40  ;;  %v2505_v43 = vpop.f32.mrb[85].mxu0  ;;  %v3593_v36 = vpop.f32.mrb[109].mxu1  ;;  %v2587_v42 = vadd.f32 %v4801_v15, %v2546_v52 }
 0xcb2   :  { %v2573_v25 = vadd.f32 %v2554_v19, %v2505_v43  ;;  %v2507_v39 = vpop.f32.mrb[86].mxu0  ;;  %v2549_v17 = vpop.f32.mrb[110].mxu1  ;;  %v2699_v19 = vunpack.c.h.bf16 %v4425_v53 }
 0xcb3   :  { %v3342_v20 = vmul.f32 -1.442695, %v2559_v60  ;;  %v2560_v16 = vadd.f32 %v2556_v13, %v2507_v39  ;;  %v2509_v59 = vpop.f32.mrb[87].mxu0  ;;  %v3594_v29 = vpop.f32.mrb[111].mxu1  ;;  %v2588_v62 = vadd.f32 %v4801_v15, %v2549_v17  ;;  %v2700_v13 = vunpack.c.h.bf16 %v4427_v55 }
 0xcb4   :  { %v2574_v33 = vadd.f32 %v2557_v30, %v2509_v59  ;;  %v3344_v3 = vmul.f32 -1.442695, %v2573_v25 }
 0xcb5   :  { %3927 = vpow2.f32 %v3342_v20  ;;  %v3343_v21 = vmul.f32 -1.442695, %v2560_v16 }
 0xcb6   :  { %v3345_v1 = vmul.f32 -1.442695, %v2574_v33 }
 0xcb7   :  { %3929 = vpow2.f32 %v3343_v21 }
 0xcb8   :  { %3931 = vpow2.f32 %v3344_v3 }
 0xcbf   :  { %v3928_v18 = vpop.eup %3927 }
 0xcc0   :  { %v2567_v9 = vadd.f32 1.0, %v3928_v18 }
 0xcc1   :  { %v3930_v46 = vpop.eup %3929 }
 0xcc2   :  { %3933 = vrcp.f32 %v2567_v9  ;;  %v2568_v41 = vadd.f32 1.0, %v3930_v46  ;;  %v3932_v12 = vpop.eup %3931  ;;  %v5100_v9 = vld [vmem:[#allocation9_spill] sm:$0xff] }
 0xcc3   :  { %3935 = vpow2.f32 %v3345_v1  ;;  %v2581_v35 = vadd.f32 1.0, %v3932_v12  ;;  %v2698_v46 = vunpack.c.l.bf16 %v5100_v9 }
 0xcc4   :  { %3937 = vrcp.f32 %v2568_v41 }
 0xccc   :  { %v3934_v37 = vpop.eup %3933 }
 0xccd   :  { %v3936_v49 = vpop.eup %3935  ;;  %v2589_v4 = vmul.f32 %v3934_v37, %v2587_v42 }
 0xcce   :  { %v3938_v34 = vpop.eup %3937  ;;  %v2582_v10 = vadd.f32 1.0, %v3936_v49  ;;  %v2701_v49 = vunpack.c.h.bf16 %v5100_v9 }
 0xccf   :  { %v2591_v61 = vadd.f32 %v2589_v4, %v2555_v7  ;;  %v2590_v24 = vmul.f32 %v3938_v34, %v2588_v62 }
 0xcd1   :  { %3939 = vtanh.f32 %v2591_v61  ;;  %v2592_v56 = vadd.f32 %v2590_v24, %v2558_v44 }
 0xcd2   :  { %3941 = vrcp.f32 %v2581_v35 }
 0xcd3   :  { %3943 = vtanh.f32 %v2592_v56 }
 0xcd4   :  { %3945 = vrcp.f32 %v2582_v10 }
 0xcdb   :  { %v3940_v28 = vpop.eup %3939 }
 0xcdc   :  { %v3942_v58 = vpop.eup %3941  ;;  %v2595_v2 = vsub.f32 %v4869_v47, %v3940_v28 }
 0xcdd   :  { %v3944_v48 = vpop.eup %3943 }
 0xcde   :  { %v2597_v0 = vmul.f32 %v3942_v58, %v2595_v2  ;;  %v2596_v32 = vsub.f32 %v4871_v57, %v3944_v48  ;;  %v3946_v50 = vpop.eup %3945 }
 0xce0   :  { %v2598_v23 = vmul.f32 %v3946_v50, %v2596_v32  ;;  %v4899_v27 = vadd.f32 %v3940_v28, %v2597_v0  ;;  %v5101_v32 = vld [vmem:[#allocation5_spill] sm:$0xff] }
 0xce1   :  { %v2839_v50 = vunpack.c.l.bf16 %v5101_v32 }
 0xce2   :  { %v4901_v51 = vadd.f32 %v3944_v48, %v2598_v23 }
 0xce4   :  { %v2601_v22 = vpack.c.bf16 %v4901_v51, %v4899_v27 }
 0xce6   :  { %2603 = vst.msk [vmem:[#allocation4 + $0x18] sm:$0xff] %vm189_vm0, %v2601_v22  ;;  %3346 = vmatmul.mubr.msk.bf16.vlgmr.msra.gmra.mrb[88].mxu0 %vm189_vm0, %v2601_v22  ;;  %3600 = vmatmul.mubr.msk.bf16.vlgmr.msra.gmra.mrb[112].mxu1 %vm189_vm0, %v2601_v22 }
 0xce7   :  { %2756 = vmatpush1.bf16.msra.mxu0 %v4734_v11  ;;  %3604 = vmatpush3.bf16.msra.mxu1 %v4740_v14 }
 0xce8   :  { %2757 = vmatprep.subr.bf16.mxu0 %v4747_v45  ;;  %3605 = vmatprep.subr.bf16.mxu1 %v5098_v8 }
 0xce9   :  { %2787 = vmatprep.mubr.bf16.mxu0 %v5099_v26  ;;  %3607 = vmatprep.mubr.msk.bf16.mxu1 %vm4016_vm1, %v5098_v8 }
 0xceb   :  { %2758 = vmatpush1.bf16.msra.mxu0 %v4752_v38  ;;  %3606 = vmatpush3.bf16.msra.mxu1 %v4757_v54 }
 0xcec   :  { %2898 = vmatprep.subr.bf16.mxu0 %v4729_v31  ;;  %3611 = vmatprep.subr.bf16.mxu1 %v5098_v8 }
 0xdb9   :  { %v2646_v47 = vpop.f32.mrb[88].mxu0  ;;  %v2689_v57 = vpop.f32.mrb[112].mxu1 }
 0xdba   :  { %v2702_v6 = vadd.f32 %v2696_v63, %v2646_v47  ;;  %v2648_v40 = vpop.f32.mrb[89].mxu0  ;;  %v3601_v52 = vpop.f32.mrb[113].mxu1  ;;  %v2730_v55 = vadd.f32 %v4801_v15, %v2689_v57 }
 0xdbb   :  { %v2716_v60 = vadd.f32 %v2697_v5, %v2648_v40  ;;  %v2650_v43 = vpop.f32.mrb[90].mxu0  ;;  %v2692_v36 = vpop.f32.mrb[114].mxu1 }
 0xdbc   :  { %v3348_v25 = vmul.f32 -1.442695, %v2702_v6  ;;  %v2703_v31 = vadd.f32 %v2699_v19, %v2650_v43  ;;  %v2652_v39 = vpop.f32.mrb[91].mxu0  ;;  %v3602_v17 = vpop.f32.mrb[115].mxu1  ;;  %v2731_v12 = vadd.f32 %v4801_v15, %v2692_v36 }
 0xdbd   :  { %v2717_v30 = vadd.f32 %v2700_v13, %v2652_v39  ;;  %v3350_v16 = vmul.f32 -1.442695, %v2716_v60 }
 0xdbe   :  { %3947 = vpow2.f32 %v3348_v25  ;;  %v3349_v20 = vmul.f32 -1.442695, %v2703_v31 }
 0xdbf   :  { %v3351_v29 = vmul.f32 -1.442695, %v2717_v30 }
 0xdc0   :  { %3949 = vpow2.f32 %v3349_v20 }
 0xdc1   :  { %3951 = vpow2.f32 %v3350_v16  ;;  %v5103_v16 = vld [vmem:[#allocation10_spill] sm:$0xff] }
 0xdc8   :  { %v3948_v59 = vpop.eup %3947 }
 0xdc9   :  { %v2710_v33 = vadd.f32 1.0, %v3948_v59  ;;  %v2841_v59 = vunpack.c.l.bf16 %v5103_v16 }
 0xdca   :  { %v3950_v21 = vpop.eup %3949 }
 0xdcb   :  { %3953 = vrcp.f32 %v2710_v33  ;;  %v2711_v53 = vadd.f32 1.0, %v3950_v21  ;;  %v3952_v3 = vpop.eup %3951 }
 0xdcc   :  { %3955 = vpow2.f32 %v3351_v29  ;;  %v2724_v37 = vadd.f32 1.0, %v3952_v3  ;;  %v2844_v3 = vunpack.c.h.bf16 %v5103_v16 }
 0xdcd   :  { %3957 = vrcp.f32 %v2711_v53 }
 0xdd5   :  { %v3954_v18 = vpop.eup %3953 }
 0xdd6   :  { %v3956_v1 = vpop.eup %3955  ;;  %v2732_v41 = vmul.f32 %v3954_v18, %v2730_v55 }
 0xdd7   :  { %v3958_v42 = vpop.eup %3957  ;;  %v2725_v34 = vadd.f32 1.0, %v3956_v1 }
 0xdd8   :  { %v2734_v7 = vadd.f32 %v2732_v41, %v2698_v46  ;;  %v2733_v4 = vmul.f32 %v3958_v42, %v2731_v12 }
 0xdda   :  { %3959 = vtanh.f32 %v2734_v7  ;;  %v2735_v62 = vadd.f32 %v2733_v4, %v2701_v49 }
 0xddb   :  { %3961 = vrcp.f32 %v2724_v37 }
 0xddc   :  { %3963 = vtanh.f32 %v2735_v62 }
 0xddd   :  { %3965 = vrcp.f32 %v2725_v34 }
 0xde4   :  { %v3960_v35 = vpop.eup %3959 }
 0xde5   :  { %v3962_v44 = vpop.eup %3961  ;;  %v2738_v61 = vsub.f32 %v4899_v27, %v3960_v35 }
 0xde6   :  { %v3964_v24 = vpop.eup %3963 }
 0xde7   :  { %v2740_v56 = vmul.f32 %v3962_v44, %v2738_v61  ;;  %v2739_v10 = vsub.f32 %v4901_v51, %v3964_v24  ;;  %v3966_v28 = vpop.eup %3965  ;;  %v3706_v61 = vld [vmem:[%s5077_s10 + $0x8] sm:$0xff]  }
 0xde9   :  { %v2741_v58 = vmul.f32 %v3966_v28, %v2739_v10  ;;  %v4929_v2 = vadd.f32 %v3960_v35, %v2740_v56  ;;  %v3705_v35 = vld [vmem:[%s5077_s10] sm:$0xff]   ;;  %v3034_v56 = vld [vmem:[#allocation4 + $0x8] sm:$0xff]  ;;  %v3035_v10 = vld [vmem:[#allocation4 + $0x10] sm:$0xff] }
 0xdea   :  { %v3036_v28 = vld [vmem:[#allocation4 + $0x18] sm:$0xff] }
 0xdeb   :  { %v4931_v48 = vadd.f32 %v3964_v24, %v2741_v58  ;;  %v3033_v24 = vld [vmem:[#allocation4] sm:$0xff] }
 0xded   :  { %v2744_v0 = vpack.c.bf16 %v4931_v48, %v4929_v2 }
 0xdef   :  { %2746 = vst.msk [vmem:[#allocation4 + $0x20] sm:$0xff] %vm189_vm0, %v2744_v0  ;;  %3352 = vmatmul.mubr.msk.bf16.vlgmr.msra.gmra.mrb[92].mxu0 %vm189_vm0, %v2744_v0  ;;  %3608 = vmatmul.mubr.msk.bf16.vlgmr.msra.gmra.mrb[116].mxu1 %vm189_vm0, %v2744_v0 }
 0xdf0   :  { %2899 = vmatpush1.bf16.msra.mxu0 %v4734_v11  ;;  %3612 = vmatpush3.bf16.msra.mxu1 %v4740_v14  ;;  %v5102_v14 = vld [vmem:[#allocation6_spill] sm:$0xff] }
 0xdf1   :  { %2900 = vmatprep.subr.bf16.mxu0 %v4747_v45  ;;  %3613 = vmatprep.subr.bf16.mxu1 %v5098_v8  ;;  %v2840_v27 = vunpack.c.l.bf16 %v5102_v14 }
 0xdf2   :  { %2930 = vmatprep.mubr.bf16.mxu0 %v5099_v26  ;;  %3615 = vmatprep.mubr.msk.bf16.mxu1 %vm4016_vm1, %v5098_v8  ;;  %v2842_v26 = vunpack.c.h.bf16 %v5101_v32 }
 0xdf4   :  { %2901 = vmatpush1.bf16.msra.mxu0 %v4752_v38  ;;  %3614 = vmatpush3.bf16.msra.mxu1 %v4757_v54  ;;  %v2843_v38 = vunpack.c.h.bf16 %v5102_v14 }
 0xdf5   :  { %3619 = vmatprep.subr.bf16.mxu0 %v5098_v8 }
 0xdf6   :  { %v3037_v58 = vld [vmem:[#allocation4 + $0x20] sm:$0xff] }
 0xec2   :  { %v2789_v11 = vpop.f32.mrb[92].mxu0  ;;  %v2832_v23 = vpop.f32.mrb[116].mxu1 }
 0xec3   :  { %v2845_v45 = vadd.f32 %v2839_v50, %v2789_v11  ;;  %v2791_v51 = vpop.f32.mrb[93].mxu0  ;;  %v3609_v22 = vpop.f32.mrb[117].mxu1  ;;  %v2873_v17 = vadd.f32 %v4801_v15, %v2832_v23  ;;  %v5105_v11 = vld [vmem:[#allocation8_spill] sm:$0xff] }
 0xec4   :  { %v2859_v63 = vadd.f32 %v2840_v27, %v2791_v51  ;;  %v2793_v47 = vpop.f32.mrb[94].mxu0  ;;  %v2835_v57 = vpop.f32.mrb[118].mxu1  ;;  %v2983_v23 = vunpack.c.l.bf16 %v5105_v11 }
 0xec5   :  { %v3354_v5 = vmul.f32 -1.442695, %v2845_v45  ;;  %v2846_v54 = vadd.f32 %v2842_v26, %v2793_v47  ;;  %v2795_v6 = vpop.f32.mrb[95].mxu0  ;;  %v3610_v40 = vpop.f32.mrb[119].mxu1  ;;  %v2874_v33 = vadd.f32 %v4801_v15, %v2835_v57  ;;  %v2986_v47 = vunpack.c.h.bf16 %v5105_v11 }
 0xec6   :  { %v2860_v52 = vadd.f32 %v2843_v38, %v2795_v6  ;;  %v3356_v60 = vmul.f32 -1.442695, %v2859_v63  ;;  %v5001_v40 = vld [vmem:[%s5078_s11] ss:$0 sm:$0xff] }
 0xec7   :  { %3967 = vpow2.f32 %v3354_v5  ;;  %v3355_v19 = vmul.f32 -1.442695, %v2846_v54 }
 0xec8   :  { %v3357_v36 = vmul.f32 -1.442695, %v2860_v52 }
 0xec9   :  { %3969 = vpow2.f32 %v3355_v19 }
 0xeca   :  { %3971 = vpow2.f32 %v3356_v60 }
 0xed1   :  { %v3968_v43 = vpop.eup %3967 }
 0xed2   :  { %v2853_v13 = vadd.f32 1.0, %v3968_v43 }
 0xed3   :  { %v3970_v25 = vpop.eup %3969 }
 0xed4   :  { %3973 = vrcp.f32 %v2853_v13  ;;  %v2854_v31 = vadd.f32 1.0, %v3970_v25  ;;  %v3972_v39 = vpop.eup %3971 }
 0xed5   :  { %3975 = vpow2.f32 %v3357_v36  ;;  %v2867_v53 = vadd.f32 1.0, %v3972_v39 }
 0xed6   :  { %3977 = vrcp.f32 %v2854_v31 }
 0xede   :  { %v3974_v30 = vpop.eup %3973 }
 0xedf   :  { %v3976_v20 = vpop.eup %3975  ;;  %v2875_v29 = vmul.f32 %v3974_v30, %v2873_v17 }
 0xee0   :  { %v3978_v21 = vpop.eup %3977  ;;  %v2868_v9 = vadd.f32 1.0, %v3976_v20 }
 0xee1   :  { %v2877_v55 = vadd.f32 %v2875_v29, %v2841_v59  ;;  %v2876_v18 = vmul.f32 %v3978_v21, %v2874_v33 }
 0xee3   :  { %3979 = vtanh.f32 %v2877_v55  ;;  %v2878_v1 = vadd.f32 %v2876_v18, %v2844_v3 }
 0xee4   :  { %3981 = vrcp.f32 %v2867_v53 }
 0xee5   :  { %3983 = vtanh.f32 %v2878_v1 }
 0xee6   :  { %3985 = vrcp.f32 %v2868_v9 }
 0xeed   :  { %v3980_v46 = vpop.eup %3979 }
 0xeee   :  { %v3982_v41 = vpop.eup %3981  ;;  %v2881_v12 = vsub.f32 %v4929_v2, %v3980_v46 }
 0xeef   :  { %v3984_v42 = vpop.eup %3983 }
 0xef0   :  { %v2883_v37 = vmul.f32 %v3982_v41, %v2881_v12  ;;  %v2882_v49 = vsub.f32 %v4931_v48, %v3984_v42  ;;  %v3986_v7 = vpop.eup %3985  ;;  %v5104_v48 = vld [vmem:[#allocation7_spill] sm:$0xff] }
 0xef1   :  { %v2982_v0 = vunpack.c.l.bf16 %v5104_v48  ;;  %v2985_v51 = vunpack.c.h.bf16 %v5104_v48 }
 0xef2   :  { %v2884_v4 = vmul.f32 %v3986_v7, %v2882_v49  ;;  %v4958_v62 = vadd.f32 %v3980_v46, %v2883_v37  ;;  %v5106_v49 = vld [vmem:[#allocation11_spill] sm:$0xff] }
 0xef3   :  { %v2984_v7 = vunpack.c.l.bf16 %v5106_v49 }
 0xef4   :  { %v4960_v34 = vadd.f32 %v3984_v42, %v2884_v4 }
 0xef6   :  { %v2887_v44 = vpack.c.bf16 %v4960_v34, %v4958_v62 }
 0xef8   :  { %2889 = vst.msk [vmem:[#allocation4 + $0x28] sm:$0xff] %vm189_vm0, %v2887_v44  ;;  %3358 = vmatmul.mubr.msk.bf16.vlgmr.msra.gmra.mrb[96].mxu0 %vm189_vm0, %v2887_v44  ;;  %3616 = vmatmul.mubr.msk.bf16.vlgmr.msra.gmra.mrb[120].mxu1 %vm189_vm0, %v2887_v44 }
 0xef9   :  { %3620 = vmatpush3.bf16.msra.mxu0 %v3705_v35  ;;  %3623 = vmatprep.mubr.msk.bf16.mxu0 %vm4016_vm1, %v5098_v8 }
 0xefa   :  { %3621 = vmatprep.subr.bf16.mxu0 %v5098_v8 }
 0xefd   :  { %3622 = vmatpush3.bf16.msra.mxu0 %v3706_v61 }
 0xeff   :  { %v3038_v2 = vld [vmem:[#allocation4 + $0x28] sm:$0xff] }
 0xf00   :  { %3624 = vmatmul.mubr.msk.bf16.vlgmr.msra.gmra.mrb[100].mxu0 %vm189_vm0, %v3033_v24  ;;  %v2987_v24 = vunpack.c.h.bf16 %v5106_v49 }
 0xf01   :  { %3627 = vmatprep.mubr.msk.bf16.mxu0 %vm4016_vm1, %v5098_v8 }
 0xf08   :  { %3628 = vmatmul.mubr.msk.bf16.gmra.mrb[104].mxu0 %vm189_vm0, %v3034_v56 }
 0xf09   :  { %3631 = vmatprep.mubr.msk.bf16.mxu0 %vm4016_vm1, %v5098_v8 }
 0xf10   :  { %3632 = vmatmul.mubr.msk.bf16.gmra.mrb[108].mxu0 %vm189_vm0, %v3035_v10 }
 0xf11   :  { %3635 = vmatprep.mubr.msk.bf16.mxu0 %vm4016_vm1, %v5098_v8 }
 0xf18   :  { %3636 = vmatmul.mubr.msk.bf16.gmra.mrb[112].mxu0 %vm189_vm0, %v3036_v28 }
 0xf19   :  { %3639 = vmatprep.mubr.msk.bf16.mxu0 %vm4016_vm1, %v5098_v8 }
 0xf20   :  { %3640 = vmatmul.mubr.msk.bf16.gmra.mrb[116].mxu0 %vm189_vm0, %v3037_v58 }
 0xf21   :  { %3643 = vmatprep.mubr.msk.bf16.mxu0 %vm4016_vm1, %v5098_v8 }
 0xf28   :  { %3644 = vmatmul.mubr.msk.bf16.gmra.mrb[120].mxu0 %vm189_vm0, %v3038_v2 }
 0xf29   :  { %3647 = vmatprep.mubr.msk.bf16.mxu0 %vm4016_vm1, %v5098_v8 }
 0xfcb   :  { %v2932_v32 = vpop.f32.mrb[96].mxu0  ;;  %v2975_v50 = vpop.f32.mrb[120].mxu1 }
 0xfcc   :  { %v2988_v14 = vadd.f32 %v2982_v0, %v2932_v32  ;;  %v2934_v27 = vpop.f32.mrb[97].mxu0  ;;  %v3617_v45 = vpop.f32.mrb[121].mxu1  ;;  %v3016_v46 = vadd.f32 %v4801_v15, %v2975_v50 }
 0xfcd   :  { %v3002_v22 = vadd.f32 %v2983_v23, %v2934_v27  ;;  %v2936_v26 = vpop.f32.mrb[98].mxu0  ;;  %v2978_v63 = vpop.f32.mrb[122].mxu1 }
 0xfce   :  { %v3360_v57 = vmul.f32 -1.442695, %v2988_v14  ;;  %v2989_v38 = vadd.f32 %v2985_v51, %v2936_v26  ;;  %v2938_v5 = vpop.f32.mrb[99].mxu0  ;;  %v3618_v8 = vpop.f32.mrb[123].mxu1  ;;  %v3017_v35 = vadd.f32 %v4801_v15, %v2978_v63 }
 0xfcf   :  { %v3003_v54 = vadd.f32 %v2986_v47, %v2938_v5  ;;  %v3362_v25 = vmul.f32 -1.442695, %v3002_v22 }
 0xfd0   :  { %3987 = vpow2.f32 %v3360_v57  ;;  %v3361_v6 = vmul.f32 -1.442695, %v2989_v38 }
 0xfd1   :  { %v3363_v39 = vmul.f32 -1.442695, %v3003_v54 }
 0xfd2   :  { %3989 = vpow2.f32 %v3361_v6 }
 0xfd3   :  { %v3119_v52 = vpop.f32.mrb[100].mxu0  ;;  %3991 = vpow2.f32 %v3362_v25 }
 0xfd4   :  { %v3120_v19 = vadd.f32 %v5001_v40, %v3119_v52  ;;  %v3625_v60 = vpop.f32.mrb[101].mxu0 }
 0xfd5   :  { %v3122_v43 = vpop.f32.mrb[102].mxu0 }
 0xfd6   :  { %3174 = vst [vmem:[%s5079_s12] sm:$0xff] %v3120_v19  ;;  %v3123_v36 = vadd.f32 %v5001_v40, %v3122_v43  ;;  %v3626_v13 = vpop.f32.mrb[103].mxu0 }
 0xfd8   :  { %3175 = vst [vmem:[%s5079_s12 + $0x8] sm:$0xff] %v3123_v36 }
 0xfda   :  { %v3988_v31 = vpop.eup %3987 }
 0xfdb   :  { %v2996_v17 = vadd.f32 1.0, %v3988_v31  ;;  %v3127_v30 = vpop.f32.mrb[104].mxu0 }
 0xfdc   :  { %v3990_v20 = vpop.eup %3989  ;;  %v3128_v16 = vadd.f32 %v5001_v40, %v3127_v30  ;;  %v3629_v59 = vpop.f32.mrb[105].mxu0 }
 0xfdd   :  { %3993 = vrcp.f32 %v2996_v17  ;;  %v2997_v29 = vadd.f32 1.0, %v3990_v20  ;;  %v3130_v33 = vpop.f32.mrb[106].mxu0  ;;  %v3992_v9 = vpop.eup %3991 }
 0xfde   :  { %3995 = vpow2.f32 %v3363_v39  ;;  %3176 = vst [vmem:[%s5079_s12 + $0x10] sm:$0xff] %v3128_v16  ;;  %v3131_v21 = vadd.f32 %v5001_v40, %v3130_v33  ;;  %v3630_v53 = vpop.f32.mrb[107].mxu0  ;;  %v3010_v61 = vadd.f32 1.0, %v3992_v9 }
 0xfdf   :  { %3997 = vrcp.f32 %v2997_v29 }
 0xfe0   :  { %3177 = vst [vmem:[%s5079_s12 + $0x18] sm:$0xff] %v3131_v21 }
 0xfe3   :  { %v3135_v3 = vpop.f32.mrb[108].mxu0 }
 0xfe4   :  { %v3136_v55 = vadd.f32 %v5001_v40, %v3135_v3  ;;  %v3633_v18 = vpop.f32.mrb[109].mxu0 }
 0xfe5   :  { %v3138_v1 = vpop.f32.mrb[110].mxu0 }
 0xfe6   :  { %3178 = vst [vmem:[%s5079_s12 + $0x20] sm:$0xff] %v3136_v55  ;;  %v3139_v41 = vadd.f32 %v5001_v40, %v3138_v1  ;;  %v3634_v12 = vpop.f32.mrb[111].mxu0 }
 0xfe7   :  { %v3994_v42 = vpop.eup %3993 }
 0xfe8   :  { %v3996_v37 = vpop.eup %3995  ;;  %v3018_v4 = vmul.f32 %v3994_v42, %v3016_v46  ;;  %3179 = vst [vmem:[%s5079_s12 + $0x28] sm:$0xff] %v3139_v41 }
 0xfe9   :  { %v3998_v44 = vpop.eup %3997  ;;  %v3011_v2 = vadd.f32 1.0, %v3996_v37 }
 0xfea   :  { %v3020_v56 = vadd.f32 %v3018_v4, %v2984_v7  ;;  %v3019_v10 = vmul.f32 %v3998_v44, %v3017_v35 }
 0xfeb   :  { %v3143_v28 = vpop.f32.mrb[112].mxu0 }
 0xfec   :  { %3999 = vtanh.f32 %v3020_v56  ;;  %v3021_v58 = vadd.f32 %v3019_v10, %v2987_v24  ;;  %v3144_v48 = vadd.f32 %v5001_v40, %v3143_v28  ;;  %v3637_v0 = vpop.f32.mrb[113].mxu0 }
 0xfed   :  { %4001 = vrcp.f32 %v3010_v61  ;;  %v3146_v32 = vpop.f32.mrb[114].mxu0 }
 0xfee   :  { %4003 = vtanh.f32 %v3021_v58  ;;  %3180 = vst [vmem:[%s5079_s12 + $0x30] sm:$0xff] %v3144_v48  ;;  %v3147_v15 = vadd.f32 %v5001_v40, %v3146_v32  ;;  %v3638_v50 = vpop.f32.mrb[115].mxu0 }
 0xfef   :  { %4005 = vrcp.f32 %v3011_v2 }
 0xff0   :  { %3181 = vst [vmem:[%s5079_s12 + $0x38] sm:$0xff] %v3147_v15 }
 0xff3   :  { %v3151_v11 = vpop.f32.mrb[116].mxu0 }
 0xff4   :  { %v3152_v23 = vadd.f32 %v5001_v40, %v3151_v11  ;;  %v3641_v14 = vpop.f32.mrb[117].mxu0 }
 0xff5   :  { %v3154_v27 = vpop.f32.mrb[118].mxu0 }
 0xff6   :  { %v4000_v45 = vpop.eup %3999  ;;  %3182 = vst [vmem:[%s5079_s12 + $0x40] sm:$0xff] %v3152_v23  ;;  %v3155_v51 = vadd.f32 %v5001_v40, %v3154_v27  ;;  %v3642_v22 = vpop.f32.mrb[119].mxu0 }
 0xff7   :  { %v4002_v26 = vpop.eup %4001  ;;  %v3024_v63 = vsub.f32 %v4958_v62, %v4000_v45 }
 0xff8   :  { %v4004_v47 = vpop.eup %4003  ;;  %3183 = vst [vmem:[%s5079_s12 + $0x48] sm:$0xff] %v3155_v51 }
 0xff9   :  { %v3026_v57 = vmul.f32 %v4002_v26, %v3024_v63  ;;  %v3025_v38 = vsub.f32 %v4960_v34, %v4004_v47  ;;  %v4006_v5 = vpop.eup %4005 }
 0xffb   :  { %v3028_v8 = vadd.f32 %v4000_v45, %v3026_v57  ;;  %v3027_v54 = vmul.f32 %v4006_v5, %v3025_v38  ;;  %v3159_v6 = vpop.f32.mrb[120].mxu0 }
 0xffc   :  { %v3160_v52 = vadd.f32 %v5001_v40, %v3159_v6  ;;  %v3645_v19 = vpop.f32.mrb[121].mxu0 }
 0xffd   :  { %v3029_v60 = vadd.f32 %v4004_v47, %v3027_v54  ;;  %v3162_v43 = vpop.f32.mrb[122].mxu0 }
 0xffe   :  { %3184 = vst [vmem:[%s5079_s12 + $0x50] sm:$0xff] %v3160_v52  ;;  %v3163_v62 = vadd.f32 %v5001_v40, %v3162_v43  ;;  %v3646_v36 = vpop.f32.mrb[123].mxu0 }
 0xfff   :  { %v3030_v13 = vpack.c.bf16 %v3029_v60, %v3028_v8 }
0x1000   :  { %3185 = vst [vmem:[%s5079_s12 + $0x58] sm:$0xff] %v3163_v62 }
0x1001   :  { %3032 = vst.msk [vmem:[#allocation4 + $0x30] sm:$0xff] %vm189_vm0, %v3030_v13 }
0x1008   :  { %v3039_v34 = vld [vmem:[#allocation4 + $0x30] sm:$0xff] }
0x1009   :  { %3648 = vmatmul.mubr.msk.bf16.gmra.mrb[124].mxu0 %vm189_vm0, %v3039_v34 }
0x10dc   :  { %v3167_v25 = vpop.f32.mrb[124].mxu0 }
0x10dd   :  { %v3168_v31 = vadd.f32 %v5001_v40, %v3167_v25  ;;  %v3649_v39 = vpop.f32.mrb[125].mxu0 }
0x10de   :  { %v3170_v17 = vpop.f32.mrb[126].mxu0 }
0x10df   :  { %3186 = vst [vmem:[%s5079_s12 + $0x60] sm:$0xff] %v3168_v31  ;;  %v3171_v30 = vadd.f32 %v5001_v40, %v3170_v17  ;;  %v3650_v20 = vpop.f32.mrb[127].mxu0 }
0x10e1   :  { %3187 = vst [vmem:[%s5079_s12 + $0x68] sm:$0xff] %v3171_v30 }

</bundles_post_ra>
